<compile_context>
chip_gen: v6e
topology: v6e:2x2x1
jax: 0.10.0
libtpu: 0.0.40
codegen_flags: <defaults>
</compile_context>

<pallas_src>
import functools

import jax
import jax.numpy as jnp
from jax.experimental import pallas as pl
from jax.experimental.pallas import tpu as pltpu

EPS = 1e-5          # nn.InstanceNorm2d default eps
NEG_SLOPE = 0.2     # nn.LeakyReLU(0.2)

try:
    _VMEM_LIMIT_BYTES = min(
        int(pltpu.get_tpu_info().vmem_capacity_bytes * 3 // 4),
        100 * 1024 * 1024)
except Exception:                     # fall back to a value safe on all gens
    _VMEM_LIMIT_BYTES = 48 * 1024 * 1024


# ----------------------------------------------------------------------------
# Fused kernel: in-VMEM im2col (shifted-slice matmuls) + bias + IN + LeakyReLU
# ----------------------------------------------------------------------------
def _conv_block_kernel(*refs, k, Ho, Wo, has_bias, do_norm, do_act, eps):
    """One (image, Cout-tile): conv via k*k shifted matmuls + fused epilogue."""
    if has_bias:
        x_ref, w_ref, b_ref, o_ref = refs
    else:
        x_ref, w_ref, o_ref = refs
        b_ref = None

    M = Ho * Wo
    ce = x_ref.shape[-1]
    xv = x_ref[0]                                       # (Hp, Wp, Ce) bf16

    acc = None
    for ki in range(k):                                 # unrolled: k*k MXU calls
        for kj in range(k):
            a = xv[ki:ki + Ho, kj:kj + Wo, :].reshape(M, ce)
            p = jnp.dot(a, w_ref[ki * k + kj],          # (M,Ce)x(Ce,Ct) f32 acc
                        preferred_element_type=jnp.float32)
            acc = p if acc is None else acc + p

    if has_bias:
        acc = acc + b_ref[...]                          # (1, Ct) f32 row

    if do_norm:                                         # InstanceNorm2d(affine=False)
        mean = jnp.mean(acc, axis=0, keepdims=True)     # single-pass stats
        ex2 = jnp.mean(acc * acc, axis=0, keepdims=True)
        inv = jax.lax.rsqrt(ex2 - mean * mean + eps)    # EUP rsqrt
        acc = acc * inv - mean * inv                    # fused normalize

    if do_act:                                          # LeakyReLU(0.2)
        acc = jnp.where(acc >= 0.0, acc, NEG_SLOPE * acc)

    o_ref[0] = acc.astype(o_ref.dtype)


# ----------------------------------------------------------------------------
# Convolution glue: pad / space-to-depth in plain JAX, everything else in Pallas
# ----------------------------------------------------------------------------
def conv_block(x, w, b, *, stride, do_norm, do_act, out_dtype, eps=EPS):
    """Conv2d(Cin,Cout,4,stride,1)[+bias][+InstanceNorm][+LeakyReLU], NHWC x."""
    N, H, W, Cin = x.shape
    Cout = w.shape[0]
    assert w.shape == (Cout, Cin, 4, 4) and stride in (1, 2)

    Ho = (H + 2 - 4) // stride + 1
    Wo = (W + 2 - 4) // stride + 1
    M = Ho * Wo

    xp = jnp.pad(x, ((0, 0), (1, 1), (1, 1), (0, 0)))
    if stride == 2:
        # 4x4/s2 conv on padded x == 2x2/s1 valid conv on its space-to-depth map.
        Hp, Wp = Ho + 1, Wo + 1
        xp = xp[:, :2 * Hp, :2 * Wp, :]
        xp = xp.reshape(N, Hp, 2, Wp, 2, Cin).transpose(0, 1, 3, 2, 4, 5)
        xp = xp.reshape(N, Hp, Wp, 4 * Cin)
        k, Ce = 2, 4 * Cin
        wm = (w.reshape(Cout, Cin, 2, 2, 2, 2)
               .transpose(2, 4, 3, 5, 1, 0)             # (bi, bj, p, q, ci, co)
               .reshape(4, 4 * Cin, Cout))
    else:
        Hp, Wp = H + 2, W + 2
        k, Ce = 4, Cin
        wm = w.transpose(2, 3, 1, 0).reshape(16, Cin, Cout)   # (ki*4+kj, ci, co)

    xp = xp.astype(jnp.bfloat16)                         # MXU operands in bf16
    wm = wm.astype(jnp.bfloat16)
    has_bias = b is not None

    # Optional Cout tiling -> second "parallel" grid axis (fills both v7x TCs
    # even at batch 1).  The x index map ignores it, so the feature map is not
    # re-DMA'd while Cout tiles cycle.
    ct = 128 if (Cout > 128 and Cout % 128 == 0) else Cout
    grid = (N, Cout // ct)

    in_specs = [
        pl.BlockSpec((1, Hp, Wp, Ce), lambda n, c: (n, 0, 0, 0)),
        pl.BlockSpec((k * k, Ce, ct), lambda n, c: (0, 0, c)),
    ]
    args = [xp, wm]
    if has_bias:
        in_specs.append(pl.BlockSpec((1, ct), lambda n, c: (0, c)))
        args.append(b.reshape(1, Cout).astype(jnp.float32))

    out = pl.pallas_call(
        functools.partial(_conv_block_kernel, k=k, Ho=Ho, Wo=Wo,
                          has_bias=has_bias, do_norm=do_norm, do_act=do_act,
                          eps=eps),
        out_shape=jax.ShapeDtypeStruct((N, M, Cout), out_dtype),
        grid=grid,
        in_specs=in_specs,
        out_specs=pl.BlockSpec((1, M, ct), lambda n, c: (n, 0, c)),
        compiler_params=pltpu.CompilerParams(
            dimension_semantics=("parallel", "parallel"),
            vmem_limit_bytes=_VMEM_LIMIT_BYTES),
    )(*args)
    return out.reshape(N, Ho, Wo, Cout)


# ----------------------------------------------------------------------------
# PatchDiscriminator parameters + forward (mirrors the PyTorch __init__/forward)
# ----------------------------------------------------------------------------
def build_patch_discriminator_params(key, in_nc=2, ndf=64, n_layers=3):
    """Same layer sequence as PatchDiscriminator.__init__ (instance norm)."""
    cfgs = [dict(cin=in_nc, cout=ndf, stride=2, bias=True, norm=False, act=True)]
    nf_mult = 1
    for n in range(1, n_layers):
        nf_prev, nf_mult = nf_mult, min(2 ** n, 8)
        cfgs.append(dict(cin=ndf * nf_prev, cout=ndf * nf_mult, stride=2,
                         bias=False, norm=True, act=True))
    nf_prev, nf_mult = nf_mult, min(2 ** n_layers, 8)
    cfgs.append(dict(cin=ndf * nf_prev, cout=ndf * nf_mult, stride=1,
                     bias=False, norm=True, act=True))
    cfgs.append(dict(cin=ndf * nf_mult, cout=1, stride=1,
                     bias=True, norm=False, act=False))

    params = []
    for k, cfg in zip(jax.random.split(key, len(cfgs)), cfgs):
        kw, kb = jax.random.split(k)
        w = 0.02 * jax.random.normal(kw, (cfg["cout"], cfg["cin"], 4, 4), jnp.float32)
        b = (0.01 * jax.random.normal(kb, (cfg["cout"],), jnp.float32)
             if cfg["bias"] else None)
        params.append(dict(cfg=cfg, w=w, b=b))
    return params


def patch_discriminator_forward(params, src, tgt):
    """forward(src, tgt) = model(cat([src, tgt], 1)); returns NCHW patch logits."""
    x = jnp.concatenate([src, tgt], axis=1)              # (N, in_nc, H, W)
    x = jnp.transpose(x, (0, 2, 3, 1))                   # NHWC once, at boundary
    last = len(params) - 1
    for i, p in enumerate(params):
        cfg = p["cfg"]
        w, b = p["w"], p["b"]
        true_cout = w.shape[0]
        is_last = i == last
        if is_last and true_cout < 8:
            # Lane-friendlier final conv: pad Cout -> 8, slice back afterwards.
            w = jnp.pad(w, ((0, 8 - true_cout), (0, 0), (0, 0), (0, 0)))
            if b is not None:
                b = jnp.pad(b, ((0, 8 - true_cout),))
        x = conv_block(x, w, b, stride=cfg["stride"], do_norm=cfg["norm"],
                       do_act=cfg["act"],
                       out_dtype=jnp.float32 if is_last else jnp.bfloat16)
        if x.shape[-1] != true_cout:
            x = x[..., :true_cout]
    return jnp.transpose(x, (0, 3, 1, 2))                # NCHW (N, 1, H', W')


# ----------------------------------------------------------------------------
# Pure-JAX f32 reference (for correctness check of the fused kernels)
# ----------------------------------------------------------------------------
def _reference_forward(params, src, tgt):
    x = jnp.concatenate([src, tgt], axis=1)
    for p in params:
        cfg = p["cfg"]
        y = jax.lax.conv_general_dilated(
            x, p["w"], window_strides=(cfg["stride"], cfg["stride"]),
            padding=((1, 1), (1, 1)),
            dimension_numbers=("NCHW", "OIHW", "NCHW"))
        if p["b"] is not None:
            y = y + p["b"].reshape(1, -1, 1, 1)
        if cfg["norm"]:
            mean = jnp.mean(y, axis=(2, 3), keepdims=True)
            var = jnp.mean((y - mean) ** 2, axis=(2, 3), keepdims=True)
            y = (y - mean) * jax.lax.rsqrt(var + EPS)
        if cfg["act"]:
            y = jnp.where(y >= 0.0, y, NEG_SLOPE * y)
        x = y
    return x


# ----------------------------------------------------------------------------
if __name__ == "__main__":
    key = jax.random.PRNGKey(0)
    kp, ks, kt = jax.random.split(key, 3)

    IN_NC, NDF, N_LAYERS = 2, 16, 3      # small but faithful configuration
    N, H, W = 2, 32, 32                  # src / tgt each contribute 1 channel

    params = build_patch_discriminator_params(kp, in_nc=IN_NC, ndf=NDF,
                                              n_layers=N_LAYERS)
    src = jax.random.normal(ks, (N, IN_NC // 2, H, W), jnp.float32)
    tgt = jax.random.normal(kt, (N, IN_NC // 2, H, W), jnp.float32)

    fwd = jax.jit(lambda s, t: patch_discriminator_forward(params, s, t))
    out = jax.block_until_ready(fwd(src, tgt))

    expect_hw = H // 8 - 2               # 3x stride-2 convs, then 2x (k=4, s=1, p=1)
    assert out.shape == (N, 1, expect_hw, expect_hw), out.shape
    assert bool(jnp.all(jnp.isfinite(out)))

    ref = _reference_forward(params, src, tgt)
    max_err = float(jnp.max(jnp.abs(out - ref)))
    assert max_err < 0.25, f"max abs err vs f32 reference: {max_err}"

    print("KERNEL_OK")
</pallas_src>

<mosaic_0001>
module attributes {stable_mosaic.version = 11 : i64} {
  func.func @_conv_block_kernel(%arg0: i32, %arg1: i32, %arg2: memref<1x17x17x8xbf16, #tpu.memory_space<vmem>>, %arg3: memref<4x8x16xbf16, #tpu.memory_space<vmem>>, %arg4: memref<1x16xf32, #tpu.memory_space<vmem>>, %arg5: memref<1x256x16xbf16, #tpu.memory_space<vmem>>) attributes {dimension_semantics = [#tpu.dimension_semantics<parallel>, #tpu.dimension_semantics<parallel>], iteration_bounds = array<i64: 2, 1>, scalar_prefetch = 0 : i64, scratch_operands = 0 : i64, tpu.core_type = #tpu.core_type<tc>, window_params = [{transform_indices = @transform_0, window_bounds = array<i64: 1, 17, 17, 8>}, {transform_indices = @transform_1, window_bounds = array<i64: 4, 8, 16>}, {transform_indices = @transform_2, window_bounds = array<i64: 1, 16>}, {transform_indices = @transform_3, window_bounds = array<i64: 1, 256, 16>}]} {
    %c0 = arith.constant 0 : index
    %c0_0 = arith.constant 0 : index
    %c0_1 = arith.constant 0 : index
    %c0_2 = arith.constant 0 : index
    %0 = vector.load %arg2[%c0, %c0_0, %c0_1, %c0_2] : memref<1x17x17x8xbf16, #tpu.memory_space<vmem>>, vector<1x17x17x8xbf16>
    %1 = vector.shape_cast %0 : vector<1x17x17x8xbf16> to vector<17x17x8xbf16>
    %2 = vector.extract_strided_slice %1 {offsets = [0, 0, 0], sizes = [16, 16, 8], strides = [1, 1, 1]} : vector<17x17x8xbf16> to vector<16x16x8xbf16>
    %3 = vector.shape_cast %2 : vector<16x16x8xbf16> to vector<256x8xbf16>
    %c0_3 = arith.constant 0 : index
    %c0_4 = arith.constant 0 : index
    %c0_5 = arith.constant 0 : index
    %4 = vector.load %arg3[%c0_3, %c0_4, %c0_5] : memref<4x8x16xbf16, #tpu.memory_space<vmem>>, vector<1x8x16xbf16>
    %5 = vector.shape_cast %4 : vector<1x8x16xbf16> to vector<8x16xbf16>
    %cst = arith.constant dense<0.000000e+00> : vector<256x16xf32>
    %6 = tpu.matmul %3, %5, %cst {dimension_numbers = #tpu.dot_dimension_numbers<[1], [0], [0], [1], [0, 0, 1, 1], [], []>} : vector<256x8xbf16>, vector<8x16xbf16>, vector<256x16xf32> -> vector<256x16xf32>
    %7 = vector.extract_strided_slice %1 {offsets = [0, 1, 0], sizes = [16, 16, 8], strides = [1, 1, 1]} : vector<17x17x8xbf16> to vector<16x16x8xbf16>
    %8 = vector.shape_cast %7 : vector<16x16x8xbf16> to vector<256x8xbf16>
    %c1 = arith.constant 1 : index
    %c0_6 = arith.constant 0 : index
    %c0_7 = arith.constant 0 : index
    %9 = vector.load %arg3[%c1, %c0_6, %c0_7] : memref<4x8x16xbf16, #tpu.memory_space<vmem>>, vector<1x8x16xbf16>
    %10 = vector.shape_cast %9 : vector<1x8x16xbf16> to vector<8x16xbf16>
    %cst_8 = arith.constant dense<0.000000e+00> : vector<256x16xf32>
    %11 = tpu.matmul %8, %10, %cst_8 {dimension_numbers = #tpu.dot_dimension_numbers<[1], [0], [0], [1], [0, 0, 1, 1], [], []>} : vector<256x8xbf16>, vector<8x16xbf16>, vector<256x16xf32> -> vector<256x16xf32>
    %12 = arith.addf %6, %11 : vector<256x16xf32>
    %13 = vector.extract_strided_slice %1 {offsets = [1, 0, 0], sizes = [16, 16, 8], strides = [1, 1, 1]} : vector<17x17x8xbf16> to vector<16x16x8xbf16>
    %14 = vector.shape_cast %13 : vector<16x16x8xbf16> to vector<256x8xbf16>
    %c2 = arith.constant 2 : index
    %c0_9 = arith.constant 0 : index
    %c0_10 = arith.constant 0 : index
    %15 = vector.load %arg3[%c2, %c0_9, %c0_10] : memref<4x8x16xbf16, #tpu.memory_space<vmem>>, vector<1x8x16xbf16>
    %16 = vector.shape_cast %15 : vector<1x8x16xbf16> to vector<8x16xbf16>
    %cst_11 = arith.constant dense<0.000000e+00> : vector<256x16xf32>
    %17 = tpu.matmul %14, %16, %cst_11 {dimension_numbers = #tpu.dot_dimension_numbers<[1], [0], [0], [1], [0, 0, 1, 1], [], []>} : vector<256x8xbf16>, vector<8x16xbf16>, vector<256x16xf32> -> vector<256x16xf32>
    %18 = arith.addf %12, %17 : vector<256x16xf32>
    %19 = vector.extract_strided_slice %1 {offsets = [1, 1, 0], sizes = [16, 16, 8], strides = [1, 1, 1]} : vector<17x17x8xbf16> to vector<16x16x8xbf16>
    %20 = vector.shape_cast %19 : vector<16x16x8xbf16> to vector<256x8xbf16>
    %c3 = arith.constant 3 : index
    %c0_12 = arith.constant 0 : index
    %c0_13 = arith.constant 0 : index
    %21 = vector.load %arg3[%c3, %c0_12, %c0_13] : memref<4x8x16xbf16, #tpu.memory_space<vmem>>, vector<1x8x16xbf16>
    %22 = vector.shape_cast %21 : vector<1x8x16xbf16> to vector<8x16xbf16>
    %cst_14 = arith.constant dense<0.000000e+00> : vector<256x16xf32>
    %23 = tpu.matmul %20, %22, %cst_14 {dimension_numbers = #tpu.dot_dimension_numbers<[1], [0], [0], [1], [0, 0, 1, 1], [], []>} : vector<256x8xbf16>, vector<8x16xbf16>, vector<256x16xf32> -> vector<256x16xf32>
    %24 = arith.addf %18, %23 : vector<256x16xf32>
    %c0_15 = arith.constant 0 : index
    %c0_16 = arith.constant 0 : index
    %25 = vector.load %arg4[%c0_15, %c0_16] : memref<1x16xf32, #tpu.memory_space<vmem>>, vector<1x16xf32>
    %26 = vector.broadcast %25 : vector<1x16xf32> to vector<256x16xf32>
    %27 = arith.addf %24, %26 : vector<256x16xf32>
    %cst_17 = arith.constant 0.000000e+00 : f32
    %28 = vector.broadcast %cst_17 : f32 to vector<256x16xf32>
    %29 = arith.cmpf oge, %27, %28 : vector<256x16xf32>
    %cst_18 = arith.constant 2.000000e-01 : f32
    %30 = vector.broadcast %cst_18 : f32 to vector<256x16xf32>
    %31 = arith.mulf %30, %27 : vector<256x16xf32>
    %32 = arith.select %29, %27, %31 : vector<256x16xi1>, vector<256x16xf32>
    %33 = arith.truncf %32 : vector<256x16xf32> to vector<256x16xbf16>
    %c0_19 = arith.constant 0 : index
    %c0_20 = arith.constant 0 : index
    %c0_21 = arith.constant 0 : index
    %34 = vector.load %arg5[%c0_19, %c0_20, %c0_21] : memref<1x256x16xbf16, #tpu.memory_space<vmem>>, vector<1x256x16xbf16>
    %35 = vector.shape_cast %34 : vector<1x256x16xbf16> to vector<256x16xbf16>
    %36 = vector.shape_cast %33 : vector<256x16xbf16> to vector<1x256x16xbf16>
    tpu.vector_store %arg5[%c0_19, %c0_20, %c0_21], %36 {strides = array<i32>} : memref<1x256x16xbf16, #tpu.memory_space<vmem>>, vector<1x256x16xbf16>,
    return
  }
  func.func @transform_0(%arg0: i32, %arg1: i32) -> (i32, i32, i32, i32) {
    %c0_i32 = arith.constant 0 : i32
    %c0_i32_0 = arith.constant 0 : i32
    %c0_i32_1 = arith.constant 0 : i32
    %c0_i32_2 = arith.constant 0 : i32
    return %arg0, %c0_i32, %c0_i32_0, %c0_i32_1 : i32, i32, i32, i32
  }
  func.func @transform_1(%arg0: i32, %arg1: i32) -> (i32, i32, i32) {
    %c0_i32 = arith.constant 0 : i32
    %c0_i32_0 = arith.constant 0 : i32
    %c0_i32_1 = arith.constant 0 : i32
    return %c0_i32, %c0_i32_0, %arg1 : i32, i32, i32
  }
  func.func @transform_2(%arg0: i32, %arg1: i32) -> (i32, i32) {
    %c0_i32 = arith.constant 0 : i32
    %c0_i32_0 = arith.constant 0 : i32
    return %c0_i32, %arg1 : i32, i32
  }
  func.func @transform_3(%arg0: i32, %arg1: i32) -> (i32, i32, i32) {
    %c0_i32 = arith.constant 0 : i32
    %c0_i32_0 = arith.constant 0 : i32
    return %arg0, %c0_i32, %arg1 : i32, i32, i32
  }
}

module attributes {stable_mosaic.version = 11 : i64} {
  func.func @_conv_block_kernel(%arg0: i32, %arg1: i32, %arg2: memref<1x9x9x64xbf16, #tpu.memory_space<vmem>>, %arg3: memref<4x64x32xbf16, #tpu.memory_space<vmem>>, %arg4: memref<1x64x32xbf16, #tpu.memory_space<vmem>>) attributes {dimension_semantics = [#tpu.dimension_semantics<parallel>, #tpu.dimension_semantics<parallel>], iteration_bounds = array<i64: 2, 1>, scalar_prefetch = 0 : i64, scratch_operands = 0 : i64, tpu.core_type = #tpu.core_type<tc>, window_params = [{transform_indices = @transform_0, window_bounds = array<i64: 1, 9, 9, 64>}, {transform_indices = @transform_1, window_bounds = array<i64: 4, 64, 32>}, {transform_indices = @transform_2, window_bounds = array<i64: 1, 64, 32>}]} {
    %c0 = arith.constant 0 : index
    %c0_0 = arith.constant 0 : index
    %c0_1 = arith.constant 0 : index
    %c0_2 = arith.constant 0 : index
    %0 = vector.load %arg2[%c0, %c0_0, %c0_1, %c0_2] : memref<1x9x9x64xbf16, #tpu.memory_space<vmem>>, vector<1x9x9x64xbf16>
    %1 = vector.shape_cast %0 : vector<1x9x9x64xbf16> to vector<9x9x64xbf16>
    %2 = vector.extract_strided_slice %1 {offsets = [0, 0, 0], sizes = [8, 8, 64], strides = [1, 1, 1]} : vector<9x9x64xbf16> to vector<8x8x64xbf16>
    %3 = vector.shape_cast %2 : vector<8x8x64xbf16> to vector<64x64xbf16>
    %c0_3 = arith.constant 0 : index
    %c0_4 = arith.constant 0 : index
    %c0_5 = arith.constant 0 : index
    %4 = vector.load %arg3[%c0_3, %c0_4, %c0_5] : memref<4x64x32xbf16, #tpu.memory_space<vmem>>, vector<1x64x32xbf16>
    %5 = vector.shape_cast %4 : vector<1x64x32xbf16> to vector<64x32xbf16>
    %cst = arith.constant dense<0.000000e+00> : vector<64x32xf32>
    %6 = tpu.matmul %3, %5, %cst {dimension_numbers = #tpu.dot_dimension_numbers<[1], [0], [0], [1], [0, 0, 1, 1], [], []>} : vector<64x64xbf16>, vector<64x32xbf16>, vector<64x32xf32> -> vector<64x32xf32>
    %7 = vector.extract_strided_slice %1 {offsets = [0, 1, 0], sizes = [8, 8, 64], strides = [1, 1, 1]} : vector<9x9x64xbf16> to vector<8x8x64xbf16>
    %8 = vector.shape_cast %7 : vector<8x8x64xbf16> to vector<64x64xbf16>
    %c1 = arith.constant 1 : index
    %c0_6 = arith.constant 0 : index
    %c0_7 = arith.constant 0 : index
    %9 = vector.load %arg3[%c1, %c0_6, %c0_7] : memref<4x64x32xbf16, #tpu.memory_space<vmem>>, vector<1x64x32xbf16>
    %10 = vector.shape_cast %9 : vector<1x64x32xbf16> to vector<64x32xbf16>
    %cst_8 = arith.constant dense<0.000000e+00> : vector<64x32xf32>
    %11 = tpu.matmul %8, %10, %cst_8 {dimension_numbers = #tpu.dot_dimension_numbers<[1], [0], [0], [1], [0, 0, 1, 1], [], []>} : vector<64x64xbf16>, vector<64x32xbf16>, vector<64x32xf32> -> vector<64x32xf32>
    %12 = arith.addf %6, %11 : vector<64x32xf32>
    %13 = vector.extract_strided_slice %1 {offsets = [1, 0, 0], sizes = [8, 8, 64], strides = [1, 1, 1]} : vector<9x9x64xbf16> to vector<8x8x64xbf16>
    %14 = vector.shape_cast %13 : vector<8x8x64xbf16> to vector<64x64xbf16>
    %c2 = arith.constant 2 : index
    %c0_9 = arith.constant 0 : index
    %c0_10 = arith.constant 0 : index
    %15 = vector.load %arg3[%c2, %c0_9, %c0_10] : memref<4x64x32xbf16, #tpu.memory_space<vmem>>, vector<1x64x32xbf16>
    %16 = vector.shape_cast %15 : vector<1x64x32xbf16> to vector<64x32xbf16>
    %cst_11 = arith.constant dense<0.000000e+00> : vector<64x32xf32>
    %17 = tpu.matmul %14, %16, %cst_11 {dimension_numbers = #tpu.dot_dimension_numbers<[1], [0], [0], [1], [0, 0, 1, 1], [], []>} : vector<64x64xbf16>, vector<64x32xbf16>, vector<64x32xf32> -> vector<64x32xf32>
    %18 = arith.addf %12, %17 : vector<64x32xf32>
    %19 = vector.extract_strided_slice %1 {offsets = [1, 1, 0], sizes = [8, 8, 64], strides = [1, 1, 1]} : vector<9x9x64xbf16> to vector<8x8x64xbf16>
    %20 = vector.shape_cast %19 : vector<8x8x64xbf16> to vector<64x64xbf16>
    %c3 = arith.constant 3 : index
    %c0_12 = arith.constant 0 : index
    %c0_13 = arith.constant 0 : index
    %21 = vector.load %arg3[%c3, %c0_12, %c0_13] : memref<4x64x32xbf16, #tpu.memory_space<vmem>>, vector<1x64x32xbf16>
    %22 = vector.shape_cast %21 : vector<1x64x32xbf16> to vector<64x32xbf16>
    %cst_14 = arith.constant dense<0.000000e+00> : vector<64x32xf32>
    %23 = tpu.matmul %20, %22, %cst_14 {dimension_numbers = #tpu.dot_dimension_numbers<[1], [0], [0], [1], [0, 0, 1, 1], [], []>} : vector<64x64xbf16>, vector<64x32xbf16>, vector<64x32xf32> -> vector<64x32xf32>
    %24 = arith.addf %18, %23 : vector<64x32xf32>
    %cst_15 = arith.constant dense<0.000000e+00> : vector<32xf32>
    %25 = vector.multi_reduction <add>, %24, %cst_15 [0] : vector<64x32xf32> to vector<32xf32>
    %26 = vector.shape_cast %25 : vector<32xf32> to vector<1x32xf32>
    %cst_16 = arith.constant 6.400000e+01 : f32
    %27 = vector.broadcast %cst_16 : f32 to vector<1x32xf32>
    %28 = arith.divf %26, %27 : vector<1x32xf32>
    %29 = arith.mulf %24, %24 : vector<64x32xf32>
    %cst_17 = arith.constant dense<0.000000e+00> : vector<32xf32>
    %30 = vector.multi_reduction <add>, %29, %cst_17 [0] : vector<64x32xf32> to vector<32xf32>
    %31 = vector.shape_cast %30 : vector<32xf32> to vector<1x32xf32>
    %cst_18 = arith.constant 6.400000e+01 : f32
    %32 = vector.broadcast %cst_18 : f32 to vector<1x32xf32>
    %33 = arith.divf %31, %32 : vector<1x32xf32>
    %34 = arith.mulf %28, %28 : vector<1x32xf32>
    %35 = arith.subf %33, %34 : vector<1x32xf32>
    %cst_19 = arith.constant 9.99999974E-6 : f32
    %36 = vector.broadcast %cst_19 : f32 to vector<1x32xf32>
    %37 = arith.addf %35, %36 : vector<1x32xf32>
    %38 = math.rsqrt %37 : vector<1x32xf32>
    %39 = vector.broadcast %38 : vector<1x32xf32> to vector<64x32xf32>
    %40 = arith.mulf %24, %39 : vector<64x32xf32>
    %41 = arith.mulf %28, %38 : vector<1x32xf32>
    %42 = vector.broadcast %41 : vector<1x32xf32> to vector<64x32xf32>
    %43 = arith.subf %40, %42 : vector<64x32xf32>
    %cst_20 = arith.constant 0.000000e+00 : f32
    %44 = vector.broadcast %cst_20 : f32 to vector<64x32xf32>
    %45 = arith.cmpf oge, %43, %44 : vector<64x32xf32>
    %cst_21 = arith.constant 2.000000e-01 : f32
    %46 = vector.broadcast %cst_21 : f32 to vector<64x32xf32>
    %47 = arith.mulf %46, %43 : vector<64x32xf32>
    %48 = arith.select %45, %43, %47 : vector<64x32xi1>, vector<64x32xf32>
    %49 = arith.truncf %48 : vector<64x32xf32> to vector<64x32xbf16>
    %c0_22 = arith.constant 0 : index
    %c0_23 = arith.constant 0 : index
    %c0_24 = arith.constant 0 : index
    %50 = vector.load %arg4[%c0_22, %c0_23, %c0_24] : memref<1x64x32xbf16, #tpu.memory_space<vmem>>, vector<1x64x32xbf16>
    %51 = vector.shape_cast %50 : vector<1x64x32xbf16> to vector<64x32xbf16>
    %52 = vector.shape_cast %49 : vector<64x32xbf16> to vector<1x64x32xbf16>
    tpu.vector_store %arg4[%c0_22, %c0_23, %c0_24], %52 {strides = array<i32>} : memref<1x64x32xbf16, #tpu.memory_space<vmem>>, vector<1x64x32xbf16>,
    return
  }
  func.func @transform_0(%arg0: i32, %arg1: i32) -> (i32, i32, i32, i32) {
    %c0_i32 = arith.constant 0 : i32
    %c0_i32_0 = arith.constant 0 : i32
    %c0_i32_1 = arith.constant 0 : i32
    %c0_i32_2 = arith.constant 0 : i32
    return %arg0, %c0_i32, %c0_i32_0, %c0_i32_1 : i32, i32, i32, i32
  }
  func.func @transform_1(%arg0: i32, %arg1: i32) -> (i32, i32, i32) {
    %c0_i32 = arith.constant 0 : i32
    %c0_i32_0 = arith.constant 0 : i32
    %c0_i32_1 = arith.constant 0 : i32
    return %c0_i32, %c0_i32_0, %arg1 : i32, i32, i32
  }
  func.func @transform_2(%arg0: i32, %arg1: i32) -> (i32, i32, i32) {
    %c0_i32 = arith.constant 0 : i32
    %c0_i32_0 = arith.constant 0 : i32
    return %arg0, %c0_i32, %arg1 : i32, i32, i32
  }
}

module attributes {stable_mosaic.version = 11 : i64} {
  func.func @_conv_block_kernel(%arg0: i32, %arg1: i32, %arg2: memref<1x5x5x128xbf16, #tpu.memory_space<vmem>>, %arg3: memref<16x128x8xbf16, #tpu.memory_space<vmem>>, %arg4: memref<1x8xf32, #tpu.memory_space<vmem>>, %arg5: memref<1x4x8xf32, #tpu.memory_space<vmem>>) attributes {dimension_semantics = [#tpu.dimension_semantics<parallel>, #tpu.dimension_semantics<parallel>], iteration_bounds = array<i64: 2, 1>, scalar_prefetch = 0 : i64, scratch_operands = 0 : i64, tpu.core_type = #tpu.core_type<tc>, window_params = [{transform_indices = @transform_0, window_bounds = array<i64: 1, 5, 5, 128>}, {transform_indices = @transform_1, window_bounds = array<i64: 16, 128, 8>}, {transform_indices = @transform_2, window_bounds = array<i64: 1, 8>}, {transform_indices = @transform_3, window_bounds = array<i64: 1, 4, 8>}]} {
    %c0 = arith.constant 0 : index
    %c0_0 = arith.constant 0 : index
    %c0_1 = arith.constant 0 : index
    %c0_2 = arith.constant 0 : index
    %0 = vector.load %arg2[%c0, %c0_0, %c0_1, %c0_2] : memref<1x5x5x128xbf16, #tpu.memory_space<vmem>>, vector<1x5x5x128xbf16>
    %1 = vector.shape_cast %0 : vector<1x5x5x128xbf16> to vector<5x5x128xbf16>
    %2 = vector.extract_strided_slice %1 {offsets = [0, 0, 0], sizes = [2, 2, 128], strides = [1, 1, 1]} : vector<5x5x128xbf16> to vector<2x2x128xbf16>
    %3 = vector.shape_cast %2 : vector<2x2x128xbf16> to vector<4x128xbf16>
    %c0_3 = arith.constant 0 : index
    %c0_4 = arith.constant 0 : index
    %c0_5 = arith.constant 0 : index
    %4 = vector.load %arg3[%c0_3, %c0_4, %c0_5] : memref<16x128x8xbf16, #tpu.memory_space<vmem>>, vector<1x128x8xbf16>
    %5 = vector.shape_cast %4 : vector<1x128x8xbf16> to vector<128x8xbf16>
    %cst = arith.constant dense<0.000000e+00> : vector<4x8xf32>
    %6 = tpu.matmul %3, %5, %cst {dimension_numbers = #tpu.dot_dimension_numbers<[1], [0], [0], [1], [0, 0, 1, 1], [], []>} : vector<4x128xbf16>, vector<128x8xbf16>, vector<4x8xf32> -> vector<4x8xf32>
    %7 = vector.extract_strided_slice %1 {offsets = [0, 1, 0], sizes = [2, 2, 128], strides = [1, 1, 1]} : vector<5x5x128xbf16> to vector<2x2x128xbf16>
    %8 = vector.shape_cast %7 : vector<2x2x128xbf16> to vector<4x128xbf16>
    %c1 = arith.constant 1 : index
    %c0_6 = arith.constant 0 : index
    %c0_7 = arith.constant 0 : index
    %9 = vector.load %arg3[%c1, %c0_6, %c0_7] : memref<16x128x8xbf16, #tpu.memory_space<vmem>>, vector<1x128x8xbf16>
    %10 = vector.shape_cast %9 : vector<1x128x8xbf16> to vector<128x8xbf16>
    %cst_8 = arith.constant dense<0.000000e+00> : vector<4x8xf32>
    %11 = tpu.matmul %8, %10, %cst_8 {dimension_numbers = #tpu.dot_dimension_numbers<[1], [0], [0], [1], [0, 0, 1, 1], [], []>} : vector<4x128xbf16>, vector<128x8xbf16>, vector<4x8xf32> -> vector<4x8xf32>
    %12 = arith.addf %6, %11 : vector<4x8xf32>
    %13 = vector.extract_strided_slice %1 {offsets = [0, 2, 0], sizes = [2, 2, 128], strides = [1, 1, 1]} : vector<5x5x128xbf16> to vector<2x2x128xbf16>
    %14 = vector.shape_cast %13 : vector<2x2x128xbf16> to vector<4x128xbf16>
    %c2 = arith.constant 2 : index
    %c0_9 = arith.constant 0 : index
    %c0_10 = arith.constant 0 : index
    %15 = vector.load %arg3[%c2, %c0_9, %c0_10] : memref<16x128x8xbf16, #tpu.memory_space<vmem>>, vector<1x128x8xbf16>
    %16 = vector.shape_cast %15 : vector<1x128x8xbf16> to vector<128x8xbf16>
    %cst_11 = arith.constant dense<0.000000e+00> : vector<4x8xf32>
    %17 = tpu.matmul %14, %16, %cst_11 {dimension_numbers = #tpu.dot_dimension_numbers<[1], [0], [0], [1], [0, 0, 1, 1], [], []>} : vector<4x128xbf16>, vector<128x8xbf16>, vector<4x8xf32> -> vector<4x8xf32>
    %18 = arith.addf %12, %17 : vector<4x8xf32>
    %19 = vector.extract_strided_slice %1 {offsets = [0, 3, 0], sizes = [2, 2, 128], strides = [1, 1, 1]} : vector<5x5x128xbf16> to vector<2x2x128xbf16>
    %20 = vector.shape_cast %19 : vector<2x2x128xbf16> to vector<4x128xbf16>
    %c3 = arith.constant 3 : index
    %c0_12 = arith.constant 0 : index
    %c0_13 = arith.constant 0 : index
    %21 = vector.load %arg3[%c3, %c0_12, %c0_13] : memref<16x128x8xbf16, #tpu.memory_space<vmem>>, vector<1x128x8xbf16>
    %22 = vector.shape_cast %21 : vector<1x128x8xbf16> to vector<128x8xbf16>
    %cst_14 = arith.constant dense<0.000000e+00> : vector<4x8xf32>
    %23 = tpu.matmul %20, %22, %cst_14 {dimension_numbers = #tpu.dot_dimension_numbers<[1], [0], [0], [1], [0, 0, 1, 1], [], []>} : vector<4x128xbf16>, vector<128x8xbf16>, vector<4x8xf32> -> vector<4x8xf32>
    %24 = arith.addf %18, %23 : vector<4x8xf32>
    %25 = vector.extract_strided_slice %1 {offsets = [1, 0, 0], sizes = [2, 2, 128], strides = [1, 1, 1]} : vector<5x5x128xbf16> to vector<2x2x128xbf16>
    %26 = vector.shape_cast %25 : vector<2x2x128xbf16> to vector<4x128xbf16>
    %c4 = arith.constant 4 : index
    %c0_15 = arith.constant 0 : index
    %c0_16 = arith.constant 0 : index
    %27 = vector.load %arg3[%c4, %c0_15, %c0_16] : memref<16x128x8xbf16, #tpu.memory_space<vmem>>, vector<1x128x8xbf16>
    %28 = vector.shape_cast %27 : vector<1x128x8xbf16> to vector<128x8xbf16>
    %cst_17 = arith.constant dense<0.000000e+00> : vector<4x8xf32>
    %29 = tpu.matmul %26, %28, %cst_17 {dimension_numbers = #tpu.dot_dimension_numbers<[1], [0], [0], [1], [0, 0, 1, 1], [], []>} : vector<4x128xbf16>, vector<128x8xbf16>, vector<4x8xf32> -> vector<4x8xf32>
    %30 = arith.addf %24, %29 : vector<4x8xf32>
    %31 = vector.extract_strided_slice %1 {offsets = [1, 1, 0], sizes = [2, 2, 128], strides = [1, 1, 1]} : vector<5x5x128xbf16> to vector<2x2x128xbf16>
    %32 = vector.shape_cast %31 : vector<2x2x128xbf16> to vector<4x128xbf16>
    %c5 = arith.constant 5 : index
    %c0_18 = arith.constant 0 : index
    %c0_19 = arith.constant 0 : index
    %33 = vector.load %arg3[%c5, %c0_18, %c0_19] : memref<16x128x8xbf16, #tpu.memory_space<vmem>>, vector<1x128x8xbf16>
    %34 = vector.shape_cast %33 : vector<1x128x8xbf16> to vector<128x8xbf16>
    %cst_20 = arith.constant dense<0.000000e+00> : vector<4x8xf32>
    %35 = tpu.matmul %32, %34, %cst_20 {dimension_numbers = #tpu.dot_dimension_numbers<[1], [0], [0], [1], [0, 0, 1, 1], [], []>} : vector<4x128xbf16>, vector<128x8xbf16>, vector<4x8xf32> -> vector<4x8xf32>
    %36 = arith.addf %30, %35 : vector<4x8xf32>
    %37 = vector.extract_strided_slice %1 {offsets = [1, 2, 0], sizes = [2, 2, 128], strides = [1, 1, 1]} : vector<5x5x128xbf16> to vector<2x2x128xbf16>
    %38 = vector.shape_cast %37 : vector<2x2x128xbf16> to vector<4x128xbf16>
    %c6 = arith.constant 6 : index
    %c0_21 = arith.constant 0 : index
    %c0_22 = arith.constant 0 : index
    %39 = vector.load %arg3[%c6, %c0_21, %c0_22] : memref<16x128x8xbf16, #tpu.memory_space<vmem>>, vector<1x128x8xbf16>
    %40 = vector.shape_cast %39 : vector<1x128x8xbf16> to vector<128x8xbf16>
    %cst_23 = arith.constant dense<0.000000e+00> : vector<4x8xf32>
    %41 = tpu.matmul %38, %40, %cst_23 {dimension_numbers = #tpu.dot_dimension_numbers<[1], [0], [0], [1], [0, 0, 1, 1], [], []>} : vector<4x128xbf16>, vector<128x8xbf16>, vector<4x8xf32> -> vector<4x8xf32>
    %42 = arith.addf %36, %41 : vector<4x8xf32>
    %43 = vector.extract_strided_slice %1 {offsets = [1, 3, 0], sizes = [2, 2, 128], strides = [1, 1, 1]} : vector<5x5x128xbf16> to vector<2x2x128xbf16>
    %44 = vector.shape_cast %43 : vector<2x2x128xbf16> to vector<4x128xbf16>
    %c7 = arith.constant 7 : index
    %c0_24 = arith.constant 0 : index
    %c0_25 = arith.constant 0 : index
    %45 = vector.load %arg3[%c7, %c0_24, %c0_25] : memref<16x128x8xbf16, #tpu.memory_space<vmem>>, vector<1x128x8xbf16>
    %46 = vector.shape_cast %45 : vector<1x128x8xbf16> to vector<128x8xbf16>
    %cst_26 = arith.constant dense<0.000000e+00> : vector<4x8xf32>
    %47 = tpu.matmul %44, %46, %cst_26 {dimension_numbers = #tpu.dot_dimension_numbers<[1], [0], [0], [1], [0, 0, 1, 1], [], []>} : vector<4x128xbf16>, vector<128x8xbf16>, vector<4x8xf32> -> vector<4x8xf32>
    %48 = arith.addf %42, %47 : vector<4x8xf32>
    %49 = vector.extract_strided_slice %1 {offsets = [2, 0, 0], sizes = [2, 2, 128], strides = [1, 1, 1]} : vector<5x5x128xbf16> to vector<2x2x128xbf16>
    %50 = vector.shape_cast %49 : vector<2x2x128xbf16> to vector<4x128xbf16>
    %c8 = arith.constant 8 : index
    %c0_27 = arith.constant 0 : index
    %c0_28 = arith.constant 0 : index
    %51 = vector.load %arg3[%c8, %c0_27, %c0_28] : memref<16x128x8xbf16, #tpu.memory_space<vmem>>, vector<1x128x8xbf16>
    %52 = vector.shape_cast %51 : vector<1x128x8xbf16> to vector<128x8xbf16>
    %cst_29 = arith.constant dense<0.000000e+00> : vector<4x8xf32>
    %53 = tpu.matmul %50, %52, %cst_29 {dimension_numbers = #tpu.dot_dimension_numbers<[1], [0], [0], [1], [0, 0, 1, 1], [], []>} : vector<4x128xbf16>, vector<128x8xbf16>, vector<4x8xf32> -> vector<4x8xf32>
    %54 = arith.addf %48, %53 : vector<4x8xf32>
    %55 = vector.extract_strided_slice %1 {offsets = [2, 1, 0], sizes = [2, 2, 128], strides = [1, 1, 1]} : vector<5x5x128xbf16> to vector<2x2x128xbf16>
    %56 = vector.shape_cast %55 : vector<2x2x128xbf16> to vector<4x128xbf16>
    %c9 = arith.constant 9 : index
    %c0_30 = arith.constant 0 : index
    %c0_31 = arith.constant 0 : index
    %57 = vector.load %arg3[%c9, %c0_30, %c0_31] : memref<16x128x8xbf16, #tpu.memory_space<vmem>>, vector<1x128x8xbf16>
    %58 = vector.shape_cast %57 : vector<1x128x8xbf16> to vector<128x8xbf16>
    %cst_32 = arith.constant dense<0.000000e+00> : vector<4x8xf32>
    %59 = tpu.matmul %56, %58, %cst_32 {dimension_numbers = #tpu.dot_dimension_numbers<[1], [0], [0], [1], [0, 0, 1, 1], [], []>} : vector<4x128xbf16>, vector<128x8xbf16>, vector<4x8xf32> -> vector<4x8xf32>
    %60 = arith.addf %54, %59 : vector<4x8xf32>
    %61 = vector.extract_strided_slice %1 {offsets = [2, 2, 0], sizes = [2, 2, 128], strides = [1, 1, 1]} : vector<5x5x128xbf16> to vector<2x2x128xbf16>
    %62 = vector.shape_cast %61 : vector<2x2x128xbf16> to vector<4x128xbf16>
    %c10 = arith.constant 10 : index
    %c0_33 = arith.constant 0 : index
    %c0_34 = arith.constant 0 : index
    %63 = vector.load %arg3[%c10, %c0_33, %c0_34] : memref<16x128x8xbf16, #tpu.memory_space<vmem>>, vector<1x128x8xbf16>
    %64 = vector.shape_cast %63 : vector<1x128x8xbf16> to vector<128x8xbf16>
    %cst_35 = arith.constant dense<0.000000e+00> : vector<4x8xf32>
    %65 = tpu.matmul %62, %64, %cst_35 {dimension_numbers = #tpu.dot_dimension_numbers<[1], [0], [0], [1], [0, 0, 1, 1], [], []>} : vector<4x128xbf16>, vector<128x8xbf16>, vector<4x8xf32> -> vector<4x8xf32>
    %66 = arith.addf %60, %65 : vector<4x8xf32>
    %67 = vector.extract_strided_slice %1 {offsets = [2, 3, 0], sizes = [2, 2, 128], strides = [1, 1, 1]} : vector<5x5x128xbf16> to vector<2x2x128xbf16>
    %68 = vector.shape_cast %67 : vector<2x2x128xbf16> to vector<4x128xbf16>
    %c11 = arith.constant 11 : index
    %c0_36 = arith.constant 0 : index
    %c0_37 = arith.constant 0 : index
    %69 = vector.load %arg3[%c11, %c0_36, %c0_37] : memref<16x128x8xbf16, #tpu.memory_space<vmem>>, vector<1x128x8xbf16>
    %70 = vector.shape_cast %69 : vector<1x128x8xbf16> to vector<128x8xbf16>
    %cst_38 = arith.constant dense<0.000000e+00> : vector<4x8xf32>
    %71 = tpu.matmul %68, %70, %cst_38 {dimension_numbers = #tpu.dot_dimension_numbers<[1], [0], [0], [1], [0, 0, 1, 1], [], []>} : vector<4x128xbf16>, vector<128x8xbf16>, vector<4x8xf32> -> vector<4x8xf32>
    %72 = arith.addf %66, %71 : vector<4x8xf32>
    %73 = vector.extract_strided_slice %1 {offsets = [3, 0, 0], sizes = [2, 2, 128], strides = [1, 1, 1]} : vector<5x5x128xbf16> to vector<2x2x128xbf16>
    %74 = vector.shape_cast %73 : vector<2x2x128xbf16> to vector<4x128xbf16>
    %c12 = arith.constant 12 : index
    %c0_39 = arith.constant 0 : index
    %c0_40 = arith.constant 0 : index
    %75 = vector.load %arg3[%c12, %c0_39, %c0_40] : memref<16x128x8xbf16, #tpu.memory_space<vmem>>, vector<1x128x8xbf16>
    %76 = vector.shape_cast %75 : vector<1x128x8xbf16> to vector<128x8xbf16>
    %cst_41 = arith.constant dense<0.000000e+00> : vector<4x8xf32>
    %77 = tpu.matmul %74, %76, %cst_41 {dimension_numbers = #tpu.dot_dimension_numbers<[1], [0], [0], [1], [0, 0, 1, 1], [], []>} : vector<4x128xbf16>, vector<128x8xbf16>, vector<4x8xf32> -> vector<4x8xf32>
    %78 = arith.addf %72, %77 : vector<4x8xf32>
    %79 = vector.extract_strided_slice %1 {offsets = [3, 1, 0], sizes = [2, 2, 128], strides = [1, 1, 1]} : vector<5x5x128xbf16> to vector<2x2x128xbf16>
    %80 = vector.shape_cast %79 : vector<2x2x128xbf16> to vector<4x128xbf16>
    %c13 = arith.constant 13 : index
    %c0_42 = arith.constant 0 : index
    %c0_43 = arith.constant 0 : index
    %81 = vector.load %arg3[%c13, %c0_42, %c0_43] : memref<16x128x8xbf16, #tpu.memory_space<vmem>>, vector<1x128x8xbf16>
    %82 = vector.shape_cast %81 : vector<1x128x8xbf16> to vector<128x8xbf16>
    %cst_44 = arith.constant dense<0.000000e+00> : vector<4x8xf32>
    %83 = tpu.matmul %80, %82, %cst_44 {dimension_numbers = #tpu.dot_dimension_numbers<[1], [0], [0], [1], [0, 0, 1, 1], [], []>} : vector<4x128xbf16>, vector<128x8xbf16>, vector<4x8xf32> -> vector<4x8xf32>
    %84 = arith.addf %78, %83 : vector<4x8xf32>
    %85 = vector.extract_strided_slice %1 {offsets = [3, 2, 0], sizes = [2, 2, 128], strides = [1, 1, 1]} : vector<5x5x128xbf16> to vector<2x2x128xbf16>
    %86 = vector.shape_cast %85 : vector<2x2x128xbf16> to vector<4x128xbf16>
    %c14 = arith.constant 14 : index
    %c0_45 = arith.constant 0 : index
    %c0_46 = arith.constant 0 : index
    %87 = vector.load %arg3[%c14, %c0_45, %c0_46] : memref<16x128x8xbf16, #tpu.memory_space<vmem>>, vector<1x128x8xbf16>
    %88 = vector.shape_cast %87 : vector<1x128x8xbf16> to vector<128x8xbf16>
    %cst_47 = arith.constant dense<0.000000e+00> : vector<4x8xf32>
    %89 = tpu.matmul %86, %88, %cst_47 {dimension_numbers = #tpu.dot_dimension_numbers<[1], [0], [0], [1], [0, 0, 1, 1], [], []>} : vector<4x128xbf16>, vector<128x8xbf16>, vector<4x8xf32> -> vector<4x8xf32>
    %90 = arith.addf %84, %89 : vector<4x8xf32>
    %91 = vector.extract_strided_slice %1 {offsets = [3, 3, 0], sizes = [2, 2, 128], strides = [1, 1, 1]} : vector<5x5x128xbf16> to vector<2x2x128xbf16>
    %92 = vector.shape_cast %91 : vector<2x2x128xbf16> to vector<4x128xbf16>
    %c15 = arith.constant 15 : index
    %c0_48 = arith.constant 0 : index
    %c0_49 = arith.constant 0 : index
    %93 = vector.load %arg3[%c15, %c0_48, %c0_49] : memref<16x128x8xbf16, #tpu.memory_space<vmem>>, vector<1x128x8xbf16>
    %94 = vector.shape_cast %93 : vector<1x128x8xbf16> to vector<128x8xbf16>
    %cst_50 = arith.constant dense<0.000000e+00> : vector<4x8xf32>
    %95 = tpu.matmul %92, %94, %cst_50 {dimension_numbers = #tpu.dot_dimension_numbers<[1], [0], [0], [1], [0, 0, 1, 1], [], []>} : vector<4x128xbf16>, vector<128x8xbf16>, vector<4x8xf32> -> vector<4x8xf32>
    %96 = arith.addf %90, %95 : vector<4x8xf32>
    %c0_51 = arith.constant 0 : index
    %c0_52 = arith.constant 0 : index
    %97 = vector.load %arg4[%c0_51, %c0_52] : memref<1x8xf32, #tpu.memory_space<vmem>>, vector<1x8xf32>
    %98 = vector.broadcast %97 : vector<1x8xf32> to vector<4x8xf32>
    %99 = arith.addf %96, %98 : vector<4x8xf32>
    %c0_53 = arith.constant 0 : index
    %c0_54 = arith.constant 0 : index
    %c0_55 = arith.constant 0 : index
    %100 = vector.load %arg5[%c0_53, %c0_54, %c0_55] : memref<1x4x8xf32, #tpu.memory_space<vmem>>, vector<1x4x8xf32>
    %101 = vector.shape_cast %100 : vector<1x4x8xf32> to vector<4x8xf32>
    %102 = vector.shape_cast %99 : vector<4x8xf32> to vector<1x4x8xf32>
    tpu.vector_store %arg5[%c0_53, %c0_54, %c0_55], %102 {strides = array<i32>} : memref<1x4x8xf32, #tpu.memory_space<vmem>>, vector<1x4x8xf32>,
    return
  }
  func.func @transform_0(%arg0: i32, %arg1: i32) -> (i32, i32, i32, i32) {
    %c0_i32 = arith.constant 0 : i32
    %c0_i32_0 = arith.constant 0 : i32
    %c0_i32_1 = arith.constant 0 : i32
    %c0_i32_2 = arith.constant 0 : i32
    return %arg0, %c0_i32, %c0_i32_0, %c0_i32_1 : i32, i32, i32, i32
  }
  func.func @transform_1(%arg0: i32, %arg1: i32) -> (i32, i32, i32) {
    %c0_i32 = arith.constant 0 : i32
    %c0_i32_0 = arith.constant 0 : i32
    %c0_i32_1 = arith.constant 0 : i32
    return %c0_i32, %c0_i32_0, %arg1 : i32, i32, i32
  }
  func.func @transform_2(%arg0: i32, %arg1: i32) -> (i32, i32) {
    %c0_i32 = arith.constant 0 : i32
    %c0_i32_0 = arith.constant 0 : i32
    return %c0_i32, %arg1 : i32, i32
  }
  func.func @transform_3(%arg0: i32, %arg1: i32) -> (i32, i32, i32) {
    %c0_i32 = arith.constant 0 : i32
    %c0_i32_0 = arith.constant 0 : i32
    return %arg0, %c0_i32, %arg1 : i32, i32, i32
  }
}

module attributes {stable_mosaic.version = 11 : i64} {
  func.func @_conv_block_kernel(%arg0: i32, %arg1: i32, %arg2: memref<1x5x5x128xbf16, #tpu.memory_space<vmem>>, %arg3: memref<4x128x64xbf16, #tpu.memory_space<vmem>>, %arg4: memref<1x16x64xbf16, #tpu.memory_space<vmem>>) attributes {dimension_semantics = [#tpu.dimension_semantics<parallel>, #tpu.dimension_semantics<parallel>], iteration_bounds = array<i64: 2, 1>, scalar_prefetch = 0 : i64, scratch_operands = 0 : i64, tpu.core_type = #tpu.core_type<tc>, window_params = [{transform_indices = @transform_0, window_bounds = array<i64: 1, 5, 5, 128>}, {transform_indices = @transform_1, window_bounds = array<i64: 4, 128, 64>}, {transform_indices = @transform_2, window_bounds = array<i64: 1, 16, 64>}]} {
    %c0 = arith.constant 0 : index
    %c0_0 = arith.constant 0 : index
    %c0_1 = arith.constant 0 : index
    %c0_2 = arith.constant 0 : index
    %0 = vector.load %arg2[%c0, %c0_0, %c0_1, %c0_2] : memref<1x5x5x128xbf16, #tpu.memory_space<vmem>>, vector<1x5x5x128xbf16>
    %1 = vector.shape_cast %0 : vector<1x5x5x128xbf16> to vector<5x5x128xbf16>
    %2 = vector.extract_strided_slice %1 {offsets = [0, 0, 0], sizes = [4, 4, 128], strides = [1, 1, 1]} : vector<5x5x128xbf16> to vector<4x4x128xbf16>
    %3 = vector.shape_cast %2 : vector<4x4x128xbf16> to vector<16x128xbf16>
    %c0_3 = arith.constant 0 : index
    %c0_4 = arith.constant 0 : index
    %c0_5 = arith.constant 0 : index
    %4 = vector.load %arg3[%c0_3, %c0_4, %c0_5] : memref<4x128x64xbf16, #tpu.memory_space<vmem>>, vector<1x128x64xbf16>
    %5 = vector.shape_cast %4 : vector<1x128x64xbf16> to vector<128x64xbf16>
    %cst = arith.constant dense<0.000000e+00> : vector<16x64xf32>
    %6 = tpu.matmul %3, %5, %cst {dimension_numbers = #tpu.dot_dimension_numbers<[1], [0], [0], [1], [0, 0, 1, 1], [], []>} : vector<16x128xbf16>, vector<128x64xbf16>, vector<16x64xf32> -> vector<16x64xf32>
    %7 = vector.extract_strided_slice %1 {offsets = [0, 1, 0], sizes = [4, 4, 128], strides = [1, 1, 1]} : vector<5x5x128xbf16> to vector<4x4x128xbf16>
    %8 = vector.shape_cast %7 : vector<4x4x128xbf16> to vector<16x128xbf16>
    %c1 = arith.constant 1 : index
    %c0_6 = arith.constant 0 : index
    %c0_7 = arith.constant 0 : index
    %9 = vector.load %arg3[%c1, %c0_6, %c0_7] : memref<4x128x64xbf16, #tpu.memory_space<vmem>>, vector<1x128x64xbf16>
    %10 = vector.shape_cast %9 : vector<1x128x64xbf16> to vector<128x64xbf16>
    %cst_8 = arith.constant dense<0.000000e+00> : vector<16x64xf32>
    %11 = tpu.matmul %8, %10, %cst_8 {dimension_numbers = #tpu.dot_dimension_numbers<[1], [0], [0], [1], [0, 0, 1, 1], [], []>} : vector<16x128xbf16>, vector<128x64xbf16>, vector<16x64xf32> -> vector<16x64xf32>
    %12 = arith.addf %6, %11 : vector<16x64xf32>
    %13 = vector.extract_strided_slice %1 {offsets = [1, 0, 0], sizes = [4, 4, 128], strides = [1, 1, 1]} : vector<5x5x128xbf16> to vector<4x4x128xbf16>
    %14 = vector.shape_cast %13 : vector<4x4x128xbf16> to vector<16x128xbf16>
    %c2 = arith.constant 2 : index
    %c0_9 = arith.constant 0 : index
    %c0_10 = arith.constant 0 : index
    %15 = vector.load %arg3[%c2, %c0_9, %c0_10] : memref<4x128x64xbf16, #tpu.memory_space<vmem>>, vector<1x128x64xbf16>
    %16 = vector.shape_cast %15 : vector<1x128x64xbf16> to vector<128x64xbf16>
    %cst_11 = arith.constant dense<0.000000e+00> : vector<16x64xf32>
    %17 = tpu.matmul %14, %16, %cst_11 {dimension_numbers = #tpu.dot_dimension_numbers<[1], [0], [0], [1], [0, 0, 1, 1], [], []>} : vector<16x128xbf16>, vector<128x64xbf16>, vector<16x64xf32> -> vector<16x64xf32>
    %18 = arith.addf %12, %17 : vector<16x64xf32>
    %19 = vector.extract_strided_slice %1 {offsets = [1, 1, 0], sizes = [4, 4, 128], strides = [1, 1, 1]} : vector<5x5x128xbf16> to vector<4x4x128xbf16>
    %20 = vector.shape_cast %19 : vector<4x4x128xbf16> to vector<16x128xbf16>
    %c3 = arith.constant 3 : index
    %c0_12 = arith.constant 0 : index
    %c0_13 = arith.constant 0 : index
    %21 = vector.load %arg3[%c3, %c0_12, %c0_13] : memref<4x128x64xbf16, #tpu.memory_space<vmem>>, vector<1x128x64xbf16>
    %22 = vector.shape_cast %21 : vector<1x128x64xbf16> to vector<128x64xbf16>
    %cst_14 = arith.constant dense<0.000000e+00> : vector<16x64xf32>
    %23 = tpu.matmul %20, %22, %cst_14 {dimension_numbers = #tpu.dot_dimension_numbers<[1], [0], [0], [1], [0, 0, 1, 1], [], []>} : vector<16x128xbf16>, vector<128x64xbf16>, vector<16x64xf32> -> vector<16x64xf32>
    %24 = arith.addf %18, %23 : vector<16x64xf32>
    %cst_15 = arith.constant dense<0.000000e+00> : vector<64xf32>
    %25 = vector.multi_reduction <add>, %24, %cst_15 [0] : vector<16x64xf32> to vector<64xf32>
    %26 = vector.shape_cast %25 : vector<64xf32> to vector<1x64xf32>
    %cst_16 = arith.constant 1.600000e+01 : f32
    %27 = vector.broadcast %cst_16 : f32 to vector<1x64xf32>
    %28 = arith.divf %26, %27 : vector<1x64xf32>
    %29 = arith.mulf %24, %24 : vector<16x64xf32>
    %cst_17 = arith.constant dense<0.000000e+00> : vector<64xf32>
    %30 = vector.multi_reduction <add>, %29, %cst_17 [0] : vector<16x64xf32> to vector<64xf32>
    %31 = vector.shape_cast %30 : vector<64xf32> to vector<1x64xf32>
    %cst_18 = arith.constant 1.600000e+01 : f32
    %32 = vector.broadcast %cst_18 : f32 to vector<1x64xf32>
    %33 = arith.divf %31, %32 : vector<1x64xf32>
    %34 = arith.mulf %28, %28 : vector<1x64xf32>
    %35 = arith.subf %33, %34 : vector<1x64xf32>
    %cst_19 = arith.constant 9.99999974E-6 : f32
    %36 = vector.broadcast %cst_19 : f32 to vector<1x64xf32>
    %37 = arith.addf %35, %36 : vector<1x64xf32>
    %38 = math.rsqrt %37 : vector<1x64xf32>
    %39 = vector.broadcast %38 : vector<1x64xf32> to vector<16x64xf32>
    %40 = arith.mulf %24, %39 : vector<16x64xf32>
    %41 = arith.mulf %28, %38 : vector<1x64xf32>
    %42 = vector.broadcast %41 : vector<1x64xf32> to vector<16x64xf32>
    %43 = arith.subf %40, %42 : vector<16x64xf32>
    %cst_20 = arith.constant 0.000000e+00 : f32
    %44 = vector.broadcast %cst_20 : f32 to vector<16x64xf32>
    %45 = arith.cmpf oge, %43, %44 : vector<16x64xf32>
    %cst_21 = arith.constant 2.000000e-01 : f32
    %46 = vector.broadcast %cst_21 : f32 to vector<16x64xf32>
    %47 = arith.mulf %46, %43 : vector<16x64xf32>
    %48 = arith.select %45, %43, %47 : vector<16x64xi1>, vector<16x64xf32>
    %49 = arith.truncf %48 : vector<16x64xf32> to vector<16x64xbf16>
    %c0_22 = arith.constant 0 : index
    %c0_23 = arith.constant 0 : index
    %c0_24 = arith.constant 0 : index
    %50 = vector.load %arg4[%c0_22, %c0_23, %c0_24] : memref<1x16x64xbf16, #tpu.memory_space<vmem>>, vector<1x16x64xbf16>
    %51 = vector.shape_cast %50 : vector<1x16x64xbf16> to vector<16x64xbf16>
    %52 = vector.shape_cast %49 : vector<16x64xbf16> to vector<1x16x64xbf16>
    tpu.vector_store %arg4[%c0_22, %c0_23, %c0_24], %52 {strides = array<i32>} : memref<1x16x64xbf16, #tpu.memory_space<vmem>>, vector<1x16x64xbf16>,
    return
  }
  func.func @transform_0(%arg0: i32, %arg1: i32) -> (i32, i32, i32, i32) {
    %c0_i32 = arith.constant 0 : i32
    %c0_i32_0 = arith.constant 0 : i32
    %c0_i32_1 = arith.constant 0 : i32
    %c0_i32_2 = arith.constant 0 : i32
    return %arg0, %c0_i32, %c0_i32_0, %c0_i32_1 : i32, i32, i32, i32
  }
  func.func @transform_1(%arg0: i32, %arg1: i32) -> (i32, i32, i32) {
    %c0_i32 = arith.constant 0 : i32
    %c0_i32_0 = arith.constant 0 : i32
    %c0_i32_1 = arith.constant 0 : i32
    return %c0_i32, %c0_i32_0, %arg1 : i32, i32, i32
  }
  func.func @transform_2(%arg0: i32, %arg1: i32) -> (i32, i32, i32) {
    %c0_i32 = arith.constant 0 : i32
    %c0_i32_0 = arith.constant 0 : i32
    return %arg0, %c0_i32, %arg1 : i32, i32, i32
  }
}

module attributes {stable_mosaic.version = 11 : i64} {
  func.func @_conv_block_kernel(%arg0: i32, %arg1: i32, %arg2: memref<1x6x6x64xbf16, #tpu.memory_space<vmem>>, %arg3: memref<16x64x128xbf16, #tpu.memory_space<vmem>>, %arg4: memref<1x9x128xbf16, #tpu.memory_space<vmem>>) attributes {dimension_semantics = [#tpu.dimension_semantics<parallel>, #tpu.dimension_semantics<parallel>], iteration_bounds = array<i64: 2, 1>, scalar_prefetch = 0 : i64, scratch_operands = 0 : i64, tpu.core_type = #tpu.core_type<tc>, window_params = [{transform_indices = @transform_0, window_bounds = array<i64: 1, 6, 6, 64>}, {transform_indices = @transform_1, window_bounds = array<i64: 16, 64, 128>}, {transform_indices = @transform_2, window_bounds = array<i64: 1, 9, 128>}]} {
    %c0 = arith.constant 0 : index
    %c0_0 = arith.constant 0 : index
    %c0_1 = arith.constant 0 : index
    %c0_2 = arith.constant 0 : index
    %0 = vector.load %arg2[%c0, %c0_0, %c0_1, %c0_2] : memref<1x6x6x64xbf16, #tpu.memory_space<vmem>>, vector<1x6x6x64xbf16>
    %1 = vector.shape_cast %0 : vector<1x6x6x64xbf16> to vector<6x6x64xbf16>
    %2 = vector.extract_strided_slice %1 {offsets = [0, 0, 0], sizes = [3, 3, 64], strides = [1, 1, 1]} : vector<6x6x64xbf16> to vector<3x3x64xbf16>
    %3 = vector.shape_cast %2 : vector<3x3x64xbf16> to vector<9x64xbf16>
    %c0_3 = arith.constant 0 : index
    %c0_4 = arith.constant 0 : index
    %c0_5 = arith.constant 0 : index
    %4 = vector.load %arg3[%c0_3, %c0_4, %c0_5] : memref<16x64x128xbf16, #tpu.memory_space<vmem>>, vector<1x64x128xbf16>
    %5 = vector.shape_cast %4 : vector<1x64x128xbf16> to vector<64x128xbf16>
    %cst = arith.constant dense<0.000000e+00> : vector<9x128xf32>
    %6 = tpu.matmul %3, %5, %cst {dimension_numbers = #tpu.dot_dimension_numbers<[1], [0], [0], [1], [0, 0, 1, 1], [], []>} : vector<9x64xbf16>, vector<64x128xbf16>, vector<9x128xf32> -> vector<9x128xf32>
    %7 = vector.extract_strided_slice %1 {offsets = [0, 1, 0], sizes = [3, 3, 64], strides = [1, 1, 1]} : vector<6x6x64xbf16> to vector<3x3x64xbf16>
    %8 = vector.shape_cast %7 : vector<3x3x64xbf16> to vector<9x64xbf16>
    %c1 = arith.constant 1 : index
    %c0_6 = arith.constant 0 : index
    %c0_7 = arith.constant 0 : index
    %9 = vector.load %arg3[%c1, %c0_6, %c0_7] : memref<16x64x128xbf16, #tpu.memory_space<vmem>>, vector<1x64x128xbf16>
    %10 = vector.shape_cast %9 : vector<1x64x128xbf16> to vector<64x128xbf16>
    %cst_8 = arith.constant dense<0.000000e+00> : vector<9x128xf32>
    %11 = tpu.matmul %8, %10, %cst_8 {dimension_numbers = #tpu.dot_dimension_numbers<[1], [0], [0], [1], [0, 0, 1, 1], [], []>} : vector<9x64xbf16>, vector<64x128xbf16>, vector<9x128xf32> -> vector<9x128xf32>
    %12 = arith.addf %6, %11 : vector<9x128xf32>
    %13 = vector.extract_strided_slice %1 {offsets = [0, 2, 0], sizes = [3, 3, 64], strides = [1, 1, 1]} : vector<6x6x64xbf16> to vector<3x3x64xbf16>
    %14 = vector.shape_cast %13 : vector<3x3x64xbf16> to vector<9x64xbf16>
    %c2 = arith.constant 2 : index
    %c0_9 = arith.constant 0 : index
    %c0_10 = arith.constant 0 : index
    %15 = vector.load %arg3[%c2, %c0_9, %c0_10] : memref<16x64x128xbf16, #tpu.memory_space<vmem>>, vector<1x64x128xbf16>
    %16 = vector.shape_cast %15 : vector<1x64x128xbf16> to vector<64x128xbf16>
    %cst_11 = arith.constant dense<0.000000e+00> : vector<9x128xf32>
    %17 = tpu.matmul %14, %16, %cst_11 {dimension_numbers = #tpu.dot_dimension_numbers<[1], [0], [0], [1], [0, 0, 1, 1], [], []>} : vector<9x64xbf16>, vector<64x128xbf16>, vector<9x128xf32> -> vector<9x128xf32>
    %18 = arith.addf %12, %17 : vector<9x128xf32>
    %19 = vector.extract_strided_slice %1 {offsets = [0, 3, 0], sizes = [3, 3, 64], strides = [1, 1, 1]} : vector<6x6x64xbf16> to vector<3x3x64xbf16>
    %20 = vector.shape_cast %19 : vector<3x3x64xbf16> to vector<9x64xbf16>
    %c3 = arith.constant 3 : index
    %c0_12 = arith.constant 0 : index
    %c0_13 = arith.constant 0 : index
    %21 = vector.load %arg3[%c3, %c0_12, %c0_13] : memref<16x64x128xbf16, #tpu.memory_space<vmem>>, vector<1x64x128xbf16>
    %22 = vector.shape_cast %21 : vector<1x64x128xbf16> to vector<64x128xbf16>
    %cst_14 = arith.constant dense<0.000000e+00> : vector<9x128xf32>
    %23 = tpu.matmul %20, %22, %cst_14 {dimension_numbers = #tpu.dot_dimension_numbers<[1], [0], [0], [1], [0, 0, 1, 1], [], []>} : vector<9x64xbf16>, vector<64x128xbf16>, vector<9x128xf32> -> vector<9x128xf32>
    %24 = arith.addf %18, %23 : vector<9x128xf32>
    %25 = vector.extract_strided_slice %1 {offsets = [1, 0, 0], sizes = [3, 3, 64], strides = [1, 1, 1]} : vector<6x6x64xbf16> to vector<3x3x64xbf16>
    %26 = vector.shape_cast %25 : vector<3x3x64xbf16> to vector<9x64xbf16>
    %c4 = arith.constant 4 : index
    %c0_15 = arith.constant 0 : index
    %c0_16 = arith.constant 0 : index
    %27 = vector.load %arg3[%c4, %c0_15, %c0_16] : memref<16x64x128xbf16, #tpu.memory_space<vmem>>, vector<1x64x128xbf16>
    %28 = vector.shape_cast %27 : vector<1x64x128xbf16> to vector<64x128xbf16>
    %cst_17 = arith.constant dense<0.000000e+00> : vector<9x128xf32>
    %29 = tpu.matmul %26, %28, %cst_17 {dimension_numbers = #tpu.dot_dimension_numbers<[1], [0], [0], [1], [0, 0, 1, 1], [], []>} : vector<9x64xbf16>, vector<64x128xbf16>, vector<9x128xf32> -> vector<9x128xf32>
    %30 = arith.addf %24, %29 : vector<9x128xf32>
    %31 = vector.extract_strided_slice %1 {offsets = [1, 1, 0], sizes = [3, 3, 64], strides = [1, 1, 1]} : vector<6x6x64xbf16> to vector<3x3x64xbf16>
    %32 = vector.shape_cast %31 : vector<3x3x64xbf16> to vector<9x64xbf16>
    %c5 = arith.constant 5 : index
    %c0_18 = arith.constant 0 : index
    %c0_19 = arith.constant 0 : index
    %33 = vector.load %arg3[%c5, %c0_18, %c0_19] : memref<16x64x128xbf16, #tpu.memory_space<vmem>>, vector<1x64x128xbf16>
    %34 = vector.shape_cast %33 : vector<1x64x128xbf16> to vector<64x128xbf16>
    %cst_20 = arith.constant dense<0.000000e+00> : vector<9x128xf32>
    %35 = tpu.matmul %32, %34, %cst_20 {dimension_numbers = #tpu.dot_dimension_numbers<[1], [0], [0], [1], [0, 0, 1, 1], [], []>} : vector<9x64xbf16>, vector<64x128xbf16>, vector<9x128xf32> -> vector<9x128xf32>
    %36 = arith.addf %30, %35 : vector<9x128xf32>
    %37 = vector.extract_strided_slice %1 {offsets = [1, 2, 0], sizes = [3, 3, 64], strides = [1, 1, 1]} : vector<6x6x64xbf16> to vector<3x3x64xbf16>
    %38 = vector.shape_cast %37 : vector<3x3x64xbf16> to vector<9x64xbf16>
    %c6 = arith.constant 6 : index
    %c0_21 = arith.constant 0 : index
    %c0_22 = arith.constant 0 : index
    %39 = vector.load %arg3[%c6, %c0_21, %c0_22] : memref<16x64x128xbf16, #tpu.memory_space<vmem>>, vector<1x64x128xbf16>
    %40 = vector.shape_cast %39 : vector<1x64x128xbf16> to vector<64x128xbf16>
    %cst_23 = arith.constant dense<0.000000e+00> : vector<9x128xf32>
    %41 = tpu.matmul %38, %40, %cst_23 {dimension_numbers = #tpu.dot_dimension_numbers<[1], [0], [0], [1], [0, 0, 1, 1], [], []>} : vector<9x64xbf16>, vector<64x128xbf16>, vector<9x128xf32> -> vector<9x128xf32>
    %42 = arith.addf %36, %41 : vector<9x128xf32>
    %43 = vector.extract_strided_slice %1 {offsets = [1, 3, 0], sizes = [3, 3, 64], strides = [1, 1, 1]} : vector<6x6x64xbf16> to vector<3x3x64xbf16>
    %44 = vector.shape_cast %43 : vector<3x3x64xbf16> to vector<9x64xbf16>
    %c7 = arith.constant 7 : index
    %c0_24 = arith.constant 0 : index
    %c0_25 = arith.constant 0 : index
    %45 = vector.load %arg3[%c7, %c0_24, %c0_25] : memref<16x64x128xbf16, #tpu.memory_space<vmem>>, vector<1x64x128xbf16>
    %46 = vector.shape_cast %45 : vector<1x64x128xbf16> to vector<64x128xbf16>
    %cst_26 = arith.constant dense<0.000000e+00> : vector<9x128xf32>
    %47 = tpu.matmul %44, %46, %cst_26 {dimension_numbers = #tpu.dot_dimension_numbers<[1], [0], [0], [1], [0, 0, 1, 1], [], []>} : vector<9x64xbf16>, vector<64x128xbf16>, vector<9x128xf32> -> vector<9x128xf32>
    %48 = arith.addf %42, %47 : vector<9x128xf32>
    %49 = vector.extract_strided_slice %1 {offsets = [2, 0, 0], sizes = [3, 3, 64], strides = [1, 1, 1]} : vector<6x6x64xbf16> to vector<3x3x64xbf16>
    %50 = vector.shape_cast %49 : vector<3x3x64xbf16> to vector<9x64xbf16>
    %c8 = arith.constant 8 : index
    %c0_27 = arith.constant 0 : index
    %c0_28 = arith.constant 0 : index
    %51 = vector.load %arg3[%c8, %c0_27, %c0_28] : memref<16x64x128xbf16, #tpu.memory_space<vmem>>, vector<1x64x128xbf16>
    %52 = vector.shape_cast %51 : vector<1x64x128xbf16> to vector<64x128xbf16>
    %cst_29 = arith.constant dense<0.000000e+00> : vector<9x128xf32>
    %53 = tpu.matmul %50, %52, %cst_29 {dimension_numbers = #tpu.dot_dimension_numbers<[1], [0], [0], [1], [0, 0, 1, 1], [], []>} : vector<9x64xbf16>, vector<64x128xbf16>, vector<9x128xf32> -> vector<9x128xf32>
    %54 = arith.addf %48, %53 : vector<9x128xf32>
    %55 = vector.extract_strided_slice %1 {offsets = [2, 1, 0], sizes = [3, 3, 64], strides = [1, 1, 1]} : vector<6x6x64xbf16> to vector<3x3x64xbf16>
    %56 = vector.shape_cast %55 : vector<3x3x64xbf16> to vector<9x64xbf16>
    %c9 = arith.constant 9 : index
    %c0_30 = arith.constant 0 : index
    %c0_31 = arith.constant 0 : index
    %57 = vector.load %arg3[%c9, %c0_30, %c0_31] : memref<16x64x128xbf16, #tpu.memory_space<vmem>>, vector<1x64x128xbf16>
    %58 = vector.shape_cast %57 : vector<1x64x128xbf16> to vector<64x128xbf16>
    %cst_32 = arith.constant dense<0.000000e+00> : vector<9x128xf32>
    %59 = tpu.matmul %56, %58, %cst_32 {dimension_numbers = #tpu.dot_dimension_numbers<[1], [0], [0], [1], [0, 0, 1, 1], [], []>} : vector<9x64xbf16>, vector<64x128xbf16>, vector<9x128xf32> -> vector<9x128xf32>
    %60 = arith.addf %54, %59 : vector<9x128xf32>
    %61 = vector.extract_strided_slice %1 {offsets = [2, 2, 0], sizes = [3, 3, 64], strides = [1, 1, 1]} : vector<6x6x64xbf16> to vector<3x3x64xbf16>
    %62 = vector.shape_cast %61 : vector<3x3x64xbf16> to vector<9x64xbf16>
    %c10 = arith.constant 10 : index
    %c0_33 = arith.constant 0 : index
    %c0_34 = arith.constant 0 : index
    %63 = vector.load %arg3[%c10, %c0_33, %c0_34] : memref<16x64x128xbf16, #tpu.memory_space<vmem>>, vector<1x64x128xbf16>
    %64 = vector.shape_cast %63 : vector<1x64x128xbf16> to vector<64x128xbf16>
    %cst_35 = arith.constant dense<0.000000e+00> : vector<9x128xf32>
    %65 = tpu.matmul %62, %64, %cst_35 {dimension_numbers = #tpu.dot_dimension_numbers<[1], [0], [0], [1], [0, 0, 1, 1], [], []>} : vector<9x64xbf16>, vector<64x128xbf16>, vector<9x128xf32> -> vector<9x128xf32>
    %66 = arith.addf %60, %65 : vector<9x128xf32>
    %67 = vector.extract_strided_slice %1 {offsets = [2, 3, 0], sizes = [3, 3, 64], strides = [1, 1, 1]} : vector<6x6x64xbf16> to vector<3x3x64xbf16>
    %68 = vector.shape_cast %67 : vector<3x3x64xbf16> to vector<9x64xbf16>
    %c11 = arith.constant 11 : index
    %c0_36 = arith.constant 0 : index
    %c0_37 = arith.constant 0 : index
    %69 = vector.load %arg3[%c11, %c0_36, %c0_37] : memref<16x64x128xbf16, #tpu.memory_space<vmem>>, vector<1x64x128xbf16>
    %70 = vector.shape_cast %69 : vector<1x64x128xbf16> to vector<64x128xbf16>
    %cst_38 = arith.constant dense<0.000000e+00> : vector<9x128xf32>
    %71 = tpu.matmul %68, %70, %cst_38 {dimension_numbers = #tpu.dot_dimension_numbers<[1], [0], [0], [1], [0, 0, 1, 1], [], []>} : vector<9x64xbf16>, vector<64x128xbf16>, vector<9x128xf32> -> vector<9x128xf32>
    %72 = arith.addf %66, %71 : vector<9x128xf32>
    %73 = vector.extract_strided_slice %1 {offsets = [3, 0, 0], sizes = [3, 3, 64], strides = [1, 1, 1]} : vector<6x6x64xbf16> to vector<3x3x64xbf16>
    %74 = vector.shape_cast %73 : vector<3x3x64xbf16> to vector<9x64xbf16>
    %c12 = arith.constant 12 : index
    %c0_39 = arith.constant 0 : index
    %c0_40 = arith.constant 0 : index
    %75 = vector.load %arg3[%c12, %c0_39, %c0_40] : memref<16x64x128xbf16, #tpu.memory_space<vmem>>, vector<1x64x128xbf16>
    %76 = vector.shape_cast %75 : vector<1x64x128xbf16> to vector<64x128xbf16>
    %cst_41 = arith.constant dense<0.000000e+00> : vector<9x128xf32>
    %77 = tpu.matmul %74, %76, %cst_41 {dimension_numbers = #tpu.dot_dimension_numbers<[1], [0], [0], [1], [0, 0, 1, 1], [], []>} : vector<9x64xbf16>, vector<64x128xbf16>, vector<9x128xf32> -> vector<9x128xf32>
    %78 = arith.addf %72, %77 : vector<9x128xf32>
    %79 = vector.extract_strided_slice %1 {offsets = [3, 1, 0], sizes = [3, 3, 64], strides = [1, 1, 1]} : vector<6x6x64xbf16> to vector<3x3x64xbf16>
    %80 = vector.shape_cast %79 : vector<3x3x64xbf16> to vector<9x64xbf16>
    %c13 = arith.constant 13 : index
    %c0_42 = arith.constant 0 : index
    %c0_43 = arith.constant 0 : index
    %81 = vector.load %arg3[%c13, %c0_42, %c0_43] : memref<16x64x128xbf16, #tpu.memory_space<vmem>>, vector<1x64x128xbf16>
    %82 = vector.shape_cast %81 : vector<1x64x128xbf16> to vector<64x128xbf16>
    %cst_44 = arith.constant dense<0.000000e+00> : vector<9x128xf32>
    %83 = tpu.matmul %80, %82, %cst_44 {dimension_numbers = #tpu.dot_dimension_numbers<[1], [0], [0], [1], [0, 0, 1, 1], [], []>} : vector<9x64xbf16>, vector<64x128xbf16>, vector<9x128xf32> -> vector<9x128xf32>
    %84 = arith.addf %78, %83 : vector<9x128xf32>
    %85 = vector.extract_strided_slice %1 {offsets = [3, 2, 0], sizes = [3, 3, 64], strides = [1, 1, 1]} : vector<6x6x64xbf16> to vector<3x3x64xbf16>
    %86 = vector.shape_cast %85 : vector<3x3x64xbf16> to vector<9x64xbf16>
    %c14 = arith.constant 14 : index
    %c0_45 = arith.constant 0 : index
    %c0_46 = arith.constant 0 : index
    %87 = vector.load %arg3[%c14, %c0_45, %c0_46] : memref<16x64x128xbf16, #tpu.memory_space<vmem>>, vector<1x64x128xbf16>
    %88 = vector.shape_cast %87 : vector<1x64x128xbf16> to vector<64x128xbf16>
    %cst_47 = arith.constant dense<0.000000e+00> : vector<9x128xf32>
    %89 = tpu.matmul %86, %88, %cst_47 {dimension_numbers = #tpu.dot_dimension_numbers<[1], [0], [0], [1], [0, 0, 1, 1], [], []>} : vector<9x64xbf16>, vector<64x128xbf16>, vector<9x128xf32> -> vector<9x128xf32>
    %90 = arith.addf %84, %89 : vector<9x128xf32>
    %91 = vector.extract_strided_slice %1 {offsets = [3, 3, 0], sizes = [3, 3, 64], strides = [1, 1, 1]} : vector<6x6x64xbf16> to vector<3x3x64xbf16>
    %92 = vector.shape_cast %91 : vector<3x3x64xbf16> to vector<9x64xbf16>
    %c15 = arith.constant 15 : index
    %c0_48 = arith.constant 0 : index
    %c0_49 = arith.constant 0 : index
    %93 = vector.load %arg3[%c15, %c0_48, %c0_49] : memref<16x64x128xbf16, #tpu.memory_space<vmem>>, vector<1x64x128xbf16>
    %94 = vector.shape_cast %93 : vector<1x64x128xbf16> to vector<64x128xbf16>
    %cst_50 = arith.constant dense<0.000000e+00> : vector<9x128xf32>
    %95 = tpu.matmul %92, %94, %cst_50 {dimension_numbers = #tpu.dot_dimension_numbers<[1], [0], [0], [1], [0, 0, 1, 1], [], []>} : vector<9x64xbf16>, vector<64x128xbf16>, vector<9x128xf32> -> vector<9x128xf32>
    %96 = arith.addf %90, %95 : vector<9x128xf32>
    %cst_51 = arith.constant dense<0.000000e+00> : vector<128xf32>
    %97 = vector.multi_reduction <add>, %96, %cst_51 [0] : vector<9x128xf32> to vector<128xf32>
    %98 = vector.shape_cast %97 : vector<128xf32> to vector<1x128xf32>
    %cst_52 = arith.constant 9.000000e+00 : f32
    %99 = vector.broadcast %cst_52 : f32 to vector<1x128xf32>
    %100 = arith.divf %98, %99 : vector<1x128xf32>
    %101 = arith.mulf %96, %96 : vector<9x128xf32>
    %cst_53 = arith.constant dense<0.000000e+00> : vector<128xf32>
    %102 = vector.multi_reduction <add>, %101, %cst_53 [0] : vector<9x128xf32> to vector<128xf32>
    %103 = vector.shape_cast %102 : vector<128xf32> to vector<1x128xf32>
    %cst_54 = arith.constant 9.000000e+00 : f32
    %104 = vector.broadcast %cst_54 : f32 to vector<1x128xf32>
    %105 = arith.divf %103, %104 : vector<1x128xf32>
    %106 = arith.mulf %100, %100 : vector<1x128xf32>
    %107 = arith.subf %105, %106 : vector<1x128xf32>
    %cst_55 = arith.constant 9.99999974E-6 : f32
    %108 = vector.broadcast %cst_55 : f32 to vector<1x128xf32>
    %109 = arith.addf %107, %108 : vector<1x128xf32>
    %110 = math.rsqrt %109 : vector<1x128xf32>
    %111 = vector.broadcast %110 : vector<1x128xf32> to vector<9x128xf32>
    %112 = arith.mulf %96, %111 : vector<9x128xf32>
    %113 = arith.mulf %100, %110 : vector<1x128xf32>
    %114 = vector.broadcast %113 : vector<1x128xf32> to vector<9x128xf32>
    %115 = arith.subf %112, %114 : vector<9x128xf32>
    %cst_56 = arith.constant 0.000000e+00 : f32
    %116 = vector.broadcast %cst_56 : f32 to vector<9x128xf32>
    %117 = arith.cmpf oge, %115, %116 : vector<9x128xf32>
    %cst_57 = arith.constant 2.000000e-01 : f32
    %118 = vector.broadcast %cst_57 : f32 to vector<9x128xf32>
    %119 = arith.mulf %118, %115 : vector<9x128xf32>
    %120 = arith.select %117, %115, %119 : vector<9x128xi1>, vector<9x128xf32>
    %121 = arith.truncf %120 : vector<9x128xf32> to vector<9x128xbf16>
    %c0_58 = arith.constant 0 : index
    %c0_59 = arith.constant 0 : index
    %c0_60 = arith.constant 0 : index
    %122 = vector.load %arg4[%c0_58, %c0_59, %c0_60] : memref<1x9x128xbf16, #tpu.memory_space<vmem>>, vector<1x9x128xbf16>
    %123 = vector.shape_cast %122 : vector<1x9x128xbf16> to vector<9x128xbf16>
    %124 = vector.shape_cast %121 : vector<9x128xbf16> to vector<1x9x128xbf16>
    tpu.vector_store %arg4[%c0_58, %c0_59, %c0_60], %124 {strides = array<i32>} : memref<1x9x128xbf16, #tpu.memory_space<vmem>>, vector<1x9x128xbf16>,
    return
  }
  func.func @transform_0(%arg0: i32, %arg1: i32) -> (i32, i32, i32, i32) {
    %c0_i32 = arith.constant 0 : i32
    %c0_i32_0 = arith.constant 0 : i32
    %c0_i32_1 = arith.constant 0 : i32
    %c0_i32_2 = arith.constant 0 : i32
    return %arg0, %c0_i32, %c0_i32_0, %c0_i32_1 : i32, i32, i32, i32
  }
  func.func @transform_1(%arg0: i32, %arg1: i32) -> (i32, i32, i32) {
    %c0_i32 = arith.constant 0 : i32
    %c0_i32_0 = arith.constant 0 : i32
    %c0_i32_1 = arith.constant 0 : i32
    return %c0_i32, %c0_i32_0, %arg1 : i32, i32, i32
  }
  func.func @transform_2(%arg0: i32, %arg1: i32) -> (i32, i32, i32) {
    %c0_i32 = arith.constant 0 : i32
    %c0_i32_0 = arith.constant 0 : i32
    return %arg0, %c0_i32, %arg1 : i32, i32, i32
  }
}

</mosaic_0001>

<bundles_post_ra>
// kernel: _lambda_.5
= control target key start
LH: loop header
LB: loop body
LE: loop exit
PB: predicated region body
PF: predicated region fallthrough
CT: control target
= control target key end

     0   :  { %s2526_s12 = smov 0   ;;  %s2528_s13 = smov 0   ;;  %s3198_s0 = inlined_call_operand.vmem [shape: bf16[2,17,17,8], index: 0, kind: input, shape index: {}]   ;;  %s3199_s1 = inlined_call_operand.vmem [shape: bf16[4,8,16], index: 1, kind: input, shape index: {}]   ;;  %s3200_s2 = inlined_call_operand.vmem [shape: f32[1,16], index: 2, kind: input, shape index: {}]   ;;  %s3201_s3 = inlined_call_operand.vmem [shape: bf16[2,256,16], index: 3, kind: output, shape index: {}]  }
   0x1   :  { %s2530_s14 = smov 0  }
   0x2 LB: > { %s25_s15 = sadd.s32 1, %s2500_s13  ;;  %p2059_p0 = scmp.ge.s32.totalorder %s2504_s14, 1  ;;  %s2504_s14 = sphi %s2530_s14, %s13_s14   ;;  %s2500_s13 = sphi %s2528_s13, %s3245_s13   ;;  %s2496_s12 = sphi %s2526_s12, %s3244_s12  }
   0x3   : > { %p27_p1 = scmp.ge.s32.totalorder %s25_s15, 2  ;;  %p168_p2 = scmp.lt.s32.totalorder %s2504_s14, 3 }
   0x5   : > { %s3247_s15 = smov (%p27_p1, %s25_s15), 0  ;;  %p169_p3 = pnand %p2059_p0, %p168_p2 }
   0x7   : > { %172 = sbr.rel (%p169_p3) target bundleno = 371 (0x173), region = 32 }
   0xc   : > { %v274_v0 = vld [vmem:[%s3199_s1] sm:$0xf]  ;;  %vm761_vm0 = vcmask 1043456   ;;  %v2063_v1 = vld [vmem:[%s3199_s1 + $0x4] sm:$0xf]  ;;  %p202_p4 = scmp.lt.s32.totalorder %s2496_s12, 1 }
   0xd   : > { %2437 = vmatprep.subr.msk.bf16.mxu1 %vm761_vm0, %v274_v0  ;;  %v1055_v2 = vsel %vm761_vm0, %v274_v0, 0  ;;  %2436 = vmatprep.subr.msk.bf16.mxu0 %vm761_vm0, %v2063_v1  ;;  %v763_v3 = vsel %vm761_vm0, %v2063_v1, 0  ;;  %v2128_v4 = vld [vmem:[%s3199_s1 + $0x8] sm:$0xf]  ;;  %v2146_v5 = vld [vmem:[%s3199_s1 + $0xc] sm:$0xf] }
   0xe   : > { %2335 = vmatpush3.bf16.msra.mxu1 %v1055_v2  ;;  %s3249_s12 = smov (!%p202_p4, %s2496_s12), 1  ;;  %2301 = vmatpush3.bf16.msra.mxu0 %v763_v3  ;;  %vm712_vm1 = vcmask 64512   ;;  %vm275_vm2 = vsmask.f32 3328  ;;  %vm276_vm3 = vsmask.f32 7440 }
   0xf   : > { %2438 = vmatprep.subr.msk.bf16.mxu0 %vm761_vm0, %v2128_v4  ;;  %s2440_s24 = smul.u32 204, %s3249_s12  ;;  %2439 = vmatprep.subr.msk.bf16.mxu1 %vm761_vm0, %v2146_v5  ;;  %v2571_v6 = vsel %vm761_vm0, %v2128_v4, 0  ;;  %v1457_v7 = vsel %vm761_vm0, %v2146_v5, 0  ;;  %vm2586_vm4 = vmor %vm275_vm2, %vm276_vm3  ;;  %s2199_s30 = sshll.u32 %s3249_s12, 7  ;;  %vm1915_vm6 = vcmask 125952  }
  0x10   : > { %s3023_s6 = scalar_lea.vmem %s3201_s3, %s2199_s30 }
  0x11   : > { %s2568_s27 = scalar_lea.vmem %s3198_s0, %s2440_s24 }
  0x12   : > { %v223_v8 = vld [vmem:[%s2568_s27] sm:$0xf]  ;;  %v224_v9 = vld [vmem:[%s2568_s27 + $0x4] sm:$0xf]  ;;  %v226_v10 = vld [vmem:[%s2568_s27 + $0xc] sm:$0xf] }
  0x13   : > { %v279_v11 = vshrl.u32 %v223_v8, 16  ;;  %v282_v12 = vshll.u32 %v223_v8, 16  ;;  %v288_v13 = vshll.u32 %v224_v9, 16  ;;  %v292_v14 = vshrl.u32 %v224_v9, 16  ;;  %v227_v15 = vld [vmem:[%s2568_s27 + $0x10] sm:$0xf] }
  0x14   : > { %v2096_v16 = vcombine.low %v223_v8, %v224_v9  ;;  %v303_v17 = vshrl.u32 %v226_v10, 16  ;;  %v306_v18 = vshll.u32 %v226_v10, 16  ;;  %v312_v19 = vshll.u32 %v227_v15, 16  ;;  %v225_v20 = vld [vmem:[%s2568_s27 + $0x8] sm:$0x1] }
  0x15   : > { %v281_v21 = vrot.slane %v279_v11, 4  ;;  %v284_v22 = vrot.slane %v282_v12, 5  ;;  %v290_v23 = vrot.slane %v288_v13, 5  ;;  %v294_v24 = vrot.slane %v292_v14, 4  ;;  %v228_v25 = vld [vmem:[%s2568_s27 + $0x14] sm:$0x1] }
  0x16   : > { %2336 = vmatprep.mubr.msk.bf16.mxu1 %vm712_vm1, %v2096_v16  ;;  %v305_v26 = vrot.slane %v303_v17, 4  ;;  %v308_v27 = vrot.slane %v306_v18, 5  ;;  %v314_v28 = vrot.slane %v312_v19, 5  ;;  %v316_v29 = vshrl.u32 %v227_v15, 16  ;;  %v229_v30 = vld [vmem:[%s2568_s27 + $0x18] sm:$0xf] }
  0x17   : > { %v2582_v31 = vcombine.low %v226_v10, %v227_v15  ;;  %v285_v32 = vor.u32 %v284_v22, %v281_v21  ;;  %v295_v33 = vor.u32 %v294_v24, %v290_v23  ;;  %v298_v34 = vshll.u32 %v225_v20, 16  ;;  %v230_v39 = vld [vmem:[%s2568_s27 + $0x1c] sm:$0xf]  ;;  %v232_v49 = vld [vmem:[%s2568_s27 + $0x24] sm:$0xf] }
  0x18   : > { %v318_v35 = vrot.slane %v316_v29, 4  ;;  %v309_v37 = vor.u32 %v308_v27, %v305_v26  ;;  %v322_v38 = vshll.u32 %v228_v25, 16  ;;  %v327_v40 = vshrl.u32 %v229_v30, 16  ;;  %v233_v54 = vld [vmem:[%s2568_s27 + $0x28] sm:$0xf] }
  0x19   : > { %2337 = vmatmul.mubr.msk.bf16.vlgmr.msra.gmra.mxu1 %vm712_vm1, %v2582_v31  ;;  %v286_v41 = vrot.slane %v285_v32, 4  ;;  %v296_v42 = vrot.slane %v295_v33, 4  ;;  %v300_v43 = vrot.slane %v298_v34, 5  ;;  %v330_v44 = vshll.u32 %v229_v30, 16  ;;  %v231_v59 = vld [vmem:[%s2568_s27 + $0x20] sm:$0x1] }
  0x1a   : > { %v310_v45 = vrot.slane %v309_v37, 4  ;;  %v319_v46 = vor.u32 %v318_v35, %v314_v28  ;;  %v324_v47 = vrot.slane %v322_v38, 5  ;;  %2403 = vmatpush3.bf16.msra.mxu1 %v1457_v7  ;;  %v329_v48 = vrot.slane %v327_v40, 4  ;;  %v234_v0 = vld [vmem:[%s2568_s27 + $0x2c] sm:$0x1] }
  0x1b   : > { %v291_v50 = vsel %vm2586_vm4, %v286_v41, %v290_v23  ;;  %v301_v51 = vsel %vm2586_vm4, %v296_v42, %v300_v43  ;;  %v332_v52 = vrot.slane %v330_v44, 5  ;;  %v336_v53 = vshll.u32 %v230_v39, 16  ;;  %v235_v5 = vld [vmem:[%s2568_s27 + $0x30] sm:$0xf]  ;;  %v236_v18 = vld [vmem:[%s2568_s27 + $0x34] sm:$0xf] }
  0x1c   : > { %v2064_v55 = vcombine.low %v291_v50, %v301_v51  ;;  %v315_v56 = vsel %vm2586_vm4, %v310_v45, %v314_v28  ;;  %v320_v57 = vrot.slane %v319_v46, 4  ;;  %v340_v58 = vshrl.u32 %v230_v39, 16  ;;  %v238_v28 = vld [vmem:[%s2568_s27 + $0x3c] sm:$0xf]  ;;  %v239_v34 = vld [vmem:[%s2568_s27 + $0x40] sm:$0xf] }
  0x1d   : > { %v338_v60 = vrot.slane %v336_v53, 5  ;;  %v2602_v61 = vcombine.low %v229_v30, %v230_v39  ;;  %v351_v62 = vshrl.u32 %v232_v49, 16  ;;  %v354_v63 = vshll.u32 %v232_v49, 16  ;;  %v237_v43 = vld [vmem:[%s2568_s27 + $0x38] sm:$0x1] }
  0x1e   : > { %2302 = vmatprep.mubr.msk.bf16.mxu0 %vm712_vm1, %v2064_v55  ;;  %v325_v1 = vsel %vm2586_vm4, %v320_v57, %v324_v47  ;;  %v342_v2 = vrot.slane %v340_v58, 4  ;;  %v360_v3 = vshll.u32 %v233_v54, 16  ;;  %v364_v4 = vshrl.u32 %v233_v54, 16  ;;  %v240_v44 = vld [vmem:[%s2568_s27 + $0x44] sm:$0x1] }
  0x1f   : > { %v2609_v7 = vcombine.low %v315_v56, %v325_v1  ;;  %2340 = vmatprep.mubr.msk.bf16.mxu1 %vm712_vm1, %v2602_v61  ;;  %v353_v8 = vrot.slane %v351_v62, 4  ;;  %v356_v9 = vrot.slane %v354_v63, 5  ;;  %v2613_v10 = vcombine.low %v232_v49, %v233_v54  ;;  %v241_v49 = vld [vmem:[%s2568_s27 + $0x48] sm:$0xf]  ;;  %v242_v62 = vld [vmem:[%s2568_s27 + $0x4c] sm:$0xf] }
  0x20   : > { %v362_v11 = vrot.slane %v360_v3, 5  ;;  %v366_v12 = vrot.slane %v364_v4, 4  ;;  %v333_v13 = vor.u32 %v332_v52, %v329_v48  ;;  %v343_v14 = vor.u32 %v342_v2, %v338_v60 }
  0x21   : > { %2303 = vmatmul.mubr.msk.bf16.vlgmr.msra.gmra.mxu0 %vm712_vm1, %v2609_v7  ;;  %2341 = vmatmul.mubr.msk.bf16.gmra.mxu1 %vm712_vm1, %v2613_v10  ;;  %v346_v15 = vshll.u32 %v231_v59, 16  ;;  %v357_v16 = vor.u32 %v356_v9, %v353_v8  ;;  %v370_v17 = vshll.u32 %v234_v0, 16  ;;  %v375_v19 = vshrl.u32 %v235_v5, 16 }
  0x22   : > { %2369 = vmatpush3.bf16.msra.mxu0 %v2571_v6  ;;  %v334_v20 = vrot.slane %v333_v13, 4  ;;  %v344_v21 = vrot.slane %v343_v14, 4  ;;  %v367_v22 = vor.u32 %v366_v12, %v362_v11  ;;  %v378_v23 = vshll.u32 %v235_v5, 16 }
  0x23   : > { %v348_v24 = vrot.slane %v346_v15, 5  ;;  %v358_v25 = vrot.slane %v357_v16, 4  ;;  %v372_v26 = vrot.slane %v370_v17, 5  ;;  %v377_v27 = vrot.slane %v375_v19, 4  ;;  %v245_v16 = vld [vmem:[%s2568_s27 + $0x58] sm:$0xf] }
  0x24   : > { %v339_v29 = vsel %vm2586_vm4, %v334_v20, %v338_v60  ;;  %v368_v30 = vrot.slane %v367_v22, 4  ;;  %v380_v32 = vrot.slane %v378_v23, 5  ;;  %v384_v33 = vshll.u32 %v236_v18, 16 }
  0x25   : > { %v349_v6 = vsel %vm2586_vm4, %v344_v21, %v348_v24  ;;  %v363_v35 = vsel %vm2586_vm4, %v358_v25, %v362_v11  ;;  %v388_v37 = vshrl.u32 %v236_v18, 16  ;;  %v2629_v38 = vcombine.low %v235_v5, %v236_v18  ;;  %v244_v11 = vld [vmem:[%s2568_s27 + $0x54] sm:$0xf]  ;;  %v243_v21 = vld [vmem:[%s2568_s27 + $0x50] sm:$0x1] }
  0x26   : > { %v2631_v39 = vcombine.low %v339_v29, %v349_v6  ;;  %v373_v40 = vsel %vm2586_vm4, %v368_v30, %v372_v26  ;;  %v386_v41 = vrot.slane %v384_v33, 5  ;;  %v399_v42 = vshrl.u32 %v238_v28, 16  ;;  %v246_v26 = vld [vmem:[%s2568_s27 + $0x5c] sm:$0x1] }
  0x27   : > { %v2637_v45 = vcombine.low %v363_v35, %v373_v40  ;;  %v390_v46 = vrot.slane %v388_v37, 4  ;;  %2344 = vmatprep.mubr.msk.bf16.mxu1 %vm712_vm1, %v2629_v38  ;;  %v402_v47 = vshll.u32 %v238_v28, 16  ;;  %v408_v48 = vshll.u32 %v239_v34, 16 }
  0x28   : > { %2306 = vmatprep.mubr.msk.bf16.mxu0 %vm712_vm1, %v2631_v39  ;;  %v401_v50 = vrot.slane %v399_v42, 4  ;;  %v412_v51 = vshrl.u32 %v239_v34, 16  ;;  %v2644_v52 = vcombine.low %v238_v28, %v239_v34  ;;  %v381_v53 = vor.u32 %v380_v32, %v377_v27  ;;  %v247_v32 = vld [vmem:[%s2568_s27 + $0x60] sm:$0xf] }
  0x29   : > { %2307 = vmatmul.mubr.msk.bf16.gmra.mxu0 %vm712_vm1, %v2637_v45  ;;  %v404_v54 = vrot.slane %v402_v47, 5  ;;  %v410_v55 = vrot.slane %v408_v48, 5  ;;  %v391_v56 = vor.u32 %v390_v46, %v386_v41  ;;  %v394_v57 = vshll.u32 %v237_v43, 16  ;;  %v248_v47 = vld [vmem:[%s2568_s27 + $0x64] sm:$0xf] }
  0x2a   : > { %v414_v58 = vrot.slane %v412_v51, 4  ;;  %2345 = vmatmul.mubr.msk.bf16.gmra.mxu1 %vm712_vm1, %v2644_v52  ;;  %v382_v59 = vrot.slane %v381_v53, 4  ;;  %v418_v60 = vshll.u32 %v240_v44, 16  ;;  %v423_v63 = vshrl.u32 %v241_v49, 16 }
  0x2b   : > { %v392_v0 = vrot.slane %v391_v56, 4  ;;  %v396_v1 = vrot.slane %v394_v57, 5  ;;  %v405_v2 = vor.u32 %v404_v54, %v401_v50  ;;  %v426_v3 = vshll.u32 %v241_v49, 16 }
  0x2c   : > { %v387_v4 = vsel %vm2586_vm4, %v382_v59, %v386_v41  ;;  %v415_v5 = vor.u32 %v414_v58, %v410_v55  ;;  %v420_v8 = vrot.slane %v418_v60, 5  ;;  %v425_v9 = vrot.slane %v423_v63, 4  ;;  %v250_v58 = vld [vmem:[%s2568_s27 + $0x6c] sm:$0xf] }
  0x2d   : > { %v397_v12 = vsel %vm2586_vm4, %v392_v0, %v396_v1  ;;  %v406_v13 = vrot.slane %v405_v2, 4  ;;  %v428_v14 = vrot.slane %v426_v3, 5  ;;  %v432_v15 = vshll.u32 %v242_v62, 16  ;;  %v251_v0 = vld [vmem:[%s2568_s27 + $0x70] sm:$0xf] }
  0x2e   : > { %v2657_v17 = vcombine.low %v387_v4, %v397_v12  ;;  %v416_v18 = vrot.slane %v415_v5, 4  ;;  %v436_v19 = vshrl.u32 %v242_v62, 16  ;;  %v2659_v20 = vcombine.low %v241_v49, %v242_v62  ;;  %v249_v12 = vld [vmem:[%s2568_s27 + $0x68] sm:$0x1] }
  0x2f   : > { %v411_v22 = vsel %vm2586_vm4, %v406_v13, %v410_v55  ;;  %v434_v23 = vrot.slane %v432_v15, 5  ;;  %v447_v24 = vshrl.u32 %v244_v11, 16  ;;  %v450_v25 = vshll.u32 %v244_v11, 16  ;;  %v252_v13 = vld [vmem:[%s2568_s27 + $0x74] sm:$0x1] }
  0x30   : > { %2310 = vmatprep.mubr.msk.bf16.mxu0 %vm712_vm1, %v2657_v17  ;;  %v421_v27 = vsel %vm2586_vm4, %v416_v18, %v420_v8  ;;  %v438_v28 = vrot.slane %v436_v19, 4  ;;  %2348 = vmatprep.mubr.msk.bf16.mxu1 %vm712_vm1, %v2659_v20  ;;  %v456_v29 = vshll.u32 %v245_v16, 16  ;;  %v460_v30 = vshrl.u32 %v245_v16, 16  ;;  %v253_v19 = vld [vmem:[%s2568_s27 + $0x78] sm:$0xf] }
  0x31   : > { %v2672_v33 = vcombine.low %v411_v22, %v421_v27  ;;  %v449_v34 = vrot.slane %v447_v24, 4  ;;  %v452_v6 = vrot.slane %v450_v25, 5  ;;  %v2674_v35 = vcombine.low %v244_v11, %v245_v16 }
  0x32   : > { %v458_v37 = vrot.slane %v456_v29, 5  ;;  %v462_v40 = vrot.slane %v460_v30, 4  ;;  %v429_v41 = vor.u32 %v428_v14, %v425_v9  ;;  %v439_v42 = vor.u32 %v438_v28, %v434_v23 }
  0x33   : > { %2311 = vmatmul.mubr.msk.bf16.gmra.mxu0 %vm712_vm1, %v2672_v33  ;;  %2349 = vmatmul.mubr.msk.bf16.gmra.mxu1 %vm712_vm1, %v2674_v35  ;;  %v442_v43 = vshll.u32 %v243_v21, 16  ;;  %v453_v44 = vor.u32 %v452_v6, %v449_v34  ;;  %v466_v46 = vshll.u32 %v246_v26, 16  ;;  %v471_v48 = vshrl.u32 %v247_v32, 16  ;;  %v254_v34 = vld [vmem:[%s2568_s27 + $0x7c] sm:$0xf] }
  0x34   : > { %v430_v49 = vrot.slane %v429_v41, 4  ;;  %v440_v50 = vrot.slane %v439_v42, 4  ;;  %v463_v51 = vor.u32 %v462_v40, %v458_v37  ;;  %v474_v53 = vshll.u32 %v247_v32, 16 }
  0x35   : > { %v444_v54 = vrot.slane %v442_v43, 5  ;;  %v454_v55 = vrot.slane %v453_v44, 4  ;;  %v468_v56 = vrot.slane %v466_v46, 5  ;;  %v473_v57 = vrot.slane %v471_v48, 4  ;;  %v256_v48 = vld [vmem:[%s2568_s27 + $0x84] sm:$0xf] }
  0x36   : > { %v435_v59 = vsel %vm2586_vm4, %v430_v49, %v434_v23  ;;  %v464_v60 = vrot.slane %v463_v51, 4  ;;  %v476_v62 = vrot.slane %v474_v53, 5  ;;  %v480_v63 = vshll.u32 %v248_v47, 16 }
  0x37   : > { %v445_v1 = vsel %vm2586_vm4, %v440_v50, %v444_v54  ;;  %v459_v2 = vsel %vm2586_vm4, %v454_v55, %v458_v37  ;;  %v484_v3 = vshrl.u32 %v248_v47, 16  ;;  %v2689_v4 = vcombine.low %v247_v32, %v248_v47  ;;  %v257_v54 = vld [vmem:[%s2568_s27 + $0x88] sm:$0xf] }
  0x38   : > { %v2691_v5 = vcombine.low %v435_v59, %v445_v1  ;;  %v469_v8 = vsel %vm2586_vm4, %v464_v60, %v468_v56  ;;  %v482_v9 = vrot.slane %v480_v63, 5  ;;  %v495_v11 = vshrl.u32 %v250_v58, 16  ;;  %v255_v59 = vld [vmem:[%s2568_s27 + $0x80] sm:$0x1]  ;;  %v258_v1 = vld [vmem:[%s2568_s27 + $0x8c] sm:$0x1] }
  0x39   : > { %v2697_v14 = vcombine.low %v459_v2, %v469_v8  ;;  %v486_v15 = vrot.slane %v484_v3, 4  ;;  %2352 = vmatprep.mubr.msk.bf16.mxu1 %vm712_vm1, %v2689_v4  ;;  %v498_v16 = vshll.u32 %v250_v58, 16  ;;  %v504_v18 = vshll.u32 %v251_v0, 16 }
  0x3a   : > { %2314 = vmatprep.mubr.msk.bf16.mxu0 %vm712_vm1, %v2691_v5  ;;  %v497_v21 = vrot.slane %v495_v11, 4  ;;  %v508_v22 = vshrl.u32 %v251_v0, 16  ;;  %v2704_v23 = vcombine.low %v250_v58, %v251_v0  ;;  %v477_v24 = vor.u32 %v476_v62, %v473_v57  ;;  %v259_v11 = vld [vmem:[%s2568_s27 + $0x90] sm:$0xf] }
  0x3b   : > { %2315 = vmatmul.mubr.msk.bf16.gmra.mxu0 %vm712_vm1, %v2697_v14  ;;  %v500_v25 = vrot.slane %v498_v16, 5  ;;  %v506_v26 = vrot.slane %v504_v18, 5  ;;  %v487_v27 = vor.u32 %v486_v15, %v482_v9  ;;  %v490_v28 = vshll.u32 %v249_v12, 16 }
  0x3c   : > { %v510_v29 = vrot.slane %v508_v22, 4  ;;  %2353 = vmatmul.mubr.msk.bf16.gmra.mxu1 %vm712_vm1, %v2704_v23  ;;  %v478_v30 = vrot.slane %v477_v24, 4  ;;  %v514_v32 = vshll.u32 %v252_v13, 16  ;;  %v519_v6 = vshrl.u32 %v253_v19, 16 }
  0x3d   : > { %v488_v37 = vrot.slane %v487_v27, 4  ;;  %v492_v40 = vrot.slane %v490_v28, 5  ;;  %v501_v41 = vor.u32 %v500_v25, %v497_v21  ;;  %v522_v42 = vshll.u32 %v253_v19, 16  ;;  %v260_v27 = vld [vmem:[%s2568_s27 + $0x94] sm:$0xf] }
  0x3e   : > { %v483_v43 = vsel %vm2586_vm4, %v478_v30, %v482_v9  ;;  %v511_v44 = vor.u32 %v510_v29, %v506_v26  ;;  %v516_v46 = vrot.slane %v514_v32, 5  ;;  %v521_v47 = vrot.slane %v519_v6, 4 }
  0x3f   : > { %v493_v49 = vsel %vm2586_vm4, %v488_v37, %v492_v40  ;;  %v502_v50 = vrot.slane %v501_v41, 4  ;;  %v524_v51 = vrot.slane %v522_v42, 5  ;;  %v528_v53 = vshll.u32 %v254_v34, 16  ;;  %v262_v42 = vld [vmem:[%s2568_s27 + $0x9c] sm:$0xf] }
  0x40   : > { %v2717_v55 = vcombine.low %v483_v43, %v493_v49  ;;  %v512_v56 = vrot.slane %v511_v44, 4  ;;  %v532_v57 = vshrl.u32 %v254_v34, 16  ;;  %v2719_v58 = vcombine.low %v253_v19, %v254_v34 }
  0x41   : > { %v507_v60 = vsel %vm2586_vm4, %v502_v50, %v506_v26  ;;  %v530_v62 = vrot.slane %v528_v53, 5  ;;  %v543_v63 = vshrl.u32 %v256_v48, 16  ;;  %v546_v0 = vshll.u32 %v256_v48, 16 }
  0x42   : > { %2318 = vmatprep.mubr.msk.bf16.mxu0 %vm712_vm1, %v2717_v55  ;;  %v517_v2 = vsel %vm2586_vm4, %v512_v56, %v516_v46  ;;  %v534_v3 = vrot.slane %v532_v57, 4  ;;  %2356 = vmatprep.mubr.msk.bf16.mxu1 %vm712_vm1, %v2719_v58  ;;  %v552_v8 = vshll.u32 %v257_v54, 16  ;;  %v556_v9 = vshrl.u32 %v257_v54, 16 }
  0x43   : > { %v2732_v12 = vcombine.low %v507_v60, %v517_v2  ;;  %v545_v13 = vrot.slane %v543_v63, 4  ;;  %v548_v15 = vrot.slane %v546_v0, 5  ;;  %v2734_v16 = vcombine.low %v256_v48, %v257_v54  ;;  %v263_v48 = vld [vmem:[%s2568_s27 + $0xa0] sm:$0xf]  ;;  %v261_v60 = vld [vmem:[%s2568_s27 + $0x98] sm:$0x1] }
  0x44   : > { %v554_v18 = vrot.slane %v552_v8, 5  ;;  %v558_v19 = vrot.slane %v556_v9, 4  ;;  %v525_v21 = vor.u32 %v524_v51, %v521_v47  ;;  %v535_v22 = vor.u32 %v534_v3, %v530_v62  ;;  %v265_v3 = vld [vmem:[%s2568_s27 + $0xa8] sm:$0xf] }
  0x45   : > { %2319 = vmatmul.mubr.msk.bf16.gmra.mxu0 %vm712_vm1, %v2732_v12  ;;  %2357 = vmatmul.mubr.msk.bf16.gmra.mxu1 %vm712_vm1, %v2734_v16  ;;  %v538_v24 = vshll.u32 %v255_v59, 16  ;;  %v549_v25 = vor.u32 %v548_v15, %v545_v13  ;;  %v562_v26 = vshll.u32 %v258_v1, 16  ;;  %v567_v28 = vshrl.u32 %v259_v11, 16 }
  0x46   : > { %v526_v29 = vrot.slane %v525_v21, 4  ;;  %v536_v30 = vrot.slane %v535_v22, 4  ;;  %v559_v32 = vor.u32 %v558_v19, %v554_v18  ;;  %v570_v34 = vshll.u32 %v259_v11, 16 }
  0x47   : > { %v540_v6 = vrot.slane %v538_v24, 5  ;;  %v550_v37 = vrot.slane %v549_v25, 4  ;;  %v564_v40 = vrot.slane %v562_v26, 5  ;;  %v569_v41 = vrot.slane %v567_v28, 4  ;;  %v266_v26 = vld [vmem:[%s2568_s27 + $0xac] sm:$0xf] }
  0x48   : > { %v531_v43 = vsel %vm2586_vm4, %v526_v29, %v530_v62  ;;  %v560_v44 = vrot.slane %v559_v32, 4  ;;  %v572_v46 = vrot.slane %v570_v34, 5  ;;  %v576_v47 = vshll.u32 %v260_v27, 16  ;;  %v264_v62 = vld [vmem:[%s2568_s27 + $0xa4] sm:$0x1] }
  0x49   : > { %v541_v49 = vsel %vm2586_vm4, %v536_v30, %v540_v6  ;;  %v555_v50 = vsel %vm2586_vm4, %v550_v37, %v554_v18  ;;  %v580_v51 = vshrl.u32 %v260_v27, 16  ;;  %v2749_v53 = vcombine.low %v259_v11, %v260_v27 }
  0x4a   : > { %v2751_v54 = vcombine.low %v531_v43, %v541_v49  ;;  %v565_v56 = vsel %vm2586_vm4, %v560_v44, %v564_v40  ;;  %v578_v57 = vrot.slane %v576_v47, 5  ;;  %v591_v59 = vshrl.u32 %v262_v42, 16  ;;  %v269_v47 = vld [vmem:[%s2568_s27 + $0xb8] sm:$0xf] }
  0x4b   : > { %v2757_v63 = vcombine.low %v555_v50, %v565_v56  ;;  %v582_v0 = vrot.slane %v580_v51, 4  ;;  %2360 = vmatprep.mubr.msk.bf16.mxu1 %vm712_vm1, %v2749_v53  ;;  %v594_v1 = vshll.u32 %v262_v42, 16  ;;  %v600_v2 = vshll.u32 %v263_v48, 16 }
  0x4c   : > { %2322 = vmatprep.mubr.msk.bf16.mxu0 %vm712_vm1, %v2751_v54  ;;  %v593_v8 = vrot.slane %v591_v59, 4  ;;  %v604_v9 = vshrl.u32 %v263_v48, 16  ;;  %v2764_v11 = vcombine.low %v262_v42, %v263_v48  ;;  %v573_v13 = vor.u32 %v572_v46, %v569_v41  ;;  %v268_v41 = vld [vmem:[%s2568_s27 + $0xb4] sm:$0xf] }
  0x4d   : > { %2323 = vmatmul.mubr.msk.bf16.gmra.mxu0 %vm712_vm1, %v2757_v63  ;;  %v596_v15 = vrot.slane %v594_v1, 5  ;;  %v602_v18 = vrot.slane %v600_v2, 5  ;;  %v583_v19 = vor.u32 %v582_v0, %v578_v57  ;;  %v586_v21 = vshll.u32 %v261_v60, 16 }
  0x4e   : > { %v606_v22 = vrot.slane %v604_v9, 4  ;;  %2361 = vmatmul.mubr.msk.bf16.gmra.mxu1 %vm712_vm1, %v2764_v11  ;;  %v574_v24 = vrot.slane %v573_v13, 4  ;;  %v610_v25 = vshll.u32 %v264_v62, 16  ;;  %v615_v27 = vshrl.u32 %v265_v3, 16  ;;  %v267_v62 = vld [vmem:[%s2568_s27 + $0xb0] sm:$0x1] }
  0x4f   : > { %v584_v28 = vrot.slane %v583_v19, 4  ;;  %v588_v29 = vrot.slane %v586_v21, 5  ;;  %v597_v30 = vor.u32 %v596_v15, %v593_v8  ;;  %v618_v32 = vshll.u32 %v265_v3, 16  ;;  %v270_v8 = vld [vmem:[%s2568_s27 + $0xbc] sm:$0x1] }
  0x50   : > { %v579_v34 = vsel %vm2586_vm4, %v574_v24, %v578_v57  ;;  %v607_v6 = vor.u32 %v606_v22, %v602_v18  ;;  %v612_v37 = vrot.slane %v610_v25, 5  ;;  %v617_v40 = vrot.slane %v615_v27, 4 }
  0x51   : > { %v589_v42 = vsel %vm2586_vm4, %v584_v28, %v588_v29  ;;  %v598_v43 = vrot.slane %v597_v30, 4  ;;  %v620_v44 = vrot.slane %v618_v32, 5  ;;  %v624_v46 = vshll.u32 %v266_v26, 16 }
  0x52   : > { %v2777_v48 = vcombine.low %v579_v34, %v589_v42  ;;  %v608_v49 = vrot.slane %v607_v6, 4  ;;  %v628_v50 = vshrl.u32 %v266_v26, 16  ;;  %v2779_v51 = vcombine.low %v265_v3, %v266_v26 }
  0x53   : > { %v603_v56 = vsel %vm2586_vm4, %v598_v43, %v602_v18  ;;  %v626_v57 = vrot.slane %v624_v46, 5  ;;  %v639_v59 = vshrl.u32 %v268_v41, 16  ;;  %v642_v60 = vshll.u32 %v268_v41, 16 }
  0x54   : > { %2326 = vmatprep.mubr.msk.bf16.mxu0 %vm712_vm1, %v2777_v48  ;;  %v613_v0 = vsel %vm2586_vm4, %v608_v49, %v612_v37  ;;  %v630_v1 = vrot.slane %v628_v50, 4  ;;  %2364 = vmatprep.mubr.msk.bf16.mxu1 %vm712_vm1, %v2779_v51  ;;  %v648_v2 = vshll.u32 %v269_v47, 16  ;;  %v652_v3 = vshrl.u32 %v269_v47, 16 }
  0x55   : > { %v2077_v9 = vcombine.low %v603_v56, %v613_v0  ;;  %v641_v13 = vrot.slane %v639_v59, 4  ;;  %v644_v15 = vrot.slane %v642_v60, 5  ;;  %v2791_v18 = vcombine.low %v268_v41, %v269_v47 }
  0x56   : > { %v650_v19 = vrot.slane %v648_v2, 5  ;;  %v654_v21 = vrot.slane %v652_v3, 4  ;;  %v621_v22 = vor.u32 %v620_v44, %v617_v40  ;;  %v631_v24 = vor.u32 %v630_v1, %v626_v57 }
  0x57   : > { %2327 = vmatmul.mubr.msk.bf16.gmra.mxu0 %vm712_vm1, %v2077_v9  ;;  %2365 = vmatmul.mubr.msk.bf16.gmra.mxu1 %vm712_vm1, %v2791_v18  ;;  %v634_v25 = vshll.u32 %v267_v62, 16  ;;  %v645_v26 = vor.u32 %v644_v15, %v641_v13  ;;  %v658_v27 = vshll.u32 %v270_v8, 16 }
  0x58   : > { %v622_v28 = vrot.slane %v621_v22, 4  ;;  %v632_v29 = vrot.slane %v631_v24, 4  ;;  %v655_v30 = vor.u32 %v654_v21, %v650_v19  ;;  %2404 = vmatprep.mubr.msk.bf16.mxu1 %vm712_vm1, %v2609_v7 }
  0x59   : > { %v636_v32 = vrot.slane %v634_v25, 5  ;;  %v646_v34 = vrot.slane %v645_v26, 4  ;;  %v660_v6 = vrot.slane %v658_v27, 5 }
  0x5a   : > { %v627_v37 = vsel %vm2586_vm4, %v622_v28, %v626_v57  ;;  %v656_v40 = vrot.slane %v655_v30, 4 }
  0x5b   : > { %v637_v41 = vsel %vm2586_vm4, %v632_v29, %v636_v32  ;;  %v651_v42 = vsel %vm2586_vm4, %v646_v34, %v650_v19 }
  0x5c   : > { %v2078_v43 = vcombine.low %v627_v37, %v637_v41  ;;  %v661_v44 = vsel %vm2586_vm4, %v656_v40, %v660_v6 }
  0x5d   : > { %v2079_v46 = vcombine.low %v651_v42, %v661_v44 }
  0x5e   : > { %2330 = vmatprep.mubr.msk.bf16.mxu0 %vm712_vm1, %v2078_v43 }
  0x5f   : > { %2331 = vmatmul.mubr.msk.bf16.gmra.mxu0 %vm712_vm1, %v2079_v46  ;;  %2405 = vmatmul.mubr.msk.bf16.vlgmr.msra.gmra.mxu1 %vm712_vm1, %v2631_v39 }
  0x60   : > { %2370 = vmatprep.mubr.msk.bf16.mxu0 %vm712_vm1, %v2582_v31  ;;  %2408 = vmatprep.mubr.msk.bf16.mxu1 %vm712_vm1, %v2637_v45  ;;  %v271_v31 = vld [vmem:[%s2568_s27 + $0xc0] sm:$0xf] }
  0x61   : > { %v1425_v7 = vshrl.u32 %v271_v31, 16 }
  0x63   : > { %v1427_v45 = vrot.slane %v1425_v7, 4 }
  0x67   : > { %2371 = vmatmul.mubr.msk.bf16.vlgmr.msra.gmra.mxu0 %vm712_vm1, %v2602_v61  ;;  %2409 = vmatmul.mubr.msk.bf16.gmra.mxu1 %vm712_vm1, %v2657_v17  ;;  %v272_v61 = vld [vmem:[%s2568_s27 + $0xc4] sm:$0xf] }
  0x68   : > { %2374 = vmatprep.mubr.msk.bf16.mxu0 %vm712_vm1, %v2613_v10  ;;  %2412 = vmatprep.mubr.msk.bf16.mxu1 %vm712_vm1, %v2672_v33  ;;  %v1428_v10 = vshll.u32 %v271_v31, 16  ;;  %v1438_v39 = vshrl.u32 %v272_v61, 16  ;;  %v273_v33 = vld [vmem:[%s2568_s27 + $0xc8] sm:$0x1] }
  0x6f   : > { %2375 = vmatmul.mubr.msk.bf16.gmra.mxu0 %vm712_vm1, %v2629_v38  ;;  %2413 = vmatmul.mubr.msk.bf16.gmra.mxu1 %vm712_vm1, %v2691_v5  ;;  %v1434_v38 = vshll.u32 %v272_v61, 16  ;;  %v1444_v5 = vshll.u32 %v273_v33, 16 }
  0x70   : > { %2378 = vmatprep.mubr.msk.bf16.mxu0 %vm712_vm1, %v2644_v52  ;;  %2416 = vmatprep.mubr.msk.bf16.mxu1 %vm712_vm1, %v2697_v14  ;;  %v1430_v52 = vrot.slane %v1428_v10, 5 }
  0x71   : > { %v1436_v17 = vrot.slane %v1434_v38, 5 }
  0x77   : > { %2379 = vmatmul.mubr.msk.bf16.gmra.mxu0 %vm712_vm1, %v2659_v20  ;;  %2417 = vmatmul.mubr.msk.bf16.gmra.mxu1 %vm712_vm1, %v2717_v55  ;;  %v1440_v20 = vrot.slane %v1438_v39, 4  ;;  %v1446_v55 = vrot.slane %v1444_v5, 5 }
  0x78   : > { %2382 = vmatprep.mubr.msk.bf16.mxu0 %vm712_vm1, %v2674_v35  ;;  %2420 = vmatprep.mubr.msk.bf16.mxu1 %vm712_vm1, %v2732_v12  ;;  %v1431_v35 = vor.u32 %v1430_v52, %v1427_v45 }
  0x7a   : > { %v1432_v14 = vrot.slane %v1431_v35, 4 }
  0x7f   : > { %2383 = vmatmul.mubr.msk.bf16.gmra.mxu0 %vm712_vm1, %v2689_v4  ;;  %2421 = vmatmul.mubr.msk.bf16.gmra.mxu1 %vm712_vm1, %v2751_v54  ;;  %v1441_v4 = vor.u32 %v1440_v20, %v1436_v17 }
  0x80   : > { %2386 = vmatprep.mubr.msk.bf16.mxu0 %vm712_vm1, %v2704_v23  ;;  %2424 = vmatprep.mubr.msk.bf16.mxu1 %vm712_vm1, %v2757_v63 }
  0x81   : > { %v1442_v23 = vrot.slane %v1441_v4, 4 }
  0x83   : > { %v1447_v12 = vsel %vm2586_vm4, %v1442_v23, %v1446_v55 }
  0x87   : > { %2387 = vmatmul.mubr.msk.bf16.gmra.mxu0 %vm712_vm1, %v2719_v58  ;;  %2425 = vmatmul.mubr.msk.bf16.gmra.mxu1 %vm712_vm1, %v2777_v48  ;;  %v1437_v58 = vsel %vm2586_vm4, %v1432_v14, %v1436_v17 }
  0x88   : > { %2390 = vmatprep.mubr.msk.bf16.mxu0 %vm712_vm1, %v2734_v16  ;;  %2428 = vmatprep.mubr.msk.bf16.mxu1 %vm712_vm1, %v2077_v9  ;;  %v2147_v16 = vcombine.low %v1437_v58, %v1447_v12 }
  0x8f   : > { %2391 = vmatmul.mubr.msk.bf16.gmra.mxu0 %vm712_vm1, %v2749_v53  ;;  %2429 = vmatmul.mubr.msk.bf16.gmra.mxu1 %vm712_vm1, %v2078_v43  ;;  %v2129_v53 = vcombine.low %v271_v31, %v272_v61 }
  0x90   : > { %2394 = vmatprep.mubr.msk.bf16.mxu0 %vm712_vm1, %v2764_v11  ;;  %2432 = vmatprep.mubr.msk.bf16.mxu1 %vm712_vm1, %v2079_v46 }
  0x97   : > { %2395 = vmatmul.mubr.msk.bf16.gmra.mxu0 %vm712_vm1, %v2779_v51  ;;  %2433 = vmatmul.mubr.msk.bf16.gmra.mxu1 %vm712_vm1, %v2147_v16 }
  0x98   : > { %2398 = vmatprep.mubr.msk.bf16.mxu0 %vm712_vm1, %v2791_v18 }
  0x9f   : > { %2399 = vmatmul.mubr.msk.bf16.gmra.mxu0 %vm712_vm1, %v2129_v53 }
  0xd9   : > { %v2872_v54 = vpop.f32.mrf.mxu1 }
  0xdb   : > { %v2874_v63 = vpop.f32.mrf.mxu1 }
  0xdd   : > { %v2876_v11 = vpop.f32.mrf.mxu1 }
  0xdf   : > { %v2878_v36 = vpop.f32.mrf.mxu1 }
  0xe1   : > { %v2880_v47 = vpop.f32.mrf.mxu0  ;;  %v2882_v48 = vpop.f32.mrf.mxu1 }
  0xe3   : > { %v2884_v49 = vpop.f32.mrf.mxu0  ;;  %v2886_v50 = vpop.f32.mrf.mxu1 }
  0xe5   : > { %v2888_v51 = vpop.f32.mrf.mxu0  ;;  %v2890_v56 = vpop.f32.mrf.mxu1 }
  0xe7   : > { %v2892_v57 = vpop.f32.mrf.mxu0  ;;  %v2894_v59 = vpop.f32.mrf.mxu1 }
  0xe9   : > { %v2896_v60 = vpop.f32.mrf.mxu0 }
  0xea   : > { %v2898_v62 = vpop.f32.mrf.mxu1 }
  0xeb   : > { %v2900_v0 = vpop.f32.mrf.mxu0 }
  0xec   : > { %v2902_v1 = vpop.f32.mrf.mxu1 }
  0xed   : > { %v2904_v2 = vpop.f32.mrf.mxu0 }
  0xee   : > { %v2906_v3 = vpop.f32.mrf.mxu1 }
  0xef   : > { %v2908_v8 = vpop.f32.mrf.mxu0 }
  0xf0   : > { %v2910_v9 = vpop.f32.mrf.mxu1 }
  0xf3   : > { %v2912_v13 = vpop.f32.mrf.mxu0  ;;  %v2914_v15 = vpop.f32.mrf.mxu1 }
  0xf5   : > { %v2916_v18 = vpop.f32.mrf.mxu0  ;;  %v2918_v19 = vpop.f32.mrf.mxu1 }
  0xf7   : > { %v2920_v21 = vpop.f32.mrf.mxu0  ;;  %v2922_v22 = vpop.f32.mrf.mxu1 }
  0xf9   : > { %v2924_v24 = vpop.f32.mrf.mxu0  ;;  %v2926_v25 = vpop.f32.mrf.mxu1 }
  0xfb   : > { %v2928_v26 = vpop.f32.mrf.mxu0 }
  0xfc   : > { %v2930_v27 = vpop.f32.mrf.mxu1 }
  0xfd   : > { %v2932_v28 = vpop.f32.mrf.mxu0 }
  0xfe   : > { %v2934_v29 = vpop.f32.mrf.mxu1 }
  0xff   : > { %v2936_v30 = vpop.f32.mrf.mxu0 }
 0x100   : > { %v2938_v32 = vpop.f32.mrf.mxu1 }
 0x101   : > { %v2940_v34 = vpop.f32.mrf.mxu0 }
 0x102   : > { %v2942_v6 = vpop.f32.mrf.mxu1 }
 0x105   : > { %v2944_v37 = vpop.f32.mrf.mxu0  ;;  %v2946_v40 = vpop.f32.mrf.mxu1 }
 0x107   : > { %v2948_v41 = vpop.f32.mrf.mxu0  ;;  %v2950_v42 = vpop.f32.mrf.mxu1 }
 0x109   : > { %v2952_v43 = vpop.f32.mrf.mxu0  ;;  %v2954_v44 = vpop.f32.mrf.mxu1 }
 0x10a   : > { %3204 = vst [vmem:[#allocation2_spill] sm:$0xff] %v2954_v44 }
 0x10b   : > { %v2956_v46 = vpop.f32.mrf.mxu0  ;;  %v2958_v31 = vpop.f32.mrf.mxu1 }
 0x10c   : > { %3205 = vst [vmem:[#allocation3_spill] sm:$0xff] %v2958_v31 }
 0x10d   : > { %v2960_v61 = vpop.f32.mrf.mxu0 }
 0x10e   : > { %v2962_v7 = vpop.f32.mrf.mxu1 }
 0x10f   : > { %3206 = vst [vmem:[#allocation4_spill] sm:$0xff] %v2962_v7  ;;  %v2964_v10 = vpop.f32.mrf.mxu0 }
 0x110   : > { %v2966_v38 = vpop.f32.mrf.mxu1 }
 0x111   : > { %3207 = vst [vmem:[#allocation5_spill] sm:$0xff] %v2966_v38  ;;  %v2968_v39 = vpop.f32.mrf.mxu0 }
 0x112   : > { %3208 = vst [vmem:[#allocation6_spill] sm:$0xff] %v2968_v39  ;;  %v2970_v45 = vpop.f32.mrf.mxu1 }
 0x113   : > { %3209 = vst [vmem:[#allocation7_spill] sm:$0xff] %v2970_v45  ;;  %v2972_v52 = vpop.f32.mrf.mxu0 }
 0x114   : > { %3210 = vst [vmem:[#allocation8_spill] sm:$0xff] %v2972_v52  ;;  %v2974_v17 = vpop.f32.mrf.mxu1 }
 0x115   : > { %3211 = vst [vmem:[#allocation9_spill] sm:$0xff] %v2974_v17 }
 0x117   : > { %v2976_v20 = vpop.f32.mrf.mxu0  ;;  %v2978_v33 = vpop.f32.mrf.mxu1 }
 0x118   : > { %3212 = vst [vmem:[#allocation10_spill] sm:$0xff] %v2976_v20  ;;  %3213 = vst [vmem:[#allocation11_spill] sm:$0xff] %v2978_v33 }
 0x119   : > { %v2980_v35 = vpop.f32.mrf.mxu0  ;;  %v2982_v4 = vpop.f32.mrf.mxu1 }
 0x11a   : > { %3214 = vst [vmem:[#allocation12_spill] sm:$0xff] %v2980_v35  ;;  %3215 = vst [vmem:[#allocation13_spill] sm:$0xff] %v2982_v4 }
 0x11b   : > { %v2984_v5 = vpop.f32.mrf.mxu0  ;;  %v2986_v14 = vpop.f32.mrf.mxu1 }
 0x11c   : > { %3216 = vst [vmem:[#allocation14_spill] sm:$0xff] %v2984_v5  ;;  %3217 = vst [vmem:[#allocation15_spill] sm:$0xff] %v2986_v14  ;;  %v1100_v5 = vadd.f32 %v2872_v54, %v2880_v47 }
 0x11d   : > { %v2988_v23 = vpop.f32.mrf.mxu0  ;;  %v2990_v55 = vpop.f32.mrf.mxu1 }
 0x11e   : > { %3218 = vst [vmem:[#allocation16_spill] sm:$0xff] %v2988_v23  ;;  %3219 = vst [vmem:[#allocation17_spill] sm:$0xff] %v2990_v55  ;;  %v1092_v55 = vadd.f32 %v2874_v63, %v2884_v49  ;;  %v1095_v63 = vadd.f32 %v2878_v36, %v2892_v57 }
 0x11f   : > { %v2992_v58 = vpop.f32.mrf.mxu0  ;;  %v2406_v12 = vpop.f32.mrf.mxu1 }
 0x120   : > { %3220 = vst [vmem:[#allocation18_spill] sm:$0xff] %v2992_v58 }
 0x121   : > { %v2994_v16 = vpop.f32.mrf.mxu0  ;;  %v1493_v53 = vpop.f32.mrf.mxu1 }
 0x122   : > { %3221 = vst [vmem:[#allocation19_spill] sm:$0xff] %v2994_v16  ;;  %v3007_v16 = vld [vmem:[%s3200_s2] ss:$0 sm:$0xff] }
 0x123   : > { %v2996_v17 = vpop.f32.mrf.mxu0  ;;  %v2407_v33 = vpop.f32.mrf.mxu1 }
 0x124   : > { %3222 = vst [vmem:[#allocation20_spill] sm:$0xff] %v2996_v17 }
 0x125   : > { %v2998_v45 = vpop.f32.mrf.mxu0  ;;  %v1496_v4 = vpop.f32.mrf.mxu1 }
 0x126   : > { %3223 = vst [vmem:[#allocation21_spill] sm:$0xff] %v2998_v45  ;;  %v1103_v45 = vadd.f32 %v2876_v11, %v2888_v51  ;;  %v1116_v11 = vadd.f32 %v2882_v48, %v2896_v60  ;;  %v1108_v51 = vadd.f32 %v2886_v50, %v2900_v0  ;;  %v1119_v48 = vadd.f32 %v2890_v56, %v2904_v2 }
 0x127   : > { %v2372_v14 = vpop.f32.mrf.mxu0  ;;  %v2410_v23 = vpop.f32.mrf.mxu1  ;;  %v1111_v56 = vadd.f32 %v2894_v59, %v2908_v8  ;;  %v1124_v8 = vadd.f32 %v2902_v1, %v2916_v18 }
 0x128   : > { %v1394_v58 = vadd.f32 %v2372_v14, %v1100_v5 }
 0x129   : > { %v1265_v17 = vpop.f32.mrf.mxu0  ;;  %v1509_v38 = vpop.f32.mrf.mxu1 }
 0x12a   : > { %v1622_v35 = vadd.f32 %v2406_v12, %v1394_v58  ;;  %v1392_v7 = vadd.f32 %v1265_v17, %v1092_v55 }
 0x12b   : > { %v2373_v54 = vpop.f32.mrf.mxu0  ;;  %v2411_v47 = vpop.f32.mrf.mxu1 }
 0x12c   : > { %v1661_v20 = vadd.f32 %v3007_v16, %v1622_v35  ;;  %v1620_v31 = vadd.f32 %v1493_v53, %v1392_v7  ;;  %v1395_v52 = vadd.f32 %v2373_v54, %v1103_v45 }
 0x12d   : > { %v1268_v49 = vpop.f32.mrf.mxu0  ;;  %v1512_v5 = vpop.f32.mrf.mxu1 }
 0x12e   : > { %vm1693_vm5 = vcmp.ge.f32.partialorder %v1661_v20, 0.0  ;;  %v1725_v14 = vmul.f32 0.2, %v1661_v20  ;;  %v1659_v44 = vadd.f32 %v3007_v16, %v1620_v31  ;;  %v1623_v39 = vadd.f32 %v2407_v33, %v1395_v52 }
 0x12f   : > { %v1393_v7 = vadd.f32 %v1268_v49, %v1095_v63  ;;  %v2376_v45 = vpop.f32.mrf.mxu0  ;;  %v2414_v17 = vpop.f32.mrf.mxu1 }
 0x130   : > { %v1757_v36 = vsel %vm1693_vm5, %v1661_v20, %v1725_v14  ;;  %vm1691_vm7 = vcmp.ge.f32.partialorder %v1659_v44, 0.0  ;;  %v1723_v57 = vmul.f32 0.2, %v1659_v44  ;;  %v1662_v31 = vadd.f32 %v3007_v16, %v1623_v39 }
 0x131   : > { %v2202_v60 = vpack.c.bf16 %v1757_v36, %v1757_v36  ;;  %v1621_v50 = vadd.f32 %v1496_v4, %v1393_v7  ;;  %v1398_v0 = vadd.f32 %v2376_v45, %v1116_v11  ;;  %v1281_v52 = vpop.f32.mrf.mxu0  ;;  %v3028_v33 = vpop.f32.mrf.mxu1 }
 0x132   : > { %v1755_v35 = vsel %vm1691_vm7, %v1659_v44, %v1723_v57  ;;  %vm1694_vm8 = vcmp.ge.f32.partialorder %v1662_v31, 0.0  ;;  %v1726_v55 = vmul.f32 0.2, %v1662_v31  ;;  %v1396_v58 = vadd.f32 %v1281_v52, %v1108_v51 }
 0x133   : > { %1918 = vst.msk [vmem:[%s3023_s6 + $0x8] sm:$0xf] %vm1915_vm6, %v2202_v60  ;;  %v2200_v20 = vpack.c.bf16 %v1755_v35, %v1755_v35  ;;  %v1660_v12 = vadd.f32 %v3007_v16, %v1621_v50  ;;  %v1626_v39 = vadd.f32 %v2410_v23, %v1398_v0  ;;  %v2377_v53 = vpop.f32.mrf.mxu0  ;;  %v2415_v54 = vpop.f32.mrf.mxu1  ;;  %v1132_v23 = vadd.f32 %v2898_v62, %v2912_v13 }
 0x134   : > { %v1758_v2 = vsel %vm1694_vm8, %v1662_v31, %v1726_v55  ;;  %v1624_v4 = vadd.f32 %v1509_v38, %v1396_v58  ;;  %v1399_v63 = vadd.f32 %v2377_v53, %v1119_v48  ;;  %v1135_v13 = vadd.f32 %v2906_v3, %v2920_v21 }
 0x135   : > { %1916 = vst.msk [vmem:[%s3023_s6] sm:$0xf] %vm1915_vm6, %v2200_v20  ;;  %v2203_v44 = vpack.c.bf16 %v1758_v2, %v1758_v2  ;;  %vm1692_vm9 = vcmp.ge.f32.partialorder %v1660_v12, 0.0  ;;  %v1724_v49 = vmul.f32 0.2, %v1660_v12  ;;  %v1665_v14 = vadd.f32 %v3007_v16, %v1626_v39  ;;  %v1284_v11 = vpop.f32.mrf.mxu0  ;;  %v1528_v51 = vpop.f32.mrf.mxu1 }
 0x136   : > { %v1663_v7 = vadd.f32 %v3007_v16, %v1624_v4  ;;  %v1627_v45 = vadd.f32 %v2411_v47, %v1399_v63  ;;  %v1397_v59 = vadd.f32 %v1284_v11, %v1111_v56 }
 0x137   : > { %1919 = vst.msk [vmem:[%s3023_s6 + $0xc] sm:$0xf] %vm1915_vm6, %v2203_v44  ;;  %v1756_v38 = vsel %vm1692_vm9, %v1660_v12, %v1724_v49  ;;  %vm1697_vm10 = vcmp.ge.f32.partialorder %v1665_v14, 0.0  ;;  %v1729_v36 = vmul.f32 0.2, %v1665_v14  ;;  %v2380_v57 = vpop.f32.mrf.mxu0  ;;  %v2418_v31 = vpop.f32.mrf.mxu1 }
 0x138   : > { %v2201_v48 = vpack.c.bf16 %v1756_v38, %v1756_v38  ;;  %vm1695_vm11 = vcmp.ge.f32.partialorder %v1663_v7, 0.0  ;;  %v1727_v60 = vmul.f32 0.2, %v1663_v7  ;;  %v1666_v62 = vadd.f32 %v3007_v16, %v1627_v45 }
 0x139   : > { %v1761_v47 = vsel %vm1697_vm10, %v1665_v14, %v1729_v36  ;;  %v1625_v50 = vadd.f32 %v1512_v5, %v1397_v59  ;;  %v1402_v1 = vadd.f32 %v2380_v57, %v1132_v23  ;;  %v1297_v18 = vpop.f32.mrf.mxu0  ;;  %v3048_v0 = vpop.f32.mrf.mxu1  ;;  %v1127_v5 = vadd.f32 %v2910_v9, %v2924_v24 }
 0x13a   : > { %1917 = vst.msk [vmem:[%s3023_s6 + $0x4] sm:$0xf] %vm1915_vm6, %v2201_v48  ;;  %v2206_v52 = vpack.c.bf16 %v1761_v47, %v1761_v47  ;;  %v1759_v35 = vsel %vm1695_vm11, %v1663_v7, %v1727_v60  ;;  %vm1698_vm12 = vcmp.ge.f32.partialorder %v1666_v62, 0.0  ;;  %v1730_v55 = vmul.f32 0.2, %v1666_v62 }
 0x13b   : > { %v2204_v58 = vpack.c.bf16 %v1759_v35, %v1759_v35  ;;  %v1664_v20 = vadd.f32 %v3007_v16, %v1625_v50  ;;  %v1630_v12 = vadd.f32 %v2414_v17, %v1402_v1  ;;  %v1400_v39 = vadd.f32 %v1297_v18, %v1124_v8  ;;  %v2381_v3 = vpop.f32.mrf.mxu0  ;;  %v2419_v21 = vpop.f32.mrf.mxu1 }
 0x13c   : > { %1922 = vst.msk [vmem:[%s3023_s6 + $0x18] sm:$0xf] %vm1915_vm6, %v2206_v52  ;;  %v1762_v53 = vsel %vm1698_vm12, %v1666_v62, %v1730_v55  ;;  %v1403_v56 = vadd.f32 %v2381_v3, %v1135_v13  ;;  %v1148_v9 = vadd.f32 %v2914_v15, %v2928_v26  ;;  %v1151_v15 = vadd.f32 %v2922_v22, %v2936_v30 }
 0x13d   : > { %1920 = vst.msk [vmem:[%s3023_s6 + $0x10] sm:$0xf] %vm1915_vm6, %v2204_v58  ;;  %v2207_v2 = vpack.c.bf16 %v1762_v53, %v1762_v53  ;;  %vm1696_vm13 = vcmp.ge.f32.partialorder %v1664_v20, 0.0  ;;  %v1728_v4 = vmul.f32 0.2, %v1664_v20  ;;  %v1669_v63 = vadd.f32 %v3007_v16, %v1630_v12  ;;  %v1300_v44 = vpop.f32.mrf.mxu0  ;;  %v1544_v17 = vpop.f32.mrf.mxu1 }
 0x13e   : > { %v1628_v49 = vadd.f32 %v3028_v33, %v1400_v39  ;;  %v1631_v14 = vadd.f32 %v2415_v54, %v1403_v56  ;;  %v1401_v11 = vadd.f32 %v1300_v44, %v1127_v5  ;;  %v1140_v54 = vadd.f32 %v2918_v19, %v2932_v28 }
 0x13f   : > { %1923 = vst.msk [vmem:[%s3023_s6 + $0x1c] sm:$0xf] %vm1915_vm6, %v2207_v2  ;;  %v1760_v24 = vsel %vm1696_vm13, %v1664_v20, %v1728_v4  ;;  %vm1701_vm14 = vcmp.ge.f32.partialorder %v1669_v63, 0.0  ;;  %v1733_v23 = vmul.f32 0.2, %v1669_v63  ;;  %v2384_v7 = vpop.f32.mrf.mxu0  ;;  %v3065_v45 = vpop.f32.mrf.mxu1  ;;  %v1143_v22 = vadd.f32 %v2926_v25, %v2940_v34 }
 0x140   : > { %v2205_v59 = vpack.c.bf16 %v1760_v24, %v1760_v24  ;;  %v1667_v8 = vadd.f32 %v3007_v16, %v1628_v49  ;;  %v1670_v38 = vadd.f32 %v3007_v16, %v1631_v14  ;;  %v1629_v33 = vadd.f32 %v1528_v51, %v1401_v11 }
 0x141   : > { %v1765_v26 = vsel %vm1701_vm14, %v1669_v63, %v1733_v23  ;;  %v1406_v36 = vadd.f32 %v2384_v7, %v1148_v9  ;;  %v1313_v57 = vpop.f32.mrf.mxu0  ;;  %v1557_v48 = vpop.f32.mrf.mxu1  ;;  %v1164_v30 = vadd.f32 %v2930_v27, %v2944_v37  ;;  %v1156_v27 = vadd.f32 %v2934_v29, %v2948_v41 }
 0x142   : > { %1921 = vst.msk [vmem:[%s3023_s6 + $0x14] sm:$0xf] %vm1915_vm6, %v2205_v59  ;;  %v2210_v60 = vpack.c.bf16 %v1765_v26, %v1765_v26  ;;  %vm1699_vm15 = vcmp.ge.f32.partialorder %v1667_v8, 0.0  ;;  %v1731_v62 = vmul.f32 0.2, %v1667_v8  ;;  %vm1702_vm0 = vcmp.ge.f32.partialorder %v1670_v38, 0.0 }
 0x143   : > { %v1734_v13 = vmul.f32 0.2, %v1670_v38  ;;  %v1668_v51 = vadd.f32 %v3007_v16, %v1629_v33  ;;  %v1634_v47 = vadd.f32 %v2418_v31, %v1406_v36  ;;  %v1404_v50 = vadd.f32 %v1313_v57, %v1140_v54  ;;  %v2385_v19 = vpop.f32.mrf.mxu0  ;;  %v2423_v28 = vpop.f32.mrf.mxu1 }
 0x144   : > { %1926 = vst.msk [vmem:[%s3023_s6 + $0x28] sm:$0xf] %vm1915_vm6, %v2210_v60  ;;  %v1763_v1 = vsel %vm1699_vm15, %v1667_v8, %v1731_v62  ;;  %v1407_v18 = vadd.f32 %v2385_v19, %v1151_v15  ;;  %v1167_v37 = vadd.f32 %v2938_v32, %v2952_v43  ;;  %v1159_v29 = vadd.f32 %v2942_v6, %v2956_v46 }
 0x145   : > { %v2208_v52 = vpack.c.bf16 %v1763_v1, %v1763_v1  ;;  %v1766_v35 = vsel %vm1702_vm0, %v1670_v38, %v1734_v13  ;;  %vm1700_vm1 = vcmp.ge.f32.partialorder %v1668_v51, 0.0  ;;  %v1732_v55 = vmul.f32 0.2, %v1668_v51  ;;  %v1316_v31 = vpop.f32.mrf.mxu0  ;;  %v3082_v58 = vpop.f32.mrf.mxu1 }
 0x146   : > { %v2211_v20 = vpack.c.bf16 %v1766_v35, %v1766_v35  ;;  %v1673_v12 = vadd.f32 %v3007_v16, %v1634_v47  ;;  %v1632_v25 = vadd.f32 %v3048_v0, %v1404_v50  ;;  %v1635_v34 = vadd.f32 %v2419_v21, %v1407_v18  ;;  %v3226_v18 = vld [vmem:[#allocation8_spill] sm:$0xff] }
 0x147   : > { %1924 = vst.msk [vmem:[%s3023_s6 + $0x20] sm:$0xf] %vm1915_vm6, %v2208_v52  ;;  %v1764_v39 = vsel %vm1700_vm1, %v1668_v51, %v1732_v55  ;;  %v1405_v3 = vadd.f32 %v1316_v31, %v1143_v22  ;;  %v2388_v5 = vpop.f32.mrf.mxu0  ;;  %v3092_v53 = vpop.f32.mrf.mxu1  ;;  %v3224_v22 = vld [vmem:[#allocation6_spill] sm:$0xff]  ;;  %v3227_v52 = vld [vmem:[#allocation3_spill] sm:$0xff] }
 0x148   : > { %1927 = vst.msk [vmem:[%s3023_s6 + $0x2c] sm:$0xf] %vm1915_vm6, %v2211_v20  ;;  %v2209_v56 = vpack.c.bf16 %v1764_v39, %v1764_v39  ;;  %vm1705_vm2 = vcmp.ge.f32.partialorder %v1673_v12, 0.0  ;;  %v1737_v0 = vmul.f32 0.2, %v1673_v12  ;;  %v1671_v21 = vadd.f32 %v3007_v16, %v1632_v25 }
 0x149   : > { %v1674_v32 = vadd.f32 %v3007_v16, %v1635_v34  ;;  %v1633_v41 = vadd.f32 %v1544_v17, %v1405_v3  ;;  %v1410_v43 = vadd.f32 %v2388_v5, %v1164_v30  ;;  %v1329_v2 = vpop.f32.mrf.mxu0  ;;  %v1573_v4 = vpop.f32.mrf.mxu1  ;;  %v3225_v30 = vld [vmem:[#allocation2_spill] sm:$0xff]  ;;  %v1175_v35 = vadd.f32 %v3227_v52, %v3226_v18 }
 0x14a   : > { %1925 = vst.msk [vmem:[%s3023_s6 + $0x24] sm:$0xf] %vm1915_vm6, %v2209_v56  ;;  %v1769_v63 = vsel %vm1705_vm2, %v1673_v12, %v1737_v0  ;;  %vm1703_vm3 = vcmp.ge.f32.partialorder %v1671_v21, 0.0  ;;  %v1735_v44 = vmul.f32 0.2, %v1671_v21  ;;  %v1408_v49 = vadd.f32 %v1329_v2, %v1156_v27  ;;  %v3228_v5 = vld [vmem:[#allocation10_spill] sm:$0xff] }
 0x14b   : > { %v2214_v14 = vpack.c.bf16 %v1769_v63, %v1769_v63  ;;  %vm1706_vm4 = vcmp.ge.f32.partialorder %v1674_v32, 0.0  ;;  %v1738_v11 = vmul.f32 0.2, %v1674_v32  ;;  %v1672_v9 = vadd.f32 %v3007_v16, %v1633_v41  ;;  %v2389_v24 = vpop.f32.mrf.mxu0  ;;  %v2427_v6 = vpop.f32.mrf.mxu1  ;;  %v3229_v56 = vld [vmem:[#allocation4_spill] sm:$0xff] }
 0x14c   : > { %v1767_v46 = vsel %vm1703_vm3, %v1671_v21, %v1735_v44  ;;  %v1638_v17 = vadd.f32 %v3065_v45, %v1410_v43  ;;  %v1636_v23 = vadd.f32 %v1557_v48, %v1408_v49  ;;  %v1411_v7 = vadd.f32 %v2389_v24, %v1167_v37  ;;  %v3230_v21 = vld [vmem:[#allocation12_spill] sm:$0xff]  ;;  %v3233_v49 = vld [vmem:[#allocation7_spill] sm:$0xff] }
 0x14d   : > { %1930 = vst.msk [vmem:[%s3023_s6 + $0x38] sm:$0xf] %vm1915_vm6, %v2214_v14  ;;  %v2212_v59 = vpack.c.bf16 %v1767_v46, %v1767_v46  ;;  %v1770_v8 = vsel %vm1706_vm4, %v1674_v32, %v1738_v11  ;;  %vm1704_vm5 = vcmp.ge.f32.partialorder %v1672_v9, 0.0  ;;  %v1736_v38 = vmul.f32 0.2, %v1672_v9  ;;  %v1332_v33 = vpop.f32.mrf.mxu0  ;;  %v3106_v54 = vpop.f32.mrf.mxu1 }
 0x14e   : > { %v2215_v15 = vpack.c.bf16 %v1770_v8, %v1770_v8  ;;  %v1677_v26 = vadd.f32 %v3007_v16, %v1638_v17  ;;  %v1675_v36 = vadd.f32 %v3007_v16, %v1636_v23  ;;  %v1639_v57 = vadd.f32 %v2423_v28, %v1411_v7 }
 0x14f   : > { %v1180_v45 = vadd.f32 %v2946_v40, %v2960_v61  ;;  %v1172_v48 = vadd.f32 %v2950_v42, %v2964_v10  ;;  %1928 = vst.msk [vmem:[%s3023_s6 + $0x30] sm:$0xf] %vm1915_vm6, %v2212_v59  ;;  %v1768_v60 = vsel %vm1704_vm5, %v1672_v9, %v1736_v38  ;;  %v1409_v62 = vadd.f32 %v1332_v33, %v1159_v29  ;;  %v2392_v13 = vpop.f32.mrf.mxu0  ;;  %v2430_v51 = vpop.f32.mrf.mxu1  ;;  %v3231_v29 = vld [vmem:[#allocation5_spill] sm:$0xff] }
 0x150   : > { %1931 = vst.msk [vmem:[%s3023_s6 + $0x3c] sm:$0xf] %vm1915_vm6, %v2215_v15  ;;  %v2213_v47 = vpack.c.bf16 %v1768_v60, %v1768_v60  ;;  %vm1709_vm7 = vcmp.ge.f32.partialorder %v1677_v26, 0.0  ;;  %v1741_v50 = vmul.f32 0.2, %v1677_v26  ;;  %vm1707_vm8 = vcmp.ge.f32.partialorder %v1675_v36, 0.0 }
 0x151   : > { %v1739_v19 = vmul.f32 0.2, %v1675_v36  ;;  %v1678_v28 = vadd.f32 %v3007_v16, %v1639_v57  ;;  %v1637_v40 = vadd.f32 %v3082_v58, %v1409_v62  ;;  %v1414_v61 = vadd.f32 %v2392_v13, %v1180_v45  ;;  %v1345_v42 = vpop.f32.mrf.mxu0  ;;  %v1589_v10 = vpop.f32.mrf.mxu1 }
 0x152   : > { %v1183_v1 = vadd.f32 %v3225_v30, %v3224_v22  ;;  %1929 = vst.msk [vmem:[%s3023_s6 + $0x34] sm:$0xf] %vm1915_vm6, %v2213_v47  ;;  %v1773_v55 = vsel %vm1709_vm7, %v1677_v26, %v1741_v50  ;;  %v1412_v31 = vadd.f32 %v1345_v42, %v1172_v48  ;;  %v1196_v0 = vadd.f32 %v3229_v56, %v3228_v5  ;;  %v3237_v42 = vld [vmem:[#allocation11_spill] sm:$0xff] }
 0x153   : > { %v2218_v20 = vpack.c.bf16 %v1773_v55, %v1773_v55  ;;  %v1771_v12 = vsel %vm1707_vm8, %v1675_v36, %v1739_v19  ;;  %vm1710_vm9 = vcmp.ge.f32.partialorder %v1678_v28, 0.0  ;;  %v1742_v25 = vmul.f32 0.2, %v1678_v28  ;;  %v2393_v58 = vpop.f32.mrf.mxu0  ;;  %v2431_v34 = vpop.f32.mrf.mxu1 }
 0x154   : > { %v2216_v27 = vpack.c.bf16 %v1771_v12, %v1771_v12  ;;  %v1676_v37 = vadd.f32 %v3007_v16, %v1637_v40  ;;  %v1642_v39 = vadd.f32 %v3092_v53, %v1414_v61  ;;  %v1640_v3 = vadd.f32 %v1573_v4, %v1412_v31  ;;  %v3232_v4 = vld [vmem:[#allocation14_spill] sm:$0xff]  ;;  %v3234_v40 = vld [vmem:[#allocation16_spill] sm:$0xff] }
 0x155   : > { %v1188_v32 = vadd.f32 %v3231_v29, %v3230_v21  ;;  %1934 = vst.msk [vmem:[%s3023_s6 + $0x48] sm:$0xf] %vm1915_vm6, %v2218_v20  ;;  %v1774_v41 = vsel %vm1710_vm9, %v1678_v28, %v1742_v25  ;;  %v1415_v43 = vadd.f32 %v2393_v58, %v1183_v1  ;;  %v1348_v2 = vpop.f32.mrf.mxu0  ;;  %v1199_v14 = vadd.f32 %v3233_v49, %v3232_v4  ;;  %v1592_v17 = vpop.f32.mrf.mxu1  ;;  %v3238_v58 = vld [vmem:[#allocation19_spill] sm:$0xff] }
 0x156   : > { %1932 = vst.msk [vmem:[%s3023_s6 + $0x40] sm:$0xf] %vm1915_vm6, %v2216_v27  ;;  %v2219_v63 = vpack.c.bf16 %v1774_v41, %v1774_v41  ;;  %vm1708_vm10 = vcmp.ge.f32.partialorder %v1676_v37, 0.0  ;;  %v1740_v44 = vmul.f32 0.2, %v1676_v37  ;;  %v1681_v53 = vadd.f32 %v3007_v16, %v1642_v39  ;;  %v3239_v27 = vld [vmem:[#allocation13_spill] sm:$0xff] }
 0x157   : > { %v1679_v11 = vadd.f32 %v3007_v16, %v1640_v3  ;;  %v1643_v9 = vadd.f32 %v2427_v6, %v1415_v43  ;;  %v1413_v24 = vadd.f32 %v1348_v2, %v1175_v35  ;;  %v2396_v46 = vpop.f32.mrf.mxu0  ;;  %v2434_v13 = vpop.f32.mrf.mxu1  ;;  %v3240_v43 = vld [vmem:[#allocation20_spill] sm:$0xff]  ;;  %v3241_v2 = vld [vmem:[#allocation15_spill] sm:$0xff] }
 0x158   : > { %1935 = vst.msk [vmem:[%s3023_s6 + $0x4c] sm:$0xf] %vm1915_vm6, %v2219_v63  ;;  %v1772_v23 = vsel %vm1708_vm10, %v1676_v37, %v1740_v44  ;;  %vm1713_vm11 = vcmp.ge.f32.partialorder %v1681_v53, 0.0  ;;  %v1745_v7 = vmul.f32 0.2, %v1681_v53  ;;  %v1418_v59 = vadd.f32 %v2396_v46, %v1196_v0  ;;  %v3242_v44 = vld [vmem:[#allocation21_spill] sm:$0xff] }
 0x159   : > { %v2217_v8 = vpack.c.bf16 %v1772_v23, %v1772_v23  ;;  %vm1711_vm12 = vcmp.ge.f32.partialorder %v1679_v11, 0.0  ;;  %v1743_v38 = vmul.f32 0.2, %v1679_v11  ;;  %v1682_v33 = vadd.f32 %v3007_v16, %v1643_v9  ;;  %v1361_v15 = vpop.f32.mrf.mxu0  ;;  %v1605_v12 = vpop.f32.mrf.mxu1 }
 0x15a   : > { %v1777_v26 = vsel %vm1713_vm11, %v1681_v53, %v1745_v7  ;;  %v1641_v36 = vadd.f32 %v3106_v54, %v1413_v24  ;;  %v1646_v6 = vadd.f32 %v2430_v51, %v1418_v59  ;;  %v1416_v57 = vadd.f32 %v1361_v15, %v1188_v32  ;;  %v3235_v54 = vld [vmem:[#allocation9_spill] sm:$0xff]  ;;  %v3236_v51 = vld [vmem:[#allocation18_spill] sm:$0xff] }
 0x15b   : > { %1933 = vst.msk [vmem:[%s3023_s6 + $0x44] sm:$0xf] %vm1915_vm6, %v2217_v8  ;;  %v2222_v45 = vpack.c.bf16 %v1777_v26, %v1777_v26  ;;  %v1775_v48 = vsel %vm1711_vm12, %v1679_v11, %v1743_v38  ;;  %vm1714_vm13 = vcmp.ge.f32.partialorder %v1682_v33, 0.0  ;;  %v1746_v60 = vmul.f32 0.2, %v1682_v33  ;;  %v2397_v62 = vpop.f32.mrf.mxu0  ;;  %v3243_v53 = vld [vmem:[#allocation17_spill] sm:$0xff] }
 0x15c   : > { %v2220_v47 = vpack.c.bf16 %v1775_v48, %v1775_v48  ;;  %v1680_v50 = vadd.f32 %v3007_v16, %v1641_v36  ;;  %v1685_v19 = vadd.f32 %v3007_v16, %v1646_v6  ;;  %v1644_v28 = vadd.f32 %v1589_v10, %v1416_v57 }
 0x15d   : > { %v1191_v61 = vadd.f32 %v3235_v54, %v3234_v40  ;;  %v1212_v22 = vadd.f32 %v3237_v42, %v3236_v51  ;;  %1938 = vst.msk [vmem:[%s3023_s6 + $0x58] sm:$0xf] %vm1915_vm6, %v2222_v45  ;;  %v1778_v30 = vsel %vm1714_vm13, %v1682_v33, %v1746_v60  ;;  %v1419_v1 = vadd.f32 %v2397_v62, %v1199_v14  ;;  %v1364_v18 = vpop.f32.mrf.mxu0  ;;  %v2435_v14 = vpop.f32.mrf.mxu1 }
 0x15e   : > { %1936 = vst.msk [vmem:[%s3023_s6 + $0x50] sm:$0xf] %vm1915_vm6, %v2220_v47  ;;  %v2223_v52 = vpack.c.bf16 %v1778_v30, %v1778_v30  ;;  %vm1712_vm14 = vcmp.ge.f32.partialorder %v1680_v50, 0.0  ;;  %v1744_v35 = vmul.f32 0.2, %v1680_v50  ;;  %vm1717_vm15 = vcmp.ge.f32.partialorder %v1685_v19, 0.0 }
 0x15f   : > { %v1749_v55 = vmul.f32 0.2, %v1685_v19  ;;  %v1683_v10 = vadd.f32 %v3007_v16, %v1644_v28  ;;  %v1647_v31 = vadd.f32 %v2431_v34, %v1419_v1  ;;  %v1417_v20 = vadd.f32 %v1364_v18, %v1191_v61  ;;  %v2400_v25 = vpop.f32.mrf.mxu0  ;;  %v1608_v57 = vpop.f32.mrf.mxu1 }
 0x160   : > { %v1204_v37 = vadd.f32 %v3239_v27, %v3238_v58  ;;  %1939 = vst.msk [vmem:[%s3023_s6 + $0x5c] sm:$0xf] %vm1915_vm6, %v2223_v52  ;;  %v1776_v39 = vsel %vm1712_vm14, %v1680_v50, %v1744_v35  ;;  %v1422_v3 = vadd.f32 %v2400_v25, %v1212_v22  ;;  %v1215_v63 = vadd.f32 %v3241_v2, %v3240_v43 }
 0x161   : > { %v2221_v5 = vpack.c.bf16 %v1776_v39, %v1776_v39  ;;  %v1781_v56 = vsel %vm1717_vm15, %v1685_v19, %v1749_v55  ;;  %vm1715_vm0 = vcmp.ge.f32.partialorder %v1683_v10, 0.0  ;;  %v1747_v0 = vmul.f32 0.2, %v1683_v10  ;;  %v1377_v21 = vpop.f32.mrf.mxu0 }
 0x162   : > { %v2226_v29 = vpack.c.bf16 %v1781_v56, %v1781_v56  ;;  %v1686_v34 = vadd.f32 %v3007_v16, %v1647_v31  ;;  %v1645_v32 = vadd.f32 %v1592_v17, %v1417_v20  ;;  %v1650_v41 = vadd.f32 %v2434_v13, %v1422_v3 }
 0x163   : > { %v1207_v4 = vadd.f32 %v3243_v53, %v3242_v44  ;;  %1937 = vst.msk [vmem:[%s3023_s6 + $0x54] sm:$0xf] %vm1915_vm6, %v2221_v5  ;;  %v1779_v49 = vsel %vm1715_vm0, %v1683_v10, %v1747_v0  ;;  %v1420_v11 = vadd.f32 %v1377_v21, %v1204_v37  ;;  %v2401_v9 = vpop.f32.mrf.mxu0 }
 0x164   : > { %1942 = vst.msk [vmem:[%s3023_s6 + $0x68] sm:$0xf] %vm1915_vm6, %v2226_v29  ;;  %v2224_v24 = vpack.c.bf16 %v1779_v49, %v1779_v49  ;;  %vm1718_vm1 = vcmp.ge.f32.partialorder %v1686_v34, 0.0  ;;  %v1750_v46 = vmul.f32 0.2, %v1686_v34  ;;  %v1684_v17 = vadd.f32 %v3007_v16, %v1645_v32 }
 0x165   : > { %v1689_v23 = vadd.f32 %v3007_v16, %v1650_v41  ;;  %v1648_v7 = vadd.f32 %v1605_v12, %v1420_v11  ;;  %v1423_v59 = vadd.f32 %v2401_v9, %v1215_v63  ;;  %v1380_v8 = vpop.f32.mrf.mxu0 }
 0x166   : > { %1940 = vst.msk [vmem:[%s3023_s6 + $0x60] sm:$0xf] %vm1915_vm6, %v2224_v24  ;;  %v1782_v38 = vsel %vm1718_vm1, %v1686_v34, %v1750_v46  ;;  %vm1716_vm2 = vcmp.ge.f32.partialorder %v1684_v17, 0.0  ;;  %v1748_v33 = vmul.f32 0.2, %v1684_v17  ;;  %v1421_v15 = vadd.f32 %v1380_v8, %v1207_v4 }
 0x167   : > { %v2227_v26 = vpack.c.bf16 %v1782_v38, %v1782_v38  ;;  %vm1721_vm3 = vcmp.ge.f32.partialorder %v1689_v23, 0.0  ;;  %v1753_v36 = vmul.f32 0.2, %v1689_v23  ;;  %v1687_v6 = vadd.f32 %v3007_v16, %v1648_v7 }
 0x168   : > { %v1780_v45 = vsel %vm1716_vm2, %v1684_v17, %v1748_v33  ;;  %v1651_v48 = vadd.f32 %v2435_v14, %v1423_v59  ;;  %v1649_v60 = vadd.f32 %v1608_v57, %v1421_v15 }
 0x169   : > { %1943 = vst.msk [vmem:[%s3023_s6 + $0x6c] sm:$0xf] %vm1915_vm6, %v2227_v26  ;;  %v2225_v62 = vpack.c.bf16 %v1780_v45, %v1780_v45  ;;  %v1785_v13 = vsel %vm1721_vm3, %v1689_v23, %v1753_v36  ;;  %vm1719_vm4 = vcmp.ge.f32.partialorder %v1687_v6, 0.0  ;;  %v1751_v47 = vmul.f32 0.2, %v1687_v6 }
 0x16a   : > { %v2230_v50 = vpack.c.bf16 %v1785_v13, %v1785_v13  ;;  %v1690_v19 = vadd.f32 %v3007_v16, %v1651_v48  ;;  %v1688_v28 = vadd.f32 %v3007_v16, %v1649_v60 }
 0x16b   : > { %1941 = vst.msk [vmem:[%s3023_s6 + $0x64] sm:$0xf] %vm1915_vm6, %v2225_v62  ;;  %v1783_v40 = vsel %vm1719_vm4, %v1687_v6, %v1751_v47 }
 0x16c   : > { %1946 = vst.msk [vmem:[%s3023_s6 + $0x78] sm:$0xf] %vm1915_vm6, %v2230_v50  ;;  %v2228_v54 = vpack.c.bf16 %v1783_v40, %v1783_v40  ;;  %vm1722_vm5 = vcmp.ge.f32.partialorder %v1690_v19, 0.0  ;;  %v1754_v61 = vmul.f32 0.2, %v1690_v19  ;;  %vm1720_vm7 = vcmp.ge.f32.partialorder %v1688_v28, 0.0 }
 0x16d   : > { %v1752_v51 = vmul.f32 0.2, %v1688_v28 }
 0x16e   : > { %1944 = vst.msk [vmem:[%s3023_s6 + $0x70] sm:$0xf] %vm1915_vm6, %v2228_v54  ;;  %v1786_v42 = vsel %vm1722_vm5, %v1690_v19, %v1754_v61 }
 0x16f   : > { %v2231_v22 = vpack.c.bf16 %v1786_v42, %v1786_v42  ;;  %v1784_v30 = vsel %vm1720_vm7, %v1688_v28, %v1752_v51 }
 0x170   : > { %v2229_v1 = vpack.c.bf16 %v1784_v30, %v1784_v30 }
 0x171   : > { %1947 = vst.msk [vmem:[%s3023_s6 + $0x7c] sm:$0xf] %vm1915_vm6, %v2231_v22 }
 0x172   : > { %1945 = vst.msk [vmem:[%s3023_s6 + $0x74] sm:$0xf] %vm1915_vm6, %v2229_v1 }
 0x173 PF: > { %s13_s14 = sadd.s32 1, %s2504_s14   ;;  %s3244_s12 = smov %s2500_s13 }
 0x174   : > { %p10_p5 = scmp.ge.s32.totalorder %s13_s14, 4   ;;  %s3245_s13 = smov %s3247_s15 }
 0x176   :  { %12 = sbr.rel (!%p10_p5) target bundleno = 2 (0x2), region = 71 }

// kernel: _lambda_.6
= control target key start
LH: loop header
LB: loop body
LE: loop exit
PB: predicated region body
PF: predicated region fallthrough
CT: control target
= control target key end

     0   :  { %s1347_s9 = smov 0   ;;  %s1349_s10 = smov 0   ;;  %s1602_s0 = inlined_call_operand.vmem [shape: bf16[2,9,9,64], index: 0, kind: input, shape index: {}]   ;;  %s1603_s1 = inlined_call_operand.vmem [shape: bf16[4,64,32], index: 1, kind: input, shape index: {}]   ;;  %s1604_s2 = inlined_call_operand.vmem [shape: bf16[2,64,32], index: 2, kind: output, shape index: {}]  }
   0x1   :  { %s1351_s11 = smov 0  }
   0x2 LB: > { %s24_s12 = sadd.s32 1, %s1326_s10  ;;  %p1066_p0 = scmp.ge.s32.totalorder %s1330_s11, 1  ;;  %s1330_s11 = sphi %s1351_s11, %s12_s11   ;;  %s1326_s10 = sphi %s1349_s10, %s1608_s10   ;;  %s1322_s9 = sphi %s1347_s9, %s1607_s9  }
   0x3   : > { %p26_p1 = scmp.ge.s32.totalorder %s24_s12, 2  ;;  %p135_p2 = scmp.lt.s32.totalorder %s1330_s11, 3 }
   0x5   : > { %s1610_s12 = smov (%p26_p1, %s24_s12), 0  ;;  %p136_p3 = pnand %p1066_p0, %p135_p2 }
   0x6   : > { %p164_p4 = scmp.lt.s32.totalorder (!%p136_p3), %s1322_s9, 1 }
   0x7   : > { %139 = sbr.rel (%p136_p3) target bundleno = 322 (0x142), region = 28 }
   0xc   : > { %v1282_v0 = vld [vmem:[%s1603_s1 + $0x38] sm:$0xff]   ;;  %v1284_v2 = vld [vmem:[%s1603_s1 + $0x30] sm:$0xff]   ;;  %s1612_s9 = smov (!%p164_p4, %s1322_s9), 1  ;;  %v1286_v4 = vld [vmem:[%s1603_s1 + $0x28] sm:$0xff]   ;;  %vm368_vm0 = vcmask 523264   ;;  %vm828_vm4 = vcmask 261120  }
   0xd   : > { %v1283_v1 = vld [vmem:[%s1603_s1 + $0x18] sm:$0xff]   ;;  %1193 = vmatprep.subr.bf16.mxu0 %v1282_v0  ;;  %v1285_v3 = vld [vmem:[%s1603_s1 + $0x10] sm:$0xff]   ;;  %s1257_s23 = smul.u32 72, %s1612_s9  ;;  %v1287_v5 = vld [vmem:[%s1603_s1 + $0x8] sm:$0xff]   ;;  %vm208_vm1 = vsmask.f32 3328 }
   0xe   : > { %1209 = vmatprep.subr.bf16.mxu1 %v1283_v1  ;;  %1194 = vmatpush3.bf16.msra.mxu0 %v1282_v0  ;;  %v1288_v6 = vld [vmem:[%s1603_s1 + $0x20] sm:$0xff]   ;;  %vm209_vm2 = vsmask.f32 7440  ;;  %v1423_v29 = vld [vmem:[%s1603_s1 + $0x58] sm:$0xff]   ;;  %v1295_v53 = vld [vmem:[%s1603_s1 + $0x70] sm:$0xff]   ;;  %vm959_vm5 = vcmask 257024  }
   0xf   : > { %1210 = vmatpush3.bf16.msra.mxu1 %v1283_v1  ;;  %1195 = vmatprep.subr.bf16.mxu0 %v1284_v2  ;;  %s1389_s28 = scalar_lea.vmem %s1602_s0, %s1257_s23  ;;  %v1289_v9 = vld [vmem:[%s1603_s1] sm:$0xff]   ;;  %vm1426_vm3 = vmor %vm208_vm1, %vm209_vm2  ;;  %v1293_v40 = vld [vmem:[%s1603_s1 + $0x78] sm:$0xff]   ;;  %s1152_s25 = sshll.u32 %s1612_s9, 5 }
  0x10   : > { %1211 = vmatprep.subr.bf16.mxu1 %v1285_v3  ;;  %v182_v7 = vld [vmem:[%s1389_s28] sm:$0xf]  ;;  %v1396_v8 = vld [vmem:[%s1389_s28 + $0x8] sm:$0xf]  ;;  %v183_v15 = vld [vmem:[%s1389_s28 + $0x4] sm:$0x1]  ;;  %s180_s9 = scalar_lea.vmem %s1604_s2, %s1152_s25 }
  0x11   : > { %v212_v10 = vshrl.u32 %v182_v7, 16  ;;  %v215_v11 = vshll.u32 %v182_v7, 16  ;;  %v226_v12 = vshrl.u32 %v1396_v8, 16  ;;  %v229_v13 = vshll.u32 %v1396_v8, 16  ;;  %v185_v16 = vld [vmem:[%s1389_s28 + $0xc] sm:$0x1] }
  0x12   : > { %1196 = vmatpush3.bf16.msra.mxu0 %v1284_v2  ;;  %v1090_v14 = vcombine.low %v182_v7, %v1396_v8  ;;  %v1407_v17 = vld [vmem:[%s1389_s28 + $0x10] sm:$0xf]  ;;  %v187_v20 = vld [vmem:[%s1389_s28 + $0x14] sm:$0x1]  ;;  %v1411_v21 = vld [vmem:[%s1389_s28 + $0x18] sm:$0xf] }
  0x13   : > { %1212 = vmatpush3.bf16.msra.mxu1 %v1285_v3  ;;  %1197 = vmatprep.subr.bf16.mxu0 %v1286_v4  ;;  %v214_v18 = vrot.slane %v212_v10, 4  ;;  %v217_v19 = vrot.slane %v215_v11, 5  ;;  %v1091_v22 = vcombine.low %v1407_v17, %v1411_v21  ;;  %v189_v23 = vld [vmem:[%s1389_s28 + $0x1c] sm:$0x1]  ;;  %v1418_v24 = vld [vmem:[%s1389_s28 + $0x20] sm:$0xf] }
  0x14   : > { %1213 = vmatprep.subr.bf16.mxu1 %v1287_v5  ;;  %1217 = vmatprep.mubr.msk.bf16.mxu1 %vm368_vm0, %v1090_v14  ;;  %v221_v26 = vshll.u32 %v183_v15, 16  ;;  %v228_v27 = vrot.slane %v226_v12, 4  ;;  %v231_v28 = vrot.slane %v229_v13, 5  ;;  %v191_v30 = vld [vmem:[%s1389_s28 + $0x24] sm:$0x1]  ;;  %v235_v32 = vshll.u32 %v185_v16, 16 }
  0x15   : > { %v218_v25 = vor.u32 %v217_v19, %v214_v18  ;;  %v240_v33 = vshrl.u32 %v1407_v17, 16  ;;  %v243_v34 = vshll.u32 %v1407_v17, 16  ;;  %v249_v35 = vshll.u32 %v187_v20, 16  ;;  %v1451_v60 = vld [vmem:[%s1389_s28 + $0x28] sm:$0xf]  ;;  %v1294_v20 = vld [vmem:[%s1603_s1 + $0x50] sm:$0xff]  }
  0x16   : > { %1198 = vmatpush3.bf16.msra.mxu0 %v1286_v4  ;;  %v223_v37 = vrot.slane %v221_v26, 5  ;;  %v232_v38 = vor.u32 %v231_v28, %v228_v27  ;;  %v254_v39 = vshrl.u32 %v1411_v21, 16  ;;  %v237_v41 = vrot.slane %v235_v32, 5  ;;  %v193_v1 = vld [vmem:[%s1389_s28 + $0x2c] sm:$0x1] }
  0x17   : > { %1214 = vmatpush3.bf16.msra.mxu1 %v1287_v5  ;;  %1199 = vmatprep.subr.bf16.mxu0 %v1288_v6  ;;  %v219_v36 = vrot.slane %v218_v25, 4  ;;  %v242_v42 = vrot.slane %v240_v33, 4  ;;  %v245_v43 = vrot.slane %v243_v34, 5  ;;  %v251_v44 = vrot.slane %v249_v35, 5  ;;  %v1457_v2 = vld [vmem:[%s1389_s28 + $0x30] sm:$0xf] }
  0x18   : > { %1215 = vmatprep.subr.bf16.mxu1 %v1289_v9  ;;  %v233_v46 = vrot.slane %v232_v38, 4  ;;  %v256_v47 = vrot.slane %v254_v39, 4  ;;  %v257_v48 = vshll.u32 %v1411_v21, 16  ;;  %v263_v50 = vshll.u32 %v189_v23, 16  ;;  %v1463_v7 = vld [vmem:[%s1389_s28 + $0x38] sm:$0xf] }
  0x19   : > { %v224_v45 = vsel %vm1426_vm3, %v219_v36, %v223_v37  ;;  %v246_v49 = vor.u32 %v245_v43, %v242_v42  ;;  %v268_v51 = vshrl.u32 %v1418_v24, 16  ;;  %v271_v52 = vshll.u32 %v1418_v24, 16  ;;  %v1299_v13 = vld [vmem:[%s1603_s1 + $0x68] sm:$0xff]   ;;  %v195_v32 = vld [vmem:[%s1389_s28 + $0x34] sm:$0x1]  ;;  %v1301_v38 = vld [vmem:[%s1603_s1 + $0x60] sm:$0xff]  }
  0x1a   : > { %1200 = vmatpush3.bf16.msra.mxu0 %v1288_v6  ;;  %v1447_v54 = vsel %vm1426_vm3, %v233_v46, %v237_v41  ;;  %v259_v55 = vrot.slane %v257_v48, 5  ;;  %v277_v56 = vshll.u32 %v191_v30, 16  ;;  %v265_v62 = vrot.slane %v263_v50, 5  ;;  %v197_v33 = vld [vmem:[%s1389_s28 + $0x3c] sm:$0x1] }
  0x1b   : > { %1216 = vmatpush3.bf16.msra.mxu1 %v1289_v9  ;;  %1225 = vmatprep.subr.bf16.mxu0 %v1423_v29  ;;  %v247_v57 = vrot.slane %v246_v49, 4  ;;  %v270_v58 = vrot.slane %v268_v51, 4  ;;  %v273_v59 = vrot.slane %v271_v52, 5  ;;  %v1078_v63 = vcombine.low %v224_v45, %v1447_v54  ;;  %v198_v45 = vld [vmem:[%s1389_s28 + $0x40] sm:$0xf] }
  0x1c   : > { %1241 = vmatprep.subr.bf16.mxu1 %v1293_v40  ;;  %v260_v61 = vor.u32 %v259_v55, %v256_v47  ;;  %v282_v0 = vshrl.u32 %v1451_v60, 16  ;;  %v279_v4 = vrot.slane %v277_v56, 5  ;;  %v285_v5 = vshll.u32 %v1451_v60, 16  ;;  %v1298_v47 = vld [vmem:[%s1603_s1 + $0x48] sm:$0xff]   ;;  %v199_v50 = vld [vmem:[%s1389_s28 + $0x44] sm:$0x1] }
  0x1d   : > { %v274_v3 = vor.u32 %v273_v59, %v270_v58  ;;  %v1092_v6 = vcombine.low %v1418_v24, %v1451_v60  ;;  %v252_v9 = vsel %vm1426_vm3, %v247_v57, %v251_v44  ;;  %1201 = vmatprep.mubr.msk.bf16.mxu0 %vm368_vm0, %v1078_v63  ;;  %v291_v12 = vshll.u32 %v193_v1, 16 }
  0x1e   : > { %1218 = vmatmul.mubr.msk.bf16.vlgmr.msra.gmra.mxu1 %vm368_vm0, %v1091_v22  ;;  %v261_v10 = vrot.slane %v260_v61, 4  ;;  %v284_v11 = vrot.slane %v282_v0, 4  ;;  %v287_v15 = vrot.slane %v285_v5, 5  ;;  %v296_v16 = vshrl.u32 %v1457_v2, 16  ;;  %v1300_v0 = vld [vmem:[%s1603_s1 + $0x40] sm:$0xff]  }
  0x1f   : > { %1242 = vmatpush3.bf16.msra.mxu1 %v1293_v40  ;;  %v275_v14 = vrot.slane %v274_v3, 4  ;;  %1221 = vmatprep.mubr.msk.bf16.mxu1 %vm368_vm0, %v1092_v6  ;;  %v299_v18 = vshll.u32 %v1457_v2, 16  ;;  %v293_v22 = vrot.slane %v291_v12, 5  ;;  %v310_v23 = vshrl.u32 %v1463_v7, 16 }
  0x20   : > { %1243 = vmatprep.subr.bf16.mxu1 %v1295_v53  ;;  %v266_v19 = vsel %vm1426_vm3, %v261_v10, %v265_v62  ;;  %v313_v25 = vshll.u32 %v1463_v7, 16  ;;  %v1130_v27 = vcombine.low %v1447_v54, %v252_v9  ;;  %v288_v28 = vor.u32 %v287_v15, %v284_v11 }
  0x21   : > { %v1079_v26 = vcombine.low %v252_v9, %v266_v19  ;;  %v1093_v30 = vcombine.low %v1457_v2, %v1463_v7  ;;  %v280_v34 = vsel %vm1426_vm3, %v275_v14, %v279_v4  ;;  %v298_v35 = vrot.slane %v296_v16, 4 }
  0x22   : > { %v301_v36 = vrot.slane %v299_v18, 5  ;;  %v305_v37 = vshll.u32 %v195_v32, 16  ;;  %v289_v39 = vrot.slane %v288_v28, 4  ;;  %v312_v40 = vrot.slane %v310_v23, 4 }
  0x23   : > { %1244 = vmatpush3.bf16.msra.mxu1 %v1295_v53  ;;  %1202 = vmatmul.mubr.msk.bf16.vlgmr.msra.gmra.mxu0 %vm368_vm0, %v1079_v26  ;;  %v315_v41 = vrot.slane %v313_v25, 5  ;;  %v319_v42 = vshll.u32 %v197_v33, 16  ;;  %v692_v51 = vshrl.u32 %v198_v45, 16  ;;  %v701_v54 = vshll.u32 %v199_v50, 16 }
  0x24   : > { %1245 = vmatprep.subr.bf16.mxu1 %v1299_v13  ;;  %1226 = vmatpush3.bf16.msra.mxu0 %v1423_v29  ;;  %v302_v43 = vor.u32 %v301_v36, %v298_v35  ;;  %v307_v44 = vrot.slane %v305_v37, 5  ;;  %v294_v46 = vsel %vm1426_vm3, %v289_v39, %v293_v22  ;;  %v695_v29 = vshll.u32 %v198_v45, 16 }
  0x25   : > { %1227 = vmatprep.subr.bf16.mxu0 %v1294_v20  ;;  %v316_v48 = vor.u32 %v315_v41, %v312_v40  ;;  %v321_v49 = vrot.slane %v319_v42, 5  ;;  %v1080_v52 = vcombine.low %v280_v34, %v294_v46  ;;  %v694_v56 = vrot.slane %v692_v51, 4 }
  0x26   : > { %1222 = vmatmul.mubr.msk.bf16.gmra.mxu1 %vm368_vm0, %v1093_v30  ;;  %v303_v53 = vrot.slane %v302_v43, 4  ;;  %v1131_v57 = vcombine.low %v266_v19, %v280_v34  ;;  %v697_v59 = vrot.slane %v695_v29, 5  ;;  %v1110_v62 = vcombine.low %v1396_v8, %v1407_v17 }
  0x27   : > { %1246 = vmatpush3.bf16.msra.mxu1 %v1299_v13  ;;  %1249 = vmatprep.mubr.msk.bf16.mxu1 %vm368_vm0, %v1130_v27  ;;  %v317_v55 = vrot.slane %v316_v48, 4  ;;  %v703_v4 = vrot.slane %v701_v54, 5  ;;  %v1111_v17 = vcombine.low %v1411_v21, %v1418_v24  ;;  %v1112_v9 = vcombine.low %v1451_v60, %v1457_v2 }
  0x28   : > { %1247 = vmatprep.subr.bf16.mxu1 %v1301_v38  ;;  %1228 = vmatpush3.bf16.msra.mxu0 %v1294_v20  ;;  %v308_v58 = vsel %vm1426_vm3, %v303_v53, %v307_v44  ;;  %v698_v3 = vor.u32 %v697_v59, %v694_v56  ;;  %v1113_v10 = vcombine.low %v1463_v7, %v198_v45 }
  0x29   : > { %1205 = vmatprep.mubr.msk.bf16.mxu0 %vm368_vm0, %v1080_v52  ;;  %1229 = vmatprep.subr.bf16.mxu0 %v1298_v47  ;;  %v322_v61 = vsel %vm1426_vm3, %v317_v55, %v321_v49  ;;  %v1132_v1 = vcombine.low %v294_v46, %v308_v58 }
  0x2a   : > { %v1081_v63 = vcombine.low %v308_v58, %v322_v61  ;;  %v699_v5 = vrot.slane %v698_v3, 4 }
  0x2b   : > { %1248 = vmatpush3.bf16.msra.mxu1 %v1301_v38 }
  0x2c   : > { %1206 = vmatmul.mubr.msk.bf16.gmra.mxu0 %vm368_vm0, %v1081_v63  ;;  %v704_v8 = vsel %vm1426_vm3, %v699_v5, %v703_v4 }
  0x2d   : > { %1230 = vmatpush3.bf16.msra.mxu0 %v1298_v47  ;;  %1233 = vmatprep.mubr.msk.bf16.mxu0 %vm368_vm0, %v1110_v62  ;;  %v1133_v6 = vcombine.low %v322_v61, %v704_v8 }
  0x2e   : > { %1250 = vmatmul.mubr.msk.bf16.vlgmr.msra.gmra.mxu1 %vm368_vm0, %v1131_v57  ;;  %1231 = vmatprep.subr.bf16.mxu0 %v1300_v0 }
  0x2f   : > { %1253 = vmatprep.mubr.msk.bf16.mxu1 %vm368_vm0, %v1132_v1 }
  0x31   : > { %1232 = vmatpush3.bf16.msra.mxu0 %v1300_v0 }
  0x34   : > { %1234 = vmatmul.mubr.msk.bf16.vlgmr.msra.gmra.mxu0 %vm368_vm0, %v1111_v17 }
  0x35   : > { %1237 = vmatprep.mubr.msk.bf16.mxu0 %vm368_vm0, %v1112_v9 }
  0x36   : > { %1254 = vmatmul.mubr.msk.bf16.gmra.mxu1 %vm368_vm0, %v1133_v6 }
  0x3c   : > { %1238 = vmatmul.mubr.msk.bf16.gmra.mxu0 %vm368_vm0, %v1113_v10 }
  0xde   : > { %v1219_v31 = vpop.f32.mrf.mxu1 }
  0xe0   : > { %v536_v11 = vpop.f32.mrf.mxu1 }
  0xe2   : > { %v1220_v12 = vpop.f32.mrf.mxu1 }
  0xe3   : > { %v1203_v21 = vpop.f32.mrf.mxu0 }
  0xe4   : > { %v539_v13 = vpop.f32.mrf.mxu1  ;;  %v545_v28 = vadd.f32 %v1219_v31, %v1203_v21 }
  0xe5   : > { %v415_v14 = vpop.f32.mrf.mxu0 }
  0xe6   : > { %v1223_v24 = vpop.f32.mrf.mxu1  ;;  %v537_v30 = vadd.f32 %v536_v11, %v415_v14 }
  0xe7   : > { %v1204_v16 = vpop.f32.mrf.mxu0 }
  0xe8   : > { %v552_v15 = vpop.f32.mrf.mxu1  ;;  %v548_v36 = vadd.f32 %v1220_v12, %v1204_v16 }
  0xe9   : > { %v418_v2 = vpop.f32.mrf.mxu0 }
  0xea   : > { %v1224_v60 = vpop.f32.mrf.mxu1  ;;  %v540_v39 = vadd.f32 %v539_v13, %v418_v2 }
  0xec   : > { %v555_v18 = vpop.f32.mrf.mxu1  ;;  %v1207_v19 = vpop.f32.mrf.mxu0 }
  0xed   : > { %v561_v48 = vadd.f32 %v1223_v24, %v1207_v19 }
  0xee   : > { %v1251_v20 = vpop.f32.mrf.mxu1  ;;  %v431_v22 = vpop.f32.mrf.mxu0 }
  0xef   : > { %v553_v46 = vadd.f32 %v552_v15, %v431_v22 }
  0xf0   : > { %v789_v23 = vpop.f32.mrf.mxu1  ;;  %v1208_v25 = vpop.f32.mrf.mxu0 }
  0xf1   : > { %v564_v53 = vadd.f32 %v1224_v60, %v1208_v25 }
  0xf2   : > { %v1252_v7 = vpop.f32.mrf.mxu1  ;;  %v434_v26 = vpop.f32.mrf.mxu0 }
  0xf3   : > { %v556_v61 = vadd.f32 %v555_v18, %v434_v26 }
  0xf4   : > { %v1235_v27 = vpop.f32.mrf.mxu0  ;;  %v792_v32 = vpop.f32.mrf.mxu1 }
  0xf5   : > { %v685_v34 = vadd.f32 %v1235_v27, %v545_v28 }
  0xf6   : > { %v652_v33 = vpop.f32.mrf.mxu0  ;;  %v1255_v38 = vpop.f32.mrf.mxu1 }
  0xf7   : > { %v683_v35 = vadd.f32 %v652_v33, %v537_v30  ;;  %v1529_v43 = vadd.f32 %v1251_v20, %v685_v34 }
  0xf8   : > { %v1236_v37 = vpop.f32.mrf.mxu0  ;;  %v805_v47 = vpop.f32.mrf.mxu1 }
  0xf9   : > { %v1527_v40 = vadd.f32 %v789_v23, %v683_v35  ;;  %v686_v41 = vadd.f32 %v1236_v37, %v548_v36  ;;  %v854_v29 = vmul.f32 %v1529_v43, %v1529_v43  ;;  %v832_v62 = vsel %vm828_vm4, %v1529_v43, 0.0 }
  0xfa   : > { %v655_v42 = vpop.f32.mrf.mxu0  ;;  %v1256_v1 = vpop.f32.mrf.mxu1 }
  0xfb   : > { %v684_v44 = vadd.f32 %v655_v42, %v540_v39  ;;  %v852_v49 = vmul.f32 %v1527_v40, %v1527_v40  ;;  %v1533_v50 = vadd.f32 %v1252_v7, %v686_v41  ;;  %v829_v55 = vsel %vm828_vm4, %v1527_v40, 0.0 }
  0xfc   : > { %v1239_v45 = vpop.f32.mrf.mxu0  ;;  %v863_v6 = vsel %vm828_vm4, %v854_v29, 0.0  ;;  %v808_v14 = vpop.f32.mrf.mxu1 }
  0xfd   : > { %v1535_v51 = vadd.f32 %v792_v32, %v684_v44  ;;  %v689_v58 = vadd.f32 %v1239_v45, %v561_v48  ;;  %v860_v3 = vsel %vm828_vm4, %v852_v49, 0.0  ;;  %v855_v4 = vmul.f32 %v1533_v50, %v1533_v50 }
  0xfe   : > { %v668_v52 = vpop.f32.mrf.mxu0  ;;  %v834_v31 = vsel %vm828_vm4, %v1533_v50, 0.0 }
  0xff   : > { %v687_v54 = vadd.f32 %v668_v52, %v553_v46  ;;  %v830_v56 = vsel %vm828_vm4, %v1535_v51, 0.0  ;;  %v853_v57 = vmul.f32 %v1535_v51, %v1535_v51  ;;  %v826_v11 = vadd.f32 %v1255_v38, %v689_v58 }
 0x100   : > { %v1240_v59 = vpop.f32.mrf.mxu0  ;;  %v831_v63 = vadd.f32 %v830_v56, %v829_v55  ;;  %v865_v15 = vsel %vm828_vm4, %v855_v4, 0.0 }
 0x101   : > { %v1547_v0 = vadd.f32 %v805_v47, %v687_v54  ;;  %v861_v5 = vsel %vm828_vm4, %v853_v57, 0.0  ;;  %v690_v8 = vadd.f32 %v1240_v59, %v564_v53  ;;  %v858_v20 = vmul.f32 %v826_v11, %v826_v11 }
 0x102   : > { %v671_v17 = vpop.f32.mrf.mxu0  ;;  %v833_v9 = vadd.f32 %v832_v62, %v831_v63  ;;  %v862_v10 = vadd.f32 %v861_v5, %v860_v3  ;;  %v840_v27 = vsel %vm828_vm4, %v826_v11, 0.0 }
 0x103   : > { %v856_v12 = vmul.f32 %v1547_v0, %v1547_v0  ;;  %v688_v13 = vadd.f32 %v671_v17, %v556_v61  ;;  %v836_v16 = vsel %vm828_vm4, %v1547_v0, 0.0  ;;  %v827_v60 = vadd.f32 %v1256_v1, %v690_v8 }
 0x104   : > { %v864_v21 = vadd.f32 %v863_v6, %v862_v10  ;;  %v835_v24 = vadd.f32 %v834_v31, %v833_v9  ;;  %v871_v34 = vsel %vm828_vm4, %v858_v20, 0.0 }
 0x105   : > { %v825_v2 = vadd.f32 %v808_v14, %v688_v13  ;;  %v867_v22 = vsel %vm828_vm4, %v856_v12, 0.0  ;;  %v859_v28 = vmul.f32 %v827_v60, %v827_v60  ;;  %v842_v35 = vsel %vm828_vm4, %v827_v60, 0.0 }
 0x106   : > { %v837_v18 = vadd.f32 %v836_v16, %v835_v24  ;;  %v866_v19 = vadd.f32 %v865_v15, %v864_v21 }
 0x107   : > { %v838_v23 = vsel %vm828_vm4, %v825_v2, 0.0  ;;  %v857_v25 = vmul.f32 %v825_v2, %v825_v2  ;;  %v873_v38 = vsel %vm828_vm4, %v859_v28, 0.0 }
 0x108   : > { %v868_v7 = vadd.f32 %v867_v22, %v866_v19  ;;  %v839_v26 = vadd.f32 %v838_v23, %v837_v18 }
 0x109   : > { %v869_v30 = vsel %vm828_vm4, %v857_v25, 0.0 }
 0x10a   : > { %v841_v32 = vadd.f32 %v840_v27, %v839_v26  ;;  %v870_v33 = vadd.f32 %v869_v30, %v868_v7 }
 0x10c   : > { %v843_v36 = vadd.f32 %v842_v35, %v841_v32  ;;  %v872_v37 = vadd.f32 %v871_v34, %v870_v33 }
 0x10e   : > { %v844_v39 = vrot.slane %v843_v36, 4  ;;  %v874_v41 = vadd.f32 %v873_v38, %v872_v37 }
 0x110   : > { %v845_v42 = vadd.f32 %v844_v39, %v843_v36  ;;  %v875_v44 = vrot.slane %v874_v41, 4 }
 0x112   : > { %v846_v45 = vrot.slane %v845_v42, 2  ;;  %v876_v46 = vadd.f32 %v875_v44, %v874_v41 }
 0x114   : > { %v847_v47 = vadd.f32 %v846_v45, %v845_v42  ;;  %v877_v48 = vrot.slane %v876_v46, 2 }
 0x116   : > { %v848_v49 = vrot.slane %v847_v47, 1  ;;  %v878_v52 = vadd.f32 %v877_v48, %v876_v46 }
 0x118   : > { %v849_v53 = vadd.f32 %v848_v49, %v847_v47  ;;  %v879_v29 = vrot.slane %v878_v52, 1 }
 0x11a   : > { %v851_v54 = vmul.f32 0.015625, %v849_v53  ;;  %v880_v55 = vadd.f32 %v879_v29, %v878_v52 }
 0x11c   : > { %v881_v56 = vmul.f32 0.015625, %v880_v55  ;;  %v882_v57 = vmul.f32 %v851_v54, %v851_v54 }
 0x11e   : > { %v883_v58 = vsub.f32 %v881_v56, %v882_v57 }
 0x120   : > { %v884_v59 = vadd.f32 1e-05, %v883_v58 }
 0x122   : > { %1306 = vrsqrt.f32 %v884_v59 }
 0x12f   : > { %v1307_v61 = vpop.eup %1306 }
 0x130   : > { %v886_v62 = vmul.f32 %v1307_v61, %v1527_v40  ;;  %v887_v63 = vmul.f32 %v1307_v61, %v1535_v51  ;;  %v888_v1 = vmul.f32 %v1307_v61, %v1529_v43  ;;  %v889_v3 = vmul.f32 %v1307_v61, %v1533_v50 }
 0x131   : > { %v890_v4 = vmul.f32 %v1307_v61, %v1547_v0  ;;  %v891_v5 = vmul.f32 %v1307_v61, %v825_v2  ;;  %v892_v8 = vmul.f32 %v1307_v61, %v826_v11  ;;  %v893_v17 = vmul.f32 %v1307_v61, %v827_v60 }
 0x132   : > { %v894_v6 = vmul.f32 %v1307_v61, %v851_v54 }
 0x134   : > { %v895_v9 = vsub.f32 %v886_v62, %v894_v6  ;;  %v896_v10 = vsub.f32 %v887_v63, %v894_v6  ;;  %v897_v31 = vsub.f32 %v888_v1, %v894_v6  ;;  %v898_v12 = vsub.f32 %v889_v3, %v894_v6 }
 0x135   : > { %v899_v13 = vsub.f32 %v890_v4, %v894_v6  ;;  %v900_v40 = vsub.f32 %v891_v5, %v894_v6  ;;  %v901_v21 = vsub.f32 %v892_v8, %v894_v6  ;;  %v902_v51 = vsub.f32 %v893_v17, %v894_v6 }
 0x136   : > { %vm903_vm6 = vcmp.ge.f32.partialorder %v895_v9, 0.0  ;;  %vm904_vm7 = vcmp.ge.f32.partialorder %v896_v10, 0.0  ;;  %vm905_vm8 = vcmp.ge.f32.partialorder %v897_v31, 0.0  ;;  %vm906_vm9 = vcmp.ge.f32.partialorder %v898_v12, 0.0 }
 0x137   : > { %vm907_vm10 = vcmp.ge.f32.partialorder %v899_v13, 0.0  ;;  %vm908_vm11 = vcmp.ge.f32.partialorder %v900_v40, 0.0  ;;  %vm909_vm12 = vcmp.ge.f32.partialorder %v901_v21, 0.0  ;;  %vm910_vm13 = vcmp.ge.f32.partialorder %v902_v51, 0.0 }
 0x138   : > { %v911_v43 = vmul.f32 0.2, %v895_v9  ;;  %v912_v50 = vmul.f32 0.2, %v896_v10  ;;  %v913_v0 = vmul.f32 0.2, %v897_v31 }
 0x139   : > { %v914_v11 = vmul.f32 0.2, %v898_v12  ;;  %v915_v24 = vmul.f32 0.2, %v899_v13  ;;  %v916_v14 = vmul.f32 0.2, %v900_v40 }
 0x13a   : > { %v917_v15 = vmul.f32 0.2, %v901_v21  ;;  %v918_v16 = vmul.f32 0.2, %v902_v51  ;;  %v919_v60 = vsel %vm903_vm6, %v895_v9, %v911_v43  ;;  %v920_v2 = vsel %vm904_vm7, %v896_v10, %v912_v50 }
 0x13b   : > { %v921_v18 = vsel %vm905_vm8, %v897_v31, %v913_v0  ;;  %v922_v19 = vsel %vm906_vm9, %v898_v12, %v914_v11  ;;  %v923_v20 = vsel %vm907_vm10, %v899_v13, %v915_v24  ;;  %v924_v22 = vsel %vm908_vm11, %v900_v40, %v916_v14 }
 0x13c   : > { %v925_v23 = vsel %vm909_vm12, %v901_v21, %v917_v15  ;;  %v926_v25 = vsel %vm910_vm13, %v902_v51, %v918_v16  ;;  %v1153_v7 = vpack.c.bf16 %v919_v60, %v919_v60  ;;  %v1154_v26 = vpack.c.bf16 %v920_v2, %v920_v2 }
 0x13d   : > { %v1155_v27 = vpack.c.bf16 %v921_v18, %v921_v18  ;;  %v1156_v28 = vpack.c.bf16 %v922_v19, %v922_v19  ;;  %v1157_v30 = vpack.c.bf16 %v923_v20, %v923_v20  ;;  %v1158_v32 = vpack.c.bf16 %v924_v22, %v924_v22 }
 0x13e   : > { %v1159_v33 = vpack.c.bf16 %v925_v23, %v925_v23  ;;  %v1160_v34 = vpack.c.bf16 %v926_v25, %v926_v25  ;;  %960 = vst.msk [vmem:[%s180_s9] sm:$0xf] %vm959_vm5, %v1153_v7  ;;  %961 = vst.msk [vmem:[%s180_s9 + $0x4] sm:$0xf] %vm959_vm5, %v1154_v26 }
 0x13f   : > { %962 = vst.msk [vmem:[%s180_s9 + $0x8] sm:$0xf] %vm959_vm5, %v1155_v27  ;;  %963 = vst.msk [vmem:[%s180_s9 + $0xc] sm:$0xf] %vm959_vm5, %v1156_v28 }
 0x140   : > { %964 = vst.msk [vmem:[%s180_s9 + $0x10] sm:$0xf] %vm959_vm5, %v1157_v30  ;;  %965 = vst.msk [vmem:[%s180_s9 + $0x14] sm:$0xf] %vm959_vm5, %v1158_v32 }
 0x141   : > { %966 = vst.msk [vmem:[%s180_s9 + $0x18] sm:$0xf] %vm959_vm5, %v1159_v33  ;;  %967 = vst.msk [vmem:[%s180_s9 + $0x1c] sm:$0xf] %vm959_vm5, %v1160_v34 }
 0x142 PF: > { %s12_s11 = sadd.s32 1, %s1330_s11   ;;  %s1607_s9 = smov %s1326_s10 }
 0x143   : > { %p9_p5 = scmp.ge.s32.totalorder %s12_s11, 4   ;;  %s1608_s10 = smov %s1610_s12 }
 0x145   :  { %11 = sbr.rel (!%p9_p5) target bundleno = 2 (0x2), region = 64 }

// kernel: _lambda_.7
= control target key start
LH: loop header
LB: loop body
LE: loop exit
PB: predicated region body
PF: predicated region fallthrough
CT: control target
= control target key end

     0   :  { %s1271_s9 = smov 0   ;;  %s1273_s10 = smov 0   ;;  %s1517_s0 = inlined_call_operand.vmem [shape: bf16[2,5,5,128], index: 0, kind: input, shape index: {}]   ;;  %s1518_s1 = inlined_call_operand.vmem [shape: bf16[4,128,64], index: 1, kind: input, shape index: {}]   ;;  %s1519_s2 = inlined_call_operand.vmem [shape: bf16[2,16,64], index: 2, kind: output, shape index: {}]  }
   0x1   :  { %s1275_s11 = smov 0  }
   0x2 LB: > { %s24_s12 = sadd.s32 1, %s1247_s10  ;;  %p956_p0 = scmp.ge.s32.totalorder %s1251_s11, 1  ;;  %s1251_s11 = sphi %s1275_s11, %s12_s11   ;;  %s1247_s10 = sphi %s1273_s10, %s1525_s10   ;;  %s1243_s9 = sphi %s1271_s9, %s1524_s9  }
   0x3   : > { %p26_p1 = scmp.ge.s32.totalorder %s24_s12, 2  ;;  %p135_p2 = scmp.lt.s32.totalorder %s1251_s11, 3 }
   0x5   : > { %s1527_s12 = smov (%p26_p1, %s24_s12), 0  ;;  %p136_p3 = pnand %p956_p0, %p135_p2 }
   0x6   : > { %p164_p4 = scmp.lt.s32.totalorder (!%p136_p3), %s1243_s9, 1 }
   0x7   : > { %139 = sbr.rel (%p136_p3) target bundleno = 325 (0x145), region = 28 }
   0xc   : > { %v1191_v0 = vld [vmem:[%s1518_s1 + $0x78] sm:$0xff]   ;;  %v1253_v1 = vmov 0.0   ;;  %v1193_v3 = vld [vmem:[%s1518_s1 + $0x70] sm:$0xff]   ;;  %vm1254_vm0 = vmmov 0   ;;  %v1195_v5 = vld [vmem:[%s1518_s1 + $0x68] sm:$0xff]   ;;  %s1529_s9 = smov (!%p164_p4, %s1243_s9), 1  ;;  %v210_v10 = vlaneseq }
   0xd   : > { %1083 = vmatprep.subr.bf16.mxu0 %v1253_v1  ;;  %1103 = vmatprep.subr.bf16.mxu1 %v1253_v1  ;;  %v1192_v2 = vld [vmem:[%s1518_s1 + $0x38] sm:$0xff]   ;;  %v1194_v4 = vld [vmem:[%s1518_s1 + $0x30] sm:$0xff]   ;;  %v1196_v6 = vld [vmem:[%s1518_s1 + $0x28] sm:$0xff]   ;;  %s1163_s29 = smul.u32 20, %s1529_s9  ;;  %v1255_v14 = vmov 1983009808  }
   0xe   : > { %1084 = vmatpush3.bf16.msra.mxu0 %v1191_v0  ;;  %1099 = vmatprep.mubr.msk.bf16.mxu0 %vm1254_vm0, %v1253_v1  ;;  %v1197_v7 = vld [vmem:[%s1518_s1 + $0x60] sm:$0xff]   ;;  %v1199_v9 = vld [vmem:[%s1518_s1 + $0x58] sm:$0xff]   ;;  %v1201_v12 = vld [vmem:[%s1518_s1 + $0x50] sm:$0xff]   ;;  %v208_v15 = vunpack.c.l.s4 %v1255_v14  ;;  %v211_v16 = vshrl.u32 %v210_v10, 7  ;;  %vm239_vm1 = vsmask.f32 1280 }
   0xf   : > { %1104 = vmatpush3.bf16.msra.mxu1 %v1192_v2  ;;  %1085 = vmatprep.subr.bf16.mxu0 %v1253_v1  ;;  %v1198_v8 = vld [vmem:[%s1518_s1 + $0x20] sm:$0xff]   ;;  %v1200_v11 = vld [vmem:[%s1518_s1 + $0x18] sm:$0xff]   ;;  %s1343_s8 = scalar_lea.vmem %s1517_s0, %s1163_s29  ;;  %v1202_v13 = vld [vmem:[%s1518_s1 + $0x10] sm:$0xff]   ;;  %vm240_vm2 = vsmask.f32 3336  ;;  %vm808_vm8 = vcmask 523264  }
  0x10   : > { %1105 = vmatprep.subr.bf16.mxu1 %v1253_v1  ;;  %1119 = vmatprep.mubr.msk.bf16.mxu1 %vm1254_vm0, %v1253_v1  ;;  %v1353_v17 = vld [vmem:[%s1343_s8] sm:$0x7]  ;;  %v1203_v18 = vld [vmem:[%s1518_s1 + $0x48] sm:$0xff]   ;;  %v1360_v19 = vld [vmem:[%s1343_s8 + $0x4] sm:$0x7]  ;;  %v209_v21 = vunpack.c.0.s8 %v208_v15  ;;  %s1044_s5 = sshll.u32 %s1529_s9, 3 }
  0x11   : > { %v1363_v20 = vld [vmem:[%s1343_s8 + $0x8] sm:$0x7]  ;;  %v1369_v23 = vld [vmem:[%s1343_s8 + $0xc] sm:$0x7]  ;;  %vm242_vm3 = vsmask.f32 5392  ;;  %v426_v31 = vcombine.low %v1353_v17, %v1360_v19  ;;  %vm241_vm5 = vmor %vm239_vm1, %vm240_vm2 }
  0x12   : > { %1086 = vmatpush3.bf16.msra.mxu0 %v1193_v3  ;;  %v1204_v22 = vld [vmem:[%s1518_s1 + $0x8] sm:$0xff]   ;;  %v1371_v24 = vsub.s32 %v209_v21, %v211_v16  ;;  %v1205_v25 = vld [vmem:[%s1518_s1 + $0x40] sm:$0xff]   ;;  %vm244_vm4 = vsmask.f32 7448  ;;  %v427_v32 = vcombine.low %v1363_v20, %v1369_v23  ;;  %vm1398_vm6 = vmor %vm241_vm5, %vm242_vm3  ;;  %vm855_vm11 = vcmask 519168  }
  0x13   : > { %1106 = vmatpush3.bf16.msra.mxu1 %v1194_v4  ;;  %1087 = vmatprep.subr.bf16.mxu0 %v1253_v1  ;;  %v1206_v30 = vld [vmem:[%s1518_s1] sm:$0xff]   ;;  %v1404_v58 = vld [vmem:[%s1343_s8 + $0x10] sm:$0x7]  ;;  %vm1409_vm7 = vmor %vm1398_vm6, %vm244_vm4  ;;  %s180_s8 = scalar_lea.vmem %s1519_s2, %s1044_s5 }
  0x14   : > { %1107 = vmatprep.subr.bf16.mxu1 %v1253_v1  ;;  %v213_v26 = vrot.slane %v1353_v17, %v1371_v24  ;;  %v221_v27 = vrot.slane %v1360_v19, %v1371_v24  ;;  %v229_v28 = vrot.slane %v1363_v20, %v1371_v24  ;;  %v237_v29 = vrot.slane %v1369_v23, %v1371_v24  ;;  %v1220_v45 = vld [vmem:[%s1518_s1 + $0xd0] sm:$0xff]  }
  0x15   : > { %v434_v63 = vrot.slane %v426_v31, %v1371_v24  ;;  %v441_v4 = vrot.slane %v427_v32, %v1371_v24  ;;  %v1209_v32 = vld [vmem:[%s1518_s1 + $0xb8] sm:$0xff]  }
  0x16   : > { %1088 = vmatpush3.bf16.msra.mxu0 %v1195_v5  ;;  %v214_v33 = vcombine.high %v213_v26, %v213_v26  ;;  %v222_v34 = vcombine.high %v221_v27, %v221_v27  ;;  %v230_v35 = vcombine.high %v229_v28, %v229_v28  ;;  %v238_v36 = vcombine.high %v237_v29, %v237_v29 }
  0x17   : > { %1108 = vmatpush3.bf16.msra.mxu1 %v1196_v6  ;;  %1089 = vmatprep.subr.bf16.mxu0 %v1253_v1  ;;  %v247_v37 = vshrl.u32 %v213_v26, 16  ;;  %v250_v38 = vshll.u32 %v213_v26, 16  ;;  %v261_v39 = vshrl.u32 %v221_v27, 16  ;;  %v264_v40 = vshll.u32 %v221_v27, 16 }
  0x18   : > { %1109 = vmatprep.subr.bf16.mxu1 %v1253_v1  ;;  %v256_v41 = vshll.u32 %v214_v33, 16  ;;  %v270_v42 = vshll.u32 %v222_v34, 16  ;;  %v275_v43 = vshrl.u32 %v229_v28, 16  ;;  %v278_v44 = vshll.u32 %v229_v28, 16  ;;  %v1214_v33 = vld [vmem:[%s1518_s1 + $0xe8] sm:$0xff]  }
  0x19   : > { %v249_v46 = vrot.slane %v247_v37, 6  ;;  %v252_v47 = vrot.slane %v250_v38, 7  ;;  %v263_v48 = vrot.slane %v261_v39, 6  ;;  %v266_v49 = vrot.slane %v264_v40, 7  ;;  %v1211_v37 = vld [vmem:[%s1518_s1 + $0xb0] sm:$0xff]   ;;  %v1216_v38 = vld [vmem:[%s1518_s1 + $0xe0] sm:$0xff]  }
  0x1a   : > { %1090 = vmatpush3.bf16.msra.mxu0 %v1197_v7  ;;  %v258_v50 = vrot.slane %v256_v41, 7  ;;  %v272_v51 = vrot.slane %v270_v42, 7  ;;  %v277_v52 = vrot.slane %v275_v43, 6  ;;  %v280_v53 = vrot.slane %v278_v44, 7  ;;  %v1213_v41 = vld [vmem:[%s1518_s1 + $0xa8] sm:$0xff]   ;;  %v1218_v42 = vld [vmem:[%s1518_s1 + $0xd8] sm:$0xff]  }
  0x1b   : > { %1110 = vmatpush3.bf16.msra.mxu1 %v1198_v8  ;;  %1091 = vmatprep.subr.bf16.mxu0 %v1253_v1  ;;  %v253_v54 = vor.u32 %v252_v47, %v249_v46  ;;  %v267_v55 = vor.u32 %v266_v49, %v263_v48  ;;  %v284_v56 = vshll.u32 %v230_v35, 16  ;;  %v289_v57 = vshrl.u32 %v237_v29, 16  ;;  %v1215_v44 = vld [vmem:[%s1518_s1 + $0xa0] sm:$0xff]   ;;  %v1217_v48 = vld [vmem:[%s1518_s1 + $0x98] sm:$0xff]   ;;  %v1222_v49 = vld [vmem:[%s1518_s1 + $0xc8] sm:$0xff]  }
  0x1c   : > { %1111 = vmatprep.subr.bf16.mxu1 %v1253_v1  ;;  %v281_v60 = vor.u32 %v280_v53, %v277_v52  ;;  %v292_v61 = vshll.u32 %v237_v29, 16  ;;  %v298_v62 = vshll.u32 %v238_v36, 16  ;;  %v442_v15 = vcombine.low %v434_v63, %v441_v4  ;;  %v1219_v52 = vld [vmem:[%s1518_s1 + $0x90] sm:$0xff]   ;;  %v1224_v53 = vld [vmem:[%s1518_s1 + $0xc0] sm:$0xff]  }
  0x1d   : > { %v254_v0 = vrot.slane %v253_v54, 2  ;;  %v268_v2 = vrot.slane %v267_v55, 2  ;;  %v291_v3 = vrot.slane %v289_v57, 6  ;;  %v286_v6 = vrot.slane %v284_v56, 7  ;;  %v1221_v57 = vld [vmem:[%s1518_s1 + $0x88] sm:$0xff]  }
  0x1e   : > { %1092 = vmatpush3.bf16.msra.mxu0 %v1199_v9  ;;  %v282_v5 = vrot.slane %v281_v60, 2  ;;  %v294_v7 = vrot.slane %v292_v61, 7  ;;  %v551_v54 = vcombine.low %v1360_v19, %v1363_v20  ;;  %v552_v55 = vcombine.low %v1369_v23, %v1404_v58  ;;  %v1223_v19 = vld [vmem:[%s1518_s1 + $0x80] sm:$0xff]  }
  0x1f   : > { %1112 = vmatpush3.bf16.msra.mxu1 %v1200_v11  ;;  %1093 = vmatprep.subr.bf16.mxu0 %v1253_v1  ;;  %v259_v8 = vsel %vm1409_vm7, %v254_v0, %v258_v50  ;;  %v273_v9 = vsel %vm1409_vm7, %v268_v2, %v272_v51  ;;  %v300_v11 = vrot.slane %v298_v62, 7 }
  0x20   : > { %1113 = vmatprep.subr.bf16.mxu1 %v1253_v1  ;;  %v295_v10 = vor.u32 %v294_v7, %v291_v3  ;;  %v319_v14 = vcombine.low %v259_v8, %v273_v9  ;;  %v287_v16 = vsel %vm1409_vm7, %v282_v5, %v286_v6  ;;  %v559_v59 = vrot.slane %v551_v54, %v1371_v24 }
  0x21   : > { %v699_v46 = vcombine.low %v273_v9, %v287_v16  ;;  %v566_v60 = vrot.slane %v552_v55, %v1371_v24 }
  0x22   : > { %1094 = vmatpush3.bf16.msra.mxu0 %v1201_v12  ;;  %v666_v12 = vrot.slane %v1404_v58, %v1371_v24  ;;  %v296_v17 = vrot.slane %v295_v10, 2  ;;  %v327_v27 = vrot.slane %v319_v14, %v1371_v24 }
  0x23   : > { %1114 = vmatpush3.bf16.msra.mxu1 %v1202_v13  ;;  %1095 = vmatprep.subr.bf16.mxu0 %v1253_v1  ;;  %v1210_v13 = vld [vmem:[%s1518_s1 + $0xf8] sm:$0xff]   ;;  %v707_v50 = vrot.slane %v699_v46, %v1371_v24  ;;  %v567_v20 = vcombine.low %v559_v59, %v566_v60 }
  0x24   : > { %1115 = vmatprep.subr.bf16.mxu1 %v1253_v1  ;;  %v669_v21 = vshrl.u32 %v666_v12, 16  ;;  %v667_v29 = vcombine.high %v666_v12, %v666_v12 }
  0x26   : > { %1096 = vmatpush3.bf16.msra.mxu0 %v1203_v18  ;;  %v301_v18 = vsel %vm1409_vm7, %v296_v17, %v300_v11  ;;  %v678_v36 = vshll.u32 %v667_v29, 16 }
  0x27   : > { %1116 = vmatpush3.bf16.msra.mxu1 %v1204_v22  ;;  %1097 = vmatprep.subr.bf16.mxu0 %v1253_v1  ;;  %v672_v22 = vshll.u32 %v666_v12, 16  ;;  %v320_v26 = vcombine.low %v287_v16, %v301_v18 }
  0x28   : > { %1117 = vmatprep.subr.bf16.mxu1 %v1253_v1  ;;  %v680_v40 = vrot.slane %v678_v36, 7 }
  0x29   : > { %v334_v28 = vrot.slane %v320_v26, %v1371_v24  ;;  %v674_v31 = vrot.slane %v672_v22, 7 }
  0x2a   : > { %1098 = vmatpush3.bf16.msra.mxu0 %v1205_v25  ;;  %v1212_v25 = vld [vmem:[%s1518_s1 + $0xf0] sm:$0xff]  }
  0x2b   : > { %1118 = vmatpush3.bf16.msra.mxu1 %v1206_v30  ;;  %1123 = vmatprep.subr.bf16.mxu0 %v1253_v1  ;;  %v671_v30 = vrot.slane %v669_v21, 6  ;;  %v335_v34 = vcombine.low %v327_v27, %v334_v28 }
  0x2c   : > { %1143 = vmatprep.subr.bf16.mxu1 %v1253_v1 }
  0x2d   : > { %1100 = vmatmul.mubr.bf16.vlgmr.msra.gmra.mxu0 %v335_v34  ;;  %v675_v35 = vor.u32 %v674_v31, %v671_v30 }
  0x2e   : > { %1120 = vmatmul.mubr.bf16.vlgmr.msra.gmra.mxu1 %v442_v15  ;;  %1124 = vmatpush3.bf16.msra.mxu0 %v1209_v32 }
  0x2f   : > { %1144 = vmatpush3.bf16.msra.mxu1 %v1210_v13  ;;  %1159 = vmatprep.mubr.msk.bf16.mxu1 %vm1254_vm0, %v1253_v1  ;;  %v676_v39 = vrot.slane %v675_v35, 2 }
  0x30   : > { %1145 = vmatprep.subr.bf16.mxu1 %v1253_v1  ;;  %1125 = vmatprep.subr.bf16.mxu0 %v1253_v1 }
  0x31   : > { %1139 = vmatprep.mubr.msk.bf16.mxu0 %vm1254_vm0, %v1253_v1  ;;  %v681_v43 = vsel %vm1409_vm7, %v676_v39, %v680_v40 }
  0x32   : > { %1126 = vmatpush3.bf16.msra.mxu0 %v1211_v37  ;;  %v700_v47 = vcombine.low %v301_v18, %v681_v43 }
  0x33   : > { %1146 = vmatpush3.bf16.msra.mxu1 %v1212_v25  ;;  %1127 = vmatprep.subr.bf16.mxu0 %v1253_v1 }
  0x34   : > { %1147 = vmatprep.subr.bf16.mxu1 %v1253_v1  ;;  %v714_v51 = vrot.slane %v700_v47, %v1371_v24 }
  0x36   : > { %1128 = vmatpush3.bf16.msra.mxu0 %v1213_v41  ;;  %v715_v56 = vcombine.low %v707_v50, %v714_v51 }
  0x37   : > { %1148 = vmatpush3.bf16.msra.mxu1 %v1214_v33  ;;  %1129 = vmatprep.subr.bf16.mxu0 %v1253_v1 }
  0x38   : > { %1149 = vmatprep.subr.bf16.mxu1 %v1253_v1 }
  0x3a   : > { %1130 = vmatpush3.bf16.msra.mxu0 %v1215_v44 }
  0x3b   : > { %1150 = vmatpush3.bf16.msra.mxu1 %v1216_v38  ;;  %1131 = vmatprep.subr.bf16.mxu0 %v1253_v1 }
  0x3c   : > { %1151 = vmatprep.subr.bf16.mxu1 %v1253_v1 }
  0x3e   : > { %1132 = vmatpush3.bf16.msra.mxu0 %v1217_v48 }
  0x3f   : > { %1152 = vmatpush3.bf16.msra.mxu1 %v1218_v42  ;;  %1133 = vmatprep.subr.bf16.mxu0 %v1253_v1 }
  0x40   : > { %1153 = vmatprep.subr.bf16.mxu1 %v1253_v1 }
  0x42   : > { %1134 = vmatpush3.bf16.msra.mxu0 %v1219_v52 }
  0x43   : > { %1154 = vmatpush3.bf16.msra.mxu1 %v1220_v45  ;;  %1135 = vmatprep.subr.bf16.mxu0 %v1253_v1 }
  0x44   : > { %1155 = vmatprep.subr.bf16.mxu1 %v1253_v1 }
  0x46   : > { %1136 = vmatpush3.bf16.msra.mxu0 %v1221_v57 }
  0x47   : > { %1156 = vmatpush3.bf16.msra.mxu1 %v1222_v49  ;;  %1137 = vmatprep.subr.bf16.mxu0 %v1253_v1 }
  0x48   : > { %1157 = vmatprep.subr.bf16.mxu1 %v1253_v1 }
  0x4a   : > { %1138 = vmatpush3.bf16.msra.mxu0 %v1223_v19 }
  0x4b   : > { %1158 = vmatpush3.bf16.msra.mxu1 %v1224_v53 }
  0x4d   : > { %1140 = vmatmul.mubr.bf16.vlgmr.msra.gmra.mxu0 %v567_v20 }
  0x4e   : > { %1160 = vmatmul.mubr.bf16.vlgmr.msra.gmra.mxu1 %v715_v56 }
  0xed   : > { %v419_v63 = vpop.f32.mrf.mxu0 }
  0xee   : > { %v526_v23 = vpop.f32.mrf.mxu1 }
  0xef   : > { %v1101_v0 = vpop.f32.mrf.mxu0  ;;  %v527_v7 = vadd.f32 %v526_v23, %v419_v63 }
  0xf0   : > { %v1121_v58 = vpop.f32.mrf.mxu1 }
  0xf1   : > { %v422_v2 = vpop.f32.mrf.mxu0 }
  0xf2   : > { %v529_v61 = vpop.f32.mrf.mxu1 }
  0xf3   : > { %v1102_v3 = vpop.f32.mrf.mxu0  ;;  %v530_v1 = vadd.f32 %v529_v61, %v422_v2 }
  0xf4   : > { %v1122_v62 = vpop.f32.mrf.mxu1 }
 0x10d   : > { %v651_v8 = vpop.f32.mrf.mxu0 }
 0x10e   : > { %v799_v24 = vpop.f32.mrf.mxu1  ;;  %v658_v9 = vadd.f32 %v651_v8, %v527_v7 }
 0x10f   : > { %v1141_v10 = vpop.f32.mrf.mxu0 }
 0x110   : > { %v1161_v4 = vpop.f32.mrf.mxu1  ;;  %v806_v11 = vadd.f32 %v799_v24, %v658_v9 }
 0x111   : > { %v654_v12 = vpop.f32.mrf.mxu0 }
 0x112   : > { %v802_v5 = vpop.f32.mrf.mxu1  ;;  %v659_v13 = vadd.f32 %v654_v12, %v530_v1  ;;  %v820_v15 = vmul.f32 %v806_v11, %v806_v11  ;;  %v809_v17 = vsel %vm808_vm8, %v806_v11, 0.0 }
 0x113   : > { %v1142_v14 = vpop.f32.mrf.mxu0 }
 0x114   : > { %v1162_v6 = vpop.f32.mrf.mxu1  ;;  %v807_v16 = vadd.f32 %v802_v5, %v659_v13  ;;  %v822_v25 = vsel %vm808_vm8, %v820_v15, 0.0 }
 0x116   : > { %v810_v18 = vsel %vm808_vm8, %v807_v16, 0.0  ;;  %v821_v21 = vmul.f32 %v807_v16, %v807_v16 }
 0x117   : > { %v811_v22 = vadd.f32 %v810_v18, %v809_v17 }
 0x118   : > { %v823_v26 = vsel %vm808_vm8, %v821_v21, 0.0 }
 0x119   : > { %v812_v27 = vrot.slane %v811_v22, 4  ;;  %v824_v28 = vadd.f32 %v823_v26, %v822_v25 }
 0x11b   : > { %v813_v29 = vadd.f32 %v812_v27, %v811_v22  ;;  %v825_v30 = vrot.slane %v824_v28, 4 }
 0x11d   : > { %v814_v31 = vrot.slane %v813_v29, 2  ;;  %v826_v32 = vadd.f32 %v825_v30, %v824_v28 }
 0x11f   : > { %v815_v33 = vadd.f32 %v814_v31, %v813_v29  ;;  %v827_v34 = vrot.slane %v826_v32, 2 }
 0x121   : > { %v816_v35 = vrot.slane %v815_v33, 1  ;;  %v828_v36 = vadd.f32 %v827_v34, %v826_v32 }
 0x123   : > { %v817_v37 = vadd.f32 %v816_v35, %v815_v33  ;;  %v829_v38 = vrot.slane %v828_v36, 1 }
 0x125   : > { %v819_v39 = vmul.f32 0.0625, %v817_v37  ;;  %v830_v40 = vadd.f32 %v829_v38, %v828_v36 }
 0x127   : > { %v831_v41 = vmul.f32 0.0625, %v830_v40  ;;  %v832_v42 = vmul.f32 %v819_v39, %v819_v39 }
 0x129   : > { %v833_v43 = vsub.f32 %v831_v41, %v832_v42 }
 0x12b   : > { %v834_v44 = vadd.f32 1e-05, %v833_v43 }
 0x12d   : > { %1227 = vrsqrt.f32 %v834_v44 }
 0x13a   : > { %v1228_v45 = vpop.eup %1227 }
 0x13b   : > { %v836_v46 = vmul.f32 %v1228_v45, %v806_v11  ;;  %v837_v47 = vmul.f32 %v1228_v45, %v807_v16  ;;  %v838_v48 = vmul.f32 %v1228_v45, %v819_v39 }
 0x13d   : > { %v839_v49 = vsub.f32 %v836_v46, %v838_v48  ;;  %v840_v50 = vsub.f32 %v837_v47, %v838_v48 }
 0x13f   : > { %vm841_vm9 = vcmp.ge.f32.partialorder %v839_v49, 0.0  ;;  %vm842_vm10 = vcmp.ge.f32.partialorder %v840_v50, 0.0  ;;  %v843_v51 = vmul.f32 0.2, %v839_v49  ;;  %v844_v52 = vmul.f32 0.2, %v840_v50 }
 0x141   : > { %v845_v53 = vsel %vm841_vm9, %v839_v49, %v843_v51  ;;  %v846_v54 = vsel %vm842_vm10, %v840_v50, %v844_v52 }
 0x142   : > { %v1045_v55 = vpack.c.bf16 %v845_v53, %v845_v53  ;;  %v1046_v56 = vpack.c.bf16 %v846_v54, %v846_v54 }
 0x144   : > { %856 = vst.msk [vmem:[%s180_s8] sm:$0xf] %vm855_vm11, %v1045_v55  ;;  %857 = vst.msk [vmem:[%s180_s8 + $0x4] sm:$0xf] %vm855_vm11, %v1046_v56 }
 0x145 PF: > { %s12_s11 = sadd.s32 1, %s1251_s11   ;;  %s1524_s9 = smov %s1247_s10 }
 0x146   : > { %p9_p5 = scmp.ge.s32.totalorder %s12_s11, 4   ;;  %s1525_s10 = smov %s1527_s12 }
 0x148   :  { %11 = sbr.rel (!%p9_p5) target bundleno = 2 (0x2), region = 64 }

// kernel: _lambda_.8
= control target key start
LH: loop header
LB: loop body
LE: loop exit
PB: predicated region body
PF: predicated region fallthrough
CT: control target
= control target key end

     0   :  { %s3107_s9 = smov 0   ;;  %s3109_s10 = smov 0   ;;  %s3788_s0 = inlined_call_operand.vmem [shape: bf16[2,6,6,64], index: 0, kind: input, shape index: {}]   ;;  %s3789_s1 = inlined_call_operand.vmem [shape: bf16[16,64,128], index: 1, kind: input, shape index: {}]   ;;  %s3790_s2 = inlined_call_operand.vmem [shape: bf16[2,9,128], index: 2, kind: output, shape index: {}]  }
   0x1   :  { %s3111_s11 = smov 0  }
   0x2 LB: > { %s24_s12 = sadd.s32 1, %s3083_s10  ;;  %p2462_p0 = scmp.ge.s32.totalorder %s3087_s11, 1  ;;  %s3087_s11 = sphi %s3111_s11, %s12_s11   ;;  %s3083_s10 = sphi %s3109_s10, %s3792_s10   ;;  %s3079_s9 = sphi %s3107_s9, %s3791_s9  }
   0x3   : > { %p26_p1 = scmp.ge.s32.totalorder %s24_s12, 2  ;;  %p135_p2 = scmp.lt.s32.totalorder %s3087_s11, 3 }
   0x5   : > { %s3794_s12 = smov (%p26_p1, %s24_s12), 0  ;;  %p136_p3 = pnand %p2462_p0, %p135_p2 }
   0x6   : > { %p164_p4 = scmp.lt.s32.totalorder (!%p136_p3), %s3079_s9, 1 }
   0x7   : > { %139 = sbr.rel (%p136_p3) target bundleno = 399 (0x18f), region = 28 }
   0xc   : > { %v2999_v0 = vld [vmem:[%s3789_s1 + $0x18] sm:$0xff]   ;;  %v3089_v1 = vmov 0.0   ;;  %v3001_v3 = vld [vmem:[%s3789_s1 + $0x10] sm:$0xff]   ;;  %vm3090_vm0 = vmmov 0   ;;  %v202_v5 = vlaneseq  ;;  %s3796_s9 = smov (!%p164_p4, %s3079_s9), 1  ;;  %v3003_v6 = vld [vmem:[%s3789_s1 + $0x8] sm:$0xff]  }
   0xd   : > { %2791 = vmatprep.subr.bf16.mxu1 %v3089_v1  ;;  %2779 = vmatprep.subr.bf16.mxu0 %v3089_v1  ;;  %v3000_v2 = vld [vmem:[%s3789_s1 + $0x38] sm:$0xff]   ;;  %v3002_v4 = vld [vmem:[%s3789_s1 + $0x30] sm:$0xff]   ;;  %s2971_s23 = smul.u32 24, %s3796_s9  ;;  %v3004_v7 = vld [vmem:[%s3789_s1 + $0x28] sm:$0xff]   ;;  %v3091_v12 = vmov 1966171168  }
   0xe   : > { %2792 = vmatpush3.bf16.msra.mxu1 %v2999_v0  ;;  %2799 = vmatprep.mubr.msk.bf16.mxu1 %vm3090_vm0, %v3089_v1  ;;  %v203_v8 = vshrl.u32 %v202_v5, 7  ;;  %v3005_v9 = vld [vmem:[%s3789_s1] sm:$0xff]   ;;  %v200_v13 = vunpack.c.l.s4 %v3091_v12  ;;  %vm354_vm1 = vcmask 523264   ;;  %vm2312_vm2 = vcmask 1040384   ;;  %s2696_s25 = sshll.u32 %s3796_s9, 3 }
   0xf   : > { %2780 = vmatpush3.bf16.msra.mxu0 %v3000_v2  ;;  %2793 = vmatprep.subr.bf16.mxu1 %v3089_v1  ;;  %s3159_s28 = scalar_lea.vmem %s3788_s0, %s2971_s23  ;;  %v3006_v10 = vld [vmem:[%s3789_s1 + $0x20] sm:$0xff]   ;;  %s180_s29 = scalar_lea.vmem %s3790_s2, %s2696_s25  ;;  %vm2359_vm3 = vsmask.f32 256 }
  0x10   : > { %2781 = vmatprep.subr.bf16.mxu0 %v3089_v1  ;;  %2787 = vmatprep.mubr.msk.bf16.mxu0 %vm3090_vm0, %v3089_v1  ;;  %v2466_v11 = vld.sshfl [vmem:[%s3159_s28] sm:$0x13 pattern:$0x75316420]  ;;  %v201_v17 = vunpack.c.0.s8 %v200_v13  ;;  %vm2360_vm6 = vmand %vm2312_vm2, %vm2359_vm3 }
  0x11   : > { %v2467_v14 = vld.sshfl [vmem:[%s3159_s28 + $0x4] sm:$0x13 pattern:$0x75316420]  ;;  %v198_v16 = vcombine.high %v2466_v11, %v2466_v11 }
  0x12   : > { %2794 = vmatpush3.bf16.msra.mxu1 %v3001_v3  ;;  %v2468_v15 = vld.sshfl [vmem:[%s3159_s28 + $0x8] sm:$0x13 pattern:$0x75316420]  ;;  %v220_v18 = vcombine.high %v2467_v14, %v2467_v14  ;;  %v3175_v21 = vsub.s32 %v201_v17, %v203_v8  ;;  %v3008_v17 = vld [vmem:[%s3789_s1 + $0x58] sm:$0xff]  }
  0x13   : > { %2782 = vmatpush3.bf16.msra.mxu0 %v3002_v4  ;;  %2795 = vmatprep.subr.bf16.mxu1 %v3089_v1  ;;  %v242_v19 = vcombine.high %v2468_v15, %v2468_v15  ;;  %v3173_v20 = vld.sshfl [vmem:[%s3159_s28 + $0x10] sm:$0x13 pattern:$0x75316420] }
  0x14   : > { %2783 = vmatprep.subr.bf16.mxu0 %v3089_v1  ;;  %v1290_v22 = vcombine.high %v3173_v20, %v3173_v20  ;;  %v205_v23 = vrot.slane %v2466_v11, %v3175_v21  ;;  %v212_v24 = vrot.slane %v198_v16, %v3175_v21  ;;  %v3183_v25 = vrot.slane %v2467_v14, %v3175_v21  ;;  %v2521_v43 = vld.sshfl [vmem:[%s3159_s28 + $0xc] sm:$0x13 pattern:$0x75316420] }
  0x15   : > { %v3186_v26 = vrot.slane %v220_v18, %v3175_v21  ;;  %v3189_v27 = vrot.slane %v2468_v15, %v3175_v21  ;;  %v3192_v28 = vrot.slane %v242_v19, %v3175_v21  ;;  %v774_v62 = vcombine.high %v2521_v43, %v2521_v43 }
  0x16   : > { %2796 = vmatpush3.bf16.msra.mxu1 %v3003_v6  ;;  %v261_v29 = vunpack.i.h.s16 %v3183_v25  ;;  %v2484_v30 = vpack.i.b16 %v3183_v25, %v212_v24  ;;  %v3198_v31 = vrot.slane %v1290_v22, %v3175_v21  ;;  %v258_v34 = vunpack.i.h.s16 %v205_v23 }
  0x17   : > { %2784 = vmatpush3.bf16.msra.mxu0 %v3004_v7  ;;  %2797 = vmatprep.subr.bf16.mxu1 %v3089_v1  ;;  %v264_v32 = vunpack.i.h.s16 %v3189_v27  ;;  %v265_v33 = vunpack.i.l.s16 %v3192_v28  ;;  %v274_v37 = vunpack.i.h.s16 %v212_v24  ;;  %v3206_v38 = vunpack.i.h.s16 %v3192_v28  ;;  %v3007_v7 = vld [vmem:[%s3789_s1 + $0x78] sm:$0xff]  }
  0x18   : > { %2785 = vmatprep.subr.bf16.mxu0 %v3089_v1  ;;  %v3203_v35 = vpack.i.b16 %v3186_v26, %v261_v29  ;;  %v404_v36 = vcombine.low %v205_v23, %v2484_v30  ;;  %v511_v40 = vcombine.high %v205_v23, %v205_v23  ;;  %v2477_v41 = vpack.i.b16 %v212_v24, %v258_v34 }
  0x19   : > { %v426_v39 = vrot.slane %v265_v33, %v3175_v21  ;;  %v3210_v42 = vpack.i.b16 %v3192_v28, %v264_v32  ;;  %v287_v46 = vpack.i.b16 %v261_v29, %v274_v37  ;;  %v275_v47 = vunpack.i.h.s16 %v3186_v26  ;;  %v3009_v29 = vld [vmem:[%s3789_s1 + $0x70] sm:$0xff]  }
  0x1a   : > { %2798 = vmatpush3.bf16.msra.mxu1 %v3005_v9  ;;  %v405_v44 = vcombine.low %v3203_v35, %v3189_v27  ;;  %v412_v45 = vrot.slane %v404_v36, %v3175_v21  ;;  %v313_v49 = vrot.slane %v3206_v38, %v3175_v21  ;;  %v3225_v53 = vcombine.high %v3183_v25, %v3183_v25 }
  0x1b   : > { %2786 = vmatpush3.bf16.msra.mxu0 %v3006_v10  ;;  %2815 = vmatprep.subr.bf16.mxu1 %v3089_v1  ;;  %v292_v48 = vcombine.low %v3186_v26, %v3210_v42  ;;  %v441_v51 = vrot.slane %v426_v39, %v3175_v21  ;;  %v291_v52 = vcombine.low %v2477_v41, %v287_v46  ;;  %v640_v57 = vunpack.i.h.s16 %v511_v40  ;;  %v3010_v39 = vld [vmem:[%s3789_s1 + $0x50] sm:$0xff]  }
  0x1c   : > { %2803 = vmatprep.subr.bf16.mxu0 %v3089_v1  ;;  %v419_v50 = vrot.slane %v405_v44, %v3175_v21  ;;  %v2514_v55 = vpack.i.b16 %v511_v40, %v274_v37  ;;  %v3230_v56 = vcombine.high %v3189_v27, %v3189_v27  ;;  %v2499_v60 = vpack.i.b16 %v3186_v26, %v511_v40 }
  0x1d   : > { %v306_v54 = vrot.slane %v292_v48, %v3175_v21  ;;  %v299_v59 = vrot.slane %v291_v52, %v3175_v21  ;;  %v3235_v61 = vpack.i.b16 %v3225_v53, %v275_v47  ;;  %v328_v63 = vrot.slane %v313_v49, %v3175_v21  ;;  %v3011_v48 = vld [vmem:[%s3789_s1 + $0x68] sm:$0xff]  }
  0x1e   : > { %v427_v58 = vcombine.low %v412_v45, %v419_v50  ;;  %v653_v0 = vpack.i.b16 %v275_v47, %v640_v57  ;;  %v3240_v2 = vpack.i.b16 %v3230_v56, %v3206_v38  ;;  %v531_v5 = vcombine.low %v212_v24, %v2499_v60 }
  0x1f   : > { %v314_v4 = vcombine.low %v299_v59, %v306_v54  ;;  %v532_v6 = vcombine.low %v3235_v61, %v3192_v28  ;;  %v642_v8 = vunpack.i.h.s16 %v3230_v56  ;;  %v516_v11 = vunpack.i.l.s16 %v3230_v56 }
  0x20   : > { %v434_v3 = vrot.slane %v427_v58, %v3175_v21  ;;  %v657_v9 = vcombine.low %v2514_v55, %v653_v0  ;;  %v658_v10 = vcombine.low %v3225_v53, %v3240_v2  ;;  %v539_v14 = vrot.slane %v531_v5, %v3175_v21  ;;  %v3012_v55 = vld [vmem:[%s3789_s1 + $0x48] sm:$0xff]  }
  0x21   : > { %v321_v13 = vrot.slane %v314_v4, %v3175_v21  ;;  %v546_v15 = vrot.slane %v532_v6, %v3175_v21  ;;  %v3256_v16 = vrot.slane %v774_v62, %v3175_v21  ;;  %v924_v22 = vpack.i.b16 %v264_v32, %v275_v47 }
  0x22   : > { %v442_v12 = vcombine.low %v434_v3, %v441_v51  ;;  %v665_v18 = vrot.slane %v657_v9, %v3175_v21  ;;  %v672_v19 = vrot.slane %v658_v10, %v3175_v21  ;;  %v3265_v24 = vrot.slane %v2521_v43, %v3175_v21  ;;  %v3013_v3 = vld [vmem:[%s3789_s1 + $0x60] sm:$0xff]  }
  0x23   : > { %v329_v23 = vcombine.low %v321_v13, %v328_v63  ;;  %v679_v30 = vrot.slane %v642_v8, %v3175_v21  ;;  %v3276_v33 = vunpack.i.h.s16 %v3256_v16  ;;  %v553_v32 = vrot.slane %v516_v11, %v3175_v21 }
  0x24   : > { %2800 = vmatmul.mubr.msk.bf16.vlgmr.msra.gmra.mxu1 %vm354_vm1, %v442_v12  ;;  %v554_v34 = vcombine.low %v539_v14, %v546_v15  ;;  %v790_v36 = vunpack.i.h.s16 %v3265_v24  ;;  %v2530_v37 = vpack.i.b16 %v3189_v27, %v3186_v26  ;;  %v680_v40 = vcombine.low %v665_v18, %v672_v19  ;;  %v3015_v19 = vld [vmem:[%s3789_s1 + $0xb8] sm:$0xff]  }
  0x25   : > { %2816 = vmatpush3.bf16.msra.mxu1 %v3007_v7  ;;  %2823 = vmatprep.mubr.msk.bf16.mxu1 %vm3090_vm0, %v3089_v1  ;;  %v791_v41 = vunpack.i.l.s16 %v3256_v16  ;;  %v806_v43 = vcombine.low %v3210_v42, %v3265_v24  ;;  %v641_v44 = vunpack.i.h.s16 %v3225_v53  ;;  %v927_v45 = vcombine.low %v3203_v35, %v924_v22 }
  0x26   : > { %2788 = vmatmul.mubr.msk.bf16.vlgmr.msra.gmra.mxu0 %vm354_vm1, %v329_v23  ;;  %2817 = vmatprep.subr.bf16.mxu1 %v3089_v1  ;;  %v3296_v46 = vpack.i.b16 %v3256_v16, %v790_v36  ;;  %v805_v47 = vcombine.low %v3183_v25, %v2530_v37  ;;  %v694_v49 = vrot.slane %v679_v30, %v3175_v21  ;;  %v1429_v6 = vunpack.i.h.s16 %v3198_v31 }
  0x27   : > { %2804 = vmatpush3.bf16.msra.mxu0 %v3008_v17  ;;  %2811 = vmatprep.mubr.msk.bf16.mxu0 %vm3090_vm0, %v3089_v1  ;;  %v3305_v50 = vcombine.high %v3265_v24, %v3265_v24  ;;  %v1169_v35 = vpack.i.b16 %v3206_v38, %v641_v44  ;;  %v561_v51 = vrot.slane %v554_v34, %v3175_v21  ;;  %v3016_v34 = vld [vmem:[%s3789_s1 + $0x98] sm:$0xff]   ;;  %v3017_v44 = vld [vmem:[%s3789_s1 + $0xb0] sm:$0xff]  }
  0x28   : > { %2805 = vmatprep.subr.bf16.mxu0 %v3089_v1  ;;  %v568_v52 = vrot.slane %v553_v32, %v3175_v21  ;;  %v928_v25 = vcombine.low %v3192_v28, %v3296_v46  ;;  %v949_v54 = vrot.slane %v3276_v33, %v3175_v21  ;;  %v687_v57 = vrot.slane %v680_v40, %v3175_v21 }
  0x29   : > { %2818 = vmatpush3.bf16.msra.mxu1 %v3009_v29  ;;  %v813_v58 = vrot.slane %v805_v47, %v3175_v21  ;;  %v820_v59 = vrot.slane %v806_v43, %v3175_v21  ;;  %v3322_v60 = vrot.slane %v791_v41, %v3175_v21  ;;  %v935_v62 = vrot.slane %v927_v45, %v3175_v21 }
  0x2a   : > { %2819 = vmatprep.subr.bf16.mxu1 %v3089_v1  ;;  %v942_v63 = vrot.slane %v928_v25, %v3175_v21  ;;  %v2558_v0 = vpack.i.b16 %v3192_v28, %v3225_v53  ;;  %v3334_v4 = vpack.i.b16 %v3305_v50, %v3276_v33  ;;  %v1173_v5 = vcombine.low %v3235_v61, %v1169_v35  ;;  %v3014_v61 = vld [vmem:[%s3789_s1 + $0x40] sm:$0xff]  }
  0x2b   : > { %2806 = vmatpush3.bf16.msra.mxu0 %v3010_v39  ;;  %v3342_v7 = vpack.i.b16 %v3276_v33, %v642_v8  ;;  %v569_v53 = vcombine.low %v561_v51, %v568_v52  ;;  %v3345_v9 = vrot.slane %v949_v54, %v3175_v21  ;;  %v1159_v10 = vunpack.i.h.s16 %v3305_v50  ;;  %v3018_v52 = vld [vmem:[%s3789_s1 + $0x90] sm:$0xff]  }
  0x2c   : > { %2807 = vmatprep.subr.bf16.mxu0 %v3089_v1  ;;  %v695_v11 = vcombine.low %v687_v57, %v694_v49  ;;  %v3351_v12 = vcombine.low %v813_v58, %v820_v59  ;;  %v842_v13 = vrot.slane %v3322_v60, %v3175_v21  ;;  %v3357_v8 = vrot.slane %v3173_v20, %v3175_v21 }
  0x2d   : > { %2820 = vmatpush3.bf16.msra.mxu1 %v3011_v48  ;;  %v950_v14 = vcombine.low %v935_v62, %v942_v63  ;;  %v3361_v15 = vcombine.low %v3186_v26, %v2558_v0  ;;  %v1051_v17 = vcombine.low %v3240_v2, %v3256_v16  ;;  %v1439_v18 = vpack.i.b16 %v790_v36, %v3206_v38  ;;  %v3019_v63 = vld [vmem:[%s3789_s1 + $0xa8] sm:$0xff]  }
  0x2e   : > { %2821 = vmatprep.subr.bf16.mxu1 %v3089_v1  ;;  %v1174_v20 = vcombine.low %v3230_v56, %v3334_v4  ;;  %v3372_v22 = vrot.slane %v1173_v5, %v3175_v21  ;;  %v1306_v23 = vunpack.i.h.s16 %v3357_v8  ;;  %v1464_v26 = vrot.slane %v1429_v6, %v3175_v21 }
  0x2f   : > { %2808 = vmatpush3.bf16.msra.mxu0 %v3012_v55  ;;  %v3378_v29 = vrot.slane %v1159_v10, %v3175_v21  ;;  %v3380_v38 = vpack.i.b16 %v1429_v6, %v1159_v10  ;;  %v1442_v30 = vcombine.low %v3210_v42, %v1439_v18  ;;  %v1307_v32 = vunpack.i.l.s16 %v3198_v31 }
  0x30   : > { %2809 = vmatprep.subr.bf16.mxu0 %v3089_v1  ;;  %v835_v36 = vrot.slane %v3351_v12, %v3175_v21  ;;  %v3390_v37 = vpack.i.b16 %v3198_v31, %v1306_v23  ;;  %v3393_v39 = vrot.slane %v1464_v26, %v3175_v21  ;;  %v2587_v40 = vpack.i.b16 %v3265_v24, %v3192_v28 }
  0x31   : > { %2822 = vmatpush3.bf16.msra.mxu1 %v3013_v3  ;;  %v3400_v42 = vrot.slane %v950_v14, %v3175_v21  ;;  %v1058_v41 = vrot.slane %v3361_v15, %v3175_v21  ;;  %v1321_v43 = vcombine.low %v3296_v46, %v3357_v8  ;;  %v1450_v47 = vrot.slane %v1442_v30, %v3175_v21 }
  0x32   : > { %2839 = vmatprep.subr.bf16.mxu1 %v3089_v1  ;;  %v1443_v45 = vcombine.low %v3256_v16, %v3390_v37  ;;  %v1320_v48 = vcombine.low %v3189_v27, %v2587_v40  ;;  %v1342_v35 = vrot.slane %v1307_v32, %v3175_v21  ;;  %v3421_v51 = vcombine.high %v3357_v8, %v3357_v8 }
  0x33   : > { %2810 = vmatpush3.bf16.msra.mxu0 %v3014_v61  ;;  %v1335_v49 = vrot.slane %v1321_v43, %v3175_v21  ;;  %v1037_v27 = vunpack.i.l.s16 %v3305_v50  ;;  %v1688_v55 = vcombine.low %v3240_v2, %v3342_v7  ;;  %v2615_v7 = vpack.i.b16 %v3256_v16, %v3230_v56  ;;  %v3021_v43 = vld [vmem:[%s3789_s1 + $0xa0] sm:$0xff]  }
  0x34   : > { %2824 = vmatmul.mubr.msk.bf16.vlgmr.msra.gmra.mxu1 %vm354_vm1, %v695_v11  ;;  %2827 = vmatprep.subr.bf16.mxu0 %v3089_v1  ;;  %v1457_v25 = vrot.slane %v1443_v45, %v3175_v21  ;;  %v1328_v54 = vrot.slane %v1320_v48, %v3175_v21  ;;  %v1357_v57 = vrot.slane %v1342_v35, %v3175_v21  ;;  %v1674_v58 = vunpack.i.h.s16 %v3421_v51  ;;  %v3020_v11 = vld [vmem:[%s3789_s1 + $0x88] sm:$0xff]   ;;  %v3022_v35 = vld [vmem:[%s3789_s1 + $0x80] sm:$0xff]  }
  0x35   : > { %2840 = vmatpush3.bf16.msra.mxu1 %v3015_v19  ;;  %2847 = vmatprep.mubr.msk.bf16.mxu1 %vm3090_vm0, %v3089_v1  ;;  %v3437_v59 = vpack.i.b16 %v3421_v51, %v1429_v6  ;;  %v1552_v62 = vunpack.i.l.s16 %v3421_v51  ;;  %v1696_v5 = vrot.slane %v1688_v55, %v3175_v21  ;;  %v1566_v10 = vcombine.low %v3334_v4, %v3198_v31  ;;  %v2635_v55 = vld.sshfl [vmem:[%s3159_s28 + $0x14] sm:$0x13 pattern:$0x75316420] }
  0x36   : > { %2812 = vmatmul.mubr.msk.bf16.vlgmr.msra.gmra.mxu0 %vm354_vm1, %v569_v53  ;;  %2841 = vmatprep.subr.bf16.mxu1 %v3089_v1  ;;  %v1465_v0 = vcombine.low %v1450_v47, %v1457_v25  ;;  %v1343_v3 = vcombine.low %v1328_v54, %v1335_v49  ;;  %v1710_v53 = vrot.slane %v1674_v58, %v3175_v21 }
  0x37   : > { %2828 = vmatpush3.bf16.msra.mxu0 %v3016_v34  ;;  %2835 = vmatprep.mubr.msk.bf16.mxu0 %vm3090_vm0, %v3089_v1  ;;  %v1689_v6 = vcombine.low %v3305_v50, %v3437_v59  ;;  %v1587_v61 = vrot.slane %v1552_v62, %v3175_v21  ;;  %v1565_v19 = vcombine.low %v3192_v28, %v2615_v7 }
  0x38   : > { %2829 = vmatprep.subr.bf16.mxu0 %v3089_v1  ;;  %v3457_v14 = vrot.slane %v1465_v0, %v3175_v21  ;;  %v1350_v18 = vrot.slane %v1343_v3, %v3175_v21  ;;  %v1954_v26 = vpack.i.b16 %v1306_v23, %v3276_v33  ;;  %v1725_v32 = vrot.slane %v1710_v53, %v3175_v21 }
  0x39   : > { %2842 = vmatpush3.bf16.msra.mxu1 %v3017_v44  ;;  %v1703_v30 = vrot.slane %v1689_v6, %v3175_v21  ;;  %v1580_v34 = vrot.slane %v1566_v10, %v3175_v21  ;;  %v1602_v40 = vrot.slane %v1587_v61, %v3175_v21  ;;  %v1573_v33 = vrot.slane %v1565_v19, %v3175_v21  ;;  %v3026_v10 = vld [vmem:[%s3789_s1 + $0xd0] sm:$0xff]  }
  0x3a   : > { %2843 = vmatprep.subr.bf16.mxu1 %v3089_v1  ;;  %v1480_v28 = vcombine.low %v3457_v14, %v3393_v39  ;;  %v3472_v44 = vcombine.low %v1350_v18, %v1357_v57  ;;  %v1957_v23 = vcombine.low %v3296_v46, %v1954_v26  ;;  %v2644_v47 = vpack.i.b16 %v3357_v8, %v3256_v16  ;;  %v3042_v39 = vld [vmem:[%s3789_s1 + $0x150] sm:$0xff]   ;;  %v3043_v14 = vld [vmem:[%s3789_s1 + $0x168] sm:$0xff]  }
  0x3b   : > { %2830 = vmatpush3.bf16.msra.mxu0 %v3018_v52  ;;  %v1711_v45 = vcombine.low %v1696_v5, %v1703_v30  ;;  %v2203_v48 = vcombine.low %v3334_v4, %v3380_v38  ;;  %v2672_v49 = vpack.i.b16 %v3198_v31, %v3305_v50  ;;  %v965_v46 = vcombine.low %v3400_v42, %v3345_v9  ;;  %v3023_v38 = vld [vmem:[%s3789_s1 + $0xf8] sm:$0xff]   ;;  %v3025_v5 = vld [vmem:[%s3789_s1 + $0xf0] sm:$0xff]   ;;  %v3027_v30 = vld [vmem:[%s3789_s1 + $0xe8] sm:$0xff]  }
  0x3c   : > { %2831 = vmatprep.subr.bf16.mxu0 %v3089_v1  ;;  %v1065_v52 = vrot.slane %v1051_v17, %v3175_v21  ;;  %v1588_v8 = vcombine.low %v1573_v33, %v1580_v34  ;;  %v3493_v25 = vrot.slane %v1957_v23, %v3175_v21  ;;  %v1835_v9 = vcombine.low %v3265_v24, %v2644_v47  ;;  %v3024_v4 = vld [vmem:[%s3789_s1 + $0xd8] sm:$0xff]   ;;  %v3028_v47 = vld [vmem:[%s3789_s1 + $0xc8] sm:$0xff]  }
  0x3d   : > { %2844 = vmatpush3.bf16.msra.mxu1 %v3019_v63  ;;  %v1718_v54 = vrot.slane %v1711_v45, %v3175_v21  ;;  %v3503_v42 = vrot.slane %v2203_v48, %v3175_v21  ;;  %v2080_v2 = vcombine.low %v3256_v16, %v2672_v49  ;;  %v1188_v17 = vrot.slane %v1174_v20, %v3175_v21 }
  0x3e   : > { %2845 = vmatprep.subr.bf16.mxu1 %v3089_v1  ;;  %v1595_v57 = vrot.slane %v1588_v8, %v3175_v21  ;;  %v1805_v58 = vcombine.high %v2635_v55, %v2635_v55  ;;  %v1812_v62 = vrot.slane %v2635_v55, %v3175_v21  ;;  %v843_v16 = vcombine.low %v835_v36, %v842_v13 }
  0x3f   : > { %2832 = vmatpush3.bf16.msra.mxu0 %v3020_v11  ;;  %v3519_v24 = vcombine.low %v1718_v54, %v1725_v32  ;;  %v1843_v63 = vrot.slane %v1835_v9, %v3175_v21  ;;  %v2088_v56 = vrot.slane %v2080_v2, %v3175_v21  ;;  %v3534_v12 = vrot.slane %v1037_v27, %v3175_v21  ;;  %v3030_v2 = vld [vmem:[%s3789_s1 + $0xc0] sm:$0xff]  }
  0x40   : > { %2833 = vmatprep.subr.bf16.mxu0 %v3089_v1  ;;  %v3526_v20 = vcombine.low %v1595_v57, %v1602_v40  ;;  %v1819_v0 = vrot.slane %v1805_v58, %v3175_v21  ;;  %v1821_v60 = vunpack.i.h.s16 %v1812_v62  ;;  %v2066_v3 = vcombine.high %v1812_v62, %v1812_v62  ;;  %v3031_v58 = vld [vmem:[%s3789_s1 + $0x138] sm:$0xff]  }
  0x41   : > { %2846 = vmatpush3.bf16.msra.mxu1 %v3021_v43  ;;  %v3539_v13 = vcombine.low %v1058_v41, %v1065_v52  ;;  %v1836_v36 = vcombine.low %v3390_v37, %v1812_v62  ;;  %v1196_v15 = vcombine.low %v3372_v22, %v1188_v17 }
  0x42   : > { %2863 = vmatprep.subr.bf16.mxu1 %v3089_v1  ;;  %v1944_v7 = vunpack.i.h.s16 %v1819_v0  ;;  %v2658_v6 = vpack.i.b16 %v1819_v0, %v1821_v60  ;;  %v1822_v50 = vunpack.i.l.s16 %v1819_v0  ;;  %v2189_v27 = vunpack.i.h.s16 %v2066_v3  ;;  %v3037_v60 = vld [vmem:[%s3789_s1 + $0x120] sm:$0xff]  }
  0x43   : > { %2834 = vmatpush3.bf16.msra.mxu0 %v3022_v35  ;;  %v1850_v37 = vrot.slane %v1836_v36, %v3175_v21  ;;  %v2067_v41 = vunpack.i.l.s16 %v2066_v3  ;;  %v2081_v53 = vcombine.low %v3437_v59, %v1819_v0  ;;  %v1203_v35 = vrot.slane %v1196_v15, %v3175_v21  ;;  %v3036_v0 = vld [vmem:[%s3789_s1 + $0x108] sm:$0xff]   ;;  %v3041_v36 = vld [vmem:[%s3789_s1 + $0x170] sm:$0xff]   ;;  %v3053_v15 = vld [vmem:[%s3789_s1 + $0x1a0] sm:$0xff]  }
  0x44   : > { %2848 = vmatmul.mubr.msk.bf16.vlgmr.msra.gmra.mxu1 %vm354_vm1, %v965_v46  ;;  %2851 = vmatprep.subr.bf16.mxu0 %v3089_v1  ;;  %v1958_v61 = vcombine.low %v3198_v31, %v2658_v6  ;;  %v1979_v11 = vrot.slane %v1944_v7, %v3175_v21  ;;  %v2686_v18 = vpack.i.b16 %v2066_v3, %v1944_v7  ;;  %v3038_v3 = vld [vmem:[%s3789_s1 + $0x100] sm:$0xff]   ;;  %v3047_v7 = vld [vmem:[%s3789_s1 + $0x1b8] sm:$0xff]  }
  0x45   : > { %2864 = vmatpush3.bf16.msra.mxu1 %v3023_v38  ;;  %2871 = vmatprep.mubr.msk.bf16.mxu1 %vm3090_vm0, %v3089_v1  ;;  %v1857_v22 = vrot.slane %v1822_v50, %v3175_v21  ;;  %v1858_v19 = vcombine.low %v1843_v63, %v1850_v37  ;;  %v2225_v59 = vrot.slane %v2189_v27, %v3175_v21  ;;  %v3032_v63 = vld [vmem:[%s3789_s1 + $0x118] sm:$0xff]   ;;  %v3049_v50 = vld [vmem:[%s3789_s1 + $0x1b0] sm:$0xff]   ;;  %v3051_v27 = vld [vmem:[%s3789_s1 + $0x1a8] sm:$0xff]  }
  0x46   : > { %2836 = vmatmul.mubr.msk.bf16.vlgmr.msra.gmra.mxu0 %vm354_vm1, %v843_v16  ;;  %2865 = vmatprep.subr.bf16.mxu1 %v3089_v1  ;;  %v2095_v26 = vrot.slane %v2081_v53, %v3175_v21  ;;  %v1972_v32 = vrot.slane %v1958_v61, %v3175_v21  ;;  %v1994_v31 = vrot.slane %v1979_v11, %v3175_v21  ;;  %v3048_v6 = vld [vmem:[%s3789_s1 + $0x198] sm:$0xff]   ;;  %v3054_v37 = vld [vmem:[%s3789_s1 + $0x180] sm:$0xff]   ;;  %v3058_v61 = vld [vmem:[%s3789_s1 + $0x1d0] sm:$0xff]  }
  0x47   : > { %2852 = vmatpush3.bf16.msra.mxu0 %v3024_v4  ;;  %2859 = vmatprep.mubr.msk.bf16.mxu0 %vm3090_vm0, %v3089_v1  ;;  %v2204_v34 = vcombine.low %v3421_v51, %v2686_v18  ;;  %v2102_v40 = vrot.slane %v2067_v41, %v3175_v21  ;;  %v1865_v43 = vrot.slane %v1858_v19, %v3175_v21  ;;  %v3035_v4 = vld [vmem:[%s3789_s1 + $0x128] sm:$0xff]   ;;  %v3055_v41 = vld [vmem:[%s3789_s1 + $0x1f8] sm:$0xff]   ;;  %v3062_v19 = vld [vmem:[%s3789_s1 + $0x1c0] sm:$0xff]  }
  0x48   : > { %2853 = vmatprep.subr.bf16.mxu0 %v3089_v1  ;;  %v1872_v33 = vrot.slane %v1857_v22, %v3175_v21  ;;  %v2240_v23 = vrot.slane %v2225_v59, %v3175_v21  ;;  %v2103_v45 = vcombine.low %v2088_v56, %v2095_v26  ;;  %v1980_v48 = vcombine.low %v3493_v25, %v1972_v32  ;;  %v3029_v25 = vld [vmem:[%s3789_s1 + $0xe0] sm:$0xff]   ;;  %v3034_v56 = vld [vmem:[%s3789_s1 + $0x110] sm:$0xff]   ;;  %v3056_v53 = vld [vmem:[%s3789_s1 + $0x1d8] sm:$0xff]  }
  0x49   : > { %2866 = vmatpush3.bf16.msra.mxu1 %v3025_v5  ;;  %v2218_v51 = vrot.slane %v2204_v34, %v3175_v21  ;;  %v2117_v49 = vrot.slane %v2102_v40, %v3175_v21  ;;  %v1210_v46 = vrot.slane %v3378_v29, %v3175_v21  ;;  %v1080_v55 = vrot.slane %v3539_v13, %v3175_v21  ;;  %v3040_v13 = vld [vmem:[%s3789_s1 + $0x158] sm:$0xff]   ;;  %v3046_v5 = vld [vmem:[%s3789_s1 + $0x140] sm:$0xff]   ;;  %v3059_v11 = vld [vmem:[%s3789_s1 + $0x1e8] sm:$0xff]  }
  0x4a   : > { %2867 = vmatprep.subr.bf16.mxu1 %v3089_v1  ;;  %v3584_v52 = vcombine.low %v1865_v43, %v1872_v33  ;;  %v2110_v8 = vrot.slane %v2103_v45, %v3175_v21  ;;  %v1987_v38 = vrot.slane %v1980_v48, %v3175_v21  ;;  %v1087_v29 = vrot.slane %v3534_v12, %v3175_v21  ;;  %v3039_v12 = vld [vmem:[%s3789_s1 + $0x178] sm:$0xff]   ;;  %v3060_v18 = vld [vmem:[%s3789_s1 + $0x1c8] sm:$0xff]   ;;  %v3061_v22 = vld [vmem:[%s3789_s1 + $0x1e0] sm:$0xff]  }
  0x4b   : > { %2854 = vmatpush3.bf16.msra.mxu0 %v3026_v10  ;;  %v2226_v54 = vcombine.low %v3503_v42, %v2218_v51  ;;  %v1211_v42 = vcombine.low %v1203_v35, %v1210_v46  ;;  %v3057_v10 = vld [vmem:[%s3789_s1 + $0x1f0] sm:$0xff]  }
  0x4c   : > { %2855 = vmatprep.subr.bf16.mxu0 %v3089_v1  ;;  %v3597_v9 = vcombine.low %v2110_v8, %v2117_v49  ;;  %v3602_v17 = vcombine.low %v1987_v38, %v1994_v31  ;;  %v1088_v16 = vcombine.low %v1080_v55, %v1087_v29 }
  0x4d   : > { %2868 = vmatpush3.bf16.msra.mxu1 %v3027_v30  ;;  %v2233_v57 = vrot.slane %v2226_v54, %v3175_v21  ;;  %v3033_v21 = vld [vmem:[%s3789_s1 + $0x130] sm:$0xff]  }
  0x4e   : > { %2869 = vmatprep.subr.bf16.mxu1 %v3089_v1 }
  0x4f   : > { %2856 = vmatpush3.bf16.msra.mxu0 %v3028_v47  ;;  %v3609_v62 = vcombine.low %v2233_v57, %v2240_v23 }
  0x50   : > { %2857 = vmatprep.subr.bf16.mxu0 %v3089_v1 }
  0x51   : > { %2870 = vmatpush3.bf16.msra.mxu1 %v3029_v25 }
  0x52   : > { %2887 = vmatprep.subr.bf16.mxu1 %v3089_v1 }
  0x53   : > { %2858 = vmatpush3.bf16.msra.mxu0 %v3030_v2 }
  0x54   : > { %2872 = vmatmul.mubr.msk.bf16.vlgmr.msra.gmra.mxu1 %vm354_vm1, %v1211_v42  ;;  %2875 = vmatprep.subr.bf16.mxu0 %v3089_v1 }
  0x55   : > { %2888 = vmatpush3.bf16.msra.mxu1 %v3031_v58  ;;  %2895 = vmatprep.mubr.msk.bf16.mxu1 %vm3090_vm0, %v3089_v1 }
  0x56   : > { %2860 = vmatmul.mubr.msk.bf16.vlgmr.msra.gmra.mxu0 %vm354_vm1, %v1088_v16  ;;  %2889 = vmatprep.subr.bf16.mxu1 %v3089_v1 }
  0x57   : > { %2876 = vmatpush3.bf16.msra.mxu0 %v3032_v63  ;;  %2883 = vmatprep.mubr.msk.bf16.mxu0 %vm3090_vm0, %v3089_v1 }
  0x58   : > { %2877 = vmatprep.subr.bf16.mxu0 %v3089_v1 }
  0x59   : > { %2890 = vmatpush3.bf16.msra.mxu1 %v3033_v21 }
  0x5a   : > { %2891 = vmatprep.subr.bf16.mxu1 %v3089_v1 }
  0x5b   : > { %2878 = vmatpush3.bf16.msra.mxu0 %v3034_v56 }
  0x5c   : > { %2879 = vmatprep.subr.bf16.mxu0 %v3089_v1 }
  0x5d   : > { %2892 = vmatpush3.bf16.msra.mxu1 %v3035_v4 }
  0x5e   : > { %2893 = vmatprep.subr.bf16.mxu1 %v3089_v1 }
  0x5f   : > { %2880 = vmatpush3.bf16.msra.mxu0 %v3036_v0 }
  0x60   : > { %2881 = vmatprep.subr.bf16.mxu0 %v3089_v1 }
  0x61   : > { %2894 = vmatpush3.bf16.msra.mxu1 %v3037_v60 }
  0x62   : > { %2911 = vmatprep.subr.bf16.mxu1 %v3089_v1 }
  0x63   : > { %2882 = vmatpush3.bf16.msra.mxu0 %v3038_v3 }
  0x64   : > { %2896 = vmatmul.mubr.msk.bf16.vlgmr.msra.gmra.mxu1 %vm354_vm1, %v1480_v28  ;;  %2899 = vmatprep.subr.bf16.mxu0 %v3089_v1  ;;  %v3044_v28 = vld [vmem:[%s3789_s1 + $0x148] sm:$0xff]  }
  0x65   : > { %2912 = vmatpush3.bf16.msra.mxu1 %v3039_v12  ;;  %2919 = vmatprep.mubr.msk.bf16.mxu1 %vm3090_vm0, %v3089_v1 }
  0x66   : > { %2884 = vmatmul.mubr.msk.bf16.vlgmr.msra.gmra.mxu0 %vm354_vm1, %v3472_v44  ;;  %2913 = vmatprep.subr.bf16.mxu1 %v3089_v1  ;;  %v3045_v44 = vld [vmem:[%s3789_s1 + $0x160] sm:$0xff]  }
  0x67   : > { %2900 = vmatpush3.bf16.msra.mxu0 %v3040_v13  ;;  %2907 = vmatprep.mubr.msk.bf16.mxu0 %vm3090_vm0, %v3089_v1 }
  0x68   : > { %2901 = vmatprep.subr.bf16.mxu0 %v3089_v1 }
  0x69   : > { %2914 = vmatpush3.bf16.msra.mxu1 %v3041_v36 }
  0x6a   : > { %2915 = vmatprep.subr.bf16.mxu1 %v3089_v1 }
  0x6b   : > { %2902 = vmatpush3.bf16.msra.mxu0 %v3042_v39 }
  0x6c   : > { %2903 = vmatprep.subr.bf16.mxu0 %v3089_v1 }
  0x6d   : > { %2916 = vmatpush3.bf16.msra.mxu1 %v3043_v14 }
  0x6e   : > { %2917 = vmatprep.subr.bf16.mxu1 %v3089_v1 }
  0x6f   : > { %2904 = vmatpush3.bf16.msra.mxu0 %v3044_v28 }
  0x70   : > { %2905 = vmatprep.subr.bf16.mxu0 %v3089_v1 }
  0x71   : > { %2918 = vmatpush3.bf16.msra.mxu1 %v3045_v44 }
  0x72   : > { %2935 = vmatprep.subr.bf16.mxu1 %v3089_v1 }
  0x73   : > { %2906 = vmatpush3.bf16.msra.mxu0 %v3046_v5 }
  0x74   : > { %2920 = vmatmul.mubr.msk.bf16.vlgmr.msra.gmra.mxu1 %vm354_vm1, %v3519_v24  ;;  %2923 = vmatprep.subr.bf16.mxu0 %v3089_v1  ;;  %v3050_v24 = vld [vmem:[%s3789_s1 + $0x190] sm:$0xff]  }
  0x75   : > { %2936 = vmatpush3.bf16.msra.mxu1 %v3047_v7  ;;  %2943 = vmatprep.mubr.msk.bf16.mxu1 %vm3090_vm0, %v3089_v1 }
  0x76   : > { %2908 = vmatmul.mubr.msk.bf16.vlgmr.msra.gmra.mxu0 %vm354_vm1, %v3526_v20  ;;  %2937 = vmatprep.subr.bf16.mxu1 %v3089_v1  ;;  %v3052_v20 = vld [vmem:[%s3789_s1 + $0x188] sm:$0xff]  }
  0x77   : > { %2924 = vmatpush3.bf16.msra.mxu0 %v3048_v6  ;;  %2931 = vmatprep.mubr.msk.bf16.mxu0 %vm3090_vm0, %v3089_v1 }
  0x78   : > { %2925 = vmatprep.subr.bf16.mxu0 %v3089_v1 }
  0x79   : > { %2938 = vmatpush3.bf16.msra.mxu1 %v3049_v50 }
  0x7a   : > { %2939 = vmatprep.subr.bf16.mxu1 %v3089_v1 }
  0x7b   : > { %2926 = vmatpush3.bf16.msra.mxu0 %v3050_v24 }
  0x7c   : > { %2927 = vmatprep.subr.bf16.mxu0 %v3089_v1 }
  0x7d   : > { %2940 = vmatpush3.bf16.msra.mxu1 %v3051_v27 }
  0x7e   : > { %2941 = vmatprep.subr.bf16.mxu1 %v3089_v1 }
  0x7f   : > { %2928 = vmatpush3.bf16.msra.mxu0 %v3052_v20 }
  0x80   : > { %2929 = vmatprep.subr.bf16.mxu0 %v3089_v1 }
  0x81   : > { %2942 = vmatpush3.bf16.msra.mxu1 %v3053_v15 }
  0x82   : > { %2959 = vmatprep.subr.bf16.mxu1 %v3089_v1 }
  0x83   : > { %2930 = vmatpush3.bf16.msra.mxu0 %v3054_v37 }
  0x84   : > { %2944 = vmatmul.mubr.msk.bf16.vlgmr.msra.gmra.mxu1 %vm354_vm1, %v3602_v17  ;;  %2947 = vmatprep.subr.bf16.mxu0 %v3089_v1 }
  0x85   : > { %2960 = vmatpush3.bf16.msra.mxu1 %v3055_v41  ;;  %2967 = vmatprep.mubr.msk.bf16.mxu1 %vm3090_vm0, %v3089_v1 }
  0x86   : > { %2932 = vmatmul.mubr.msk.bf16.vlgmr.msra.gmra.mxu0 %vm354_vm1, %v3584_v52  ;;  %2961 = vmatprep.subr.bf16.mxu1 %v3089_v1 }
  0x87   : > { %2948 = vmatpush3.bf16.msra.mxu0 %v3056_v53  ;;  %2955 = vmatprep.mubr.msk.bf16.mxu0 %vm3090_vm0, %v3089_v1 }
  0x88   : > { %2949 = vmatprep.subr.bf16.mxu0 %v3089_v1 }
  0x89   : > { %2962 = vmatpush3.bf16.msra.mxu1 %v3057_v10 }
  0x8a   : > { %2963 = vmatprep.subr.bf16.mxu1 %v3089_v1 }
  0x8b   : > { %2950 = vmatpush3.bf16.msra.mxu0 %v3058_v61 }
  0x8c   : > { %2951 = vmatprep.subr.bf16.mxu0 %v3089_v1 }
  0x8d   : > { %2964 = vmatpush3.bf16.msra.mxu1 %v3059_v11 }
  0x8e   : > { %2965 = vmatprep.subr.bf16.mxu1 %v3089_v1 }
  0x8f   : > { %2952 = vmatpush3.bf16.msra.mxu0 %v3060_v18 }
  0x90   : > { %2953 = vmatprep.subr.bf16.mxu0 %v3089_v1 }
  0x91   : > { %2966 = vmatpush3.bf16.msra.mxu1 %v3061_v22 }
  0x93   : > { %2954 = vmatpush3.bf16.msra.mxu0 %v3062_v19 }
  0x94   : > { %2968 = vmatmul.mubr.msk.bf16.vlgmr.msra.gmra.mxu1 %vm354_vm1, %v3609_v62 }
  0x96   : > { %2956 = vmatmul.mubr.msk.bf16.vlgmr.msra.gmra.mxu0 %vm354_vm1, %v3597_v9 }
  0xe4   : > { %v504_v59 = vpop.f32.mrf.mxu1 }
  0xe6   : > { %v392_v26 = vpop.f32.mrf.mxu0  ;;  %v2801_v30 = vpop.f32.mrf.mxu1 }
  0xe7   : > { %v505_v32 = vadd.f32 %v504_v59, %v392_v26 }
  0xe8   : > { %v2789_v31 = vpop.f32.mrf.mxu0  ;;  %v507_v34 = vpop.f32.mrf.mxu1 }
  0xea   : > { %v395_v40 = vpop.f32.mrf.mxu0  ;;  %v2802_v43 = vpop.f32.mrf.mxu1 }
  0xeb   : > { %v508_v33 = vadd.f32 %v507_v34, %v395_v40 }
  0xec   : > { %v2790_v23 = vpop.f32.mrf.mxu0 }
  0xf4   : > { %v757_v45 = vpop.f32.mrf.mxu1 }
  0xf6   : > { %v631_v1 = vpop.f32.mrf.mxu0  ;;  %v2825_v47 = vpop.f32.mrf.mxu1 }
  0xf7   : > { %v638_v48 = vadd.f32 %v631_v1, %v505_v32 }
  0xf8   : > { %v2813_v51 = vpop.f32.mrf.mxu0  ;;  %v760_v49 = vpop.f32.mrf.mxu1 }
  0xf9   : > { %v764_v35 = vadd.f32 %v757_v45, %v638_v48 }
  0xfa   : > { %v634_v46 = vpop.f32.mrf.mxu0  ;;  %v2826_v52 = vpop.f32.mrf.mxu1 }
  0xfb   : > { %v639_v8 = vadd.f32 %v634_v46, %v508_v33 }
  0xfc   : > { %v2814_v25 = vpop.f32.mrf.mxu0 }
  0xfd   : > { %v765_v38 = vadd.f32 %v760_v49, %v639_v8 }
 0x104   : > { %v1027_v54 = vpop.f32.mrf.mxu1 }
 0x106   : > { %v905_v55 = vpop.f32.mrf.mxu0  ;;  %v2849_v29 = vpop.f32.mrf.mxu1 }
 0x107   : > { %v912_v9 = vadd.f32 %v905_v55, %v764_v35 }
 0x108   : > { %v2837_v2 = vpop.f32.mrf.mxu0  ;;  %v1030_v17 = vpop.f32.mrf.mxu1 }
 0x109   : > { %v1034_v57 = vadd.f32 %v1027_v54, %v912_v9 }
 0x10a   : > { %v908_v42 = vpop.f32.mrf.mxu0  ;;  %v2850_v58 = vpop.f32.mrf.mxu1 }
 0x10b   : > { %v913_v62 = vadd.f32 %v908_v42, %v765_v38 }
 0x10c   : > { %v2838_v16 = vpop.f32.mrf.mxu0 }
 0x10d   : > { %v1035_v63 = vadd.f32 %v1030_v17, %v913_v62 }
 0x114   : > { %v1273_v21 = vpop.f32.mrf.mxu1 }
 0x116   : > { %v1150_v56 = vpop.f32.mrf.mxu0  ;;  %v2873_v4 = vpop.f32.mrf.mxu1 }
 0x117   : > { %v1157_v10 = vadd.f32 %v1150_v56, %v1034_v57 }
 0x118   : > { %v2861_v0 = vpop.f32.mrf.mxu0  ;;  %v1276_v60 = vpop.f32.mrf.mxu1 }
 0x119   : > { %v1280_v11 = vadd.f32 %v1273_v21, %v1157_v10 }
 0x11a   : > { %v1153_v3 = vpop.f32.mrf.mxu0  ;;  %v2874_v12 = vpop.f32.mrf.mxu1 }
 0x11b   : > { %v1158_v61 = vadd.f32 %v1153_v3, %v1035_v63 }
 0x11c   : > { %v2862_v13 = vpop.f32.mrf.mxu0 }
 0x11d   : > { %v1281_v26 = vadd.f32 %v1276_v60, %v1158_v61 }
 0x124   : > { %v1542_v36 = vpop.f32.mrf.mxu1 }
 0x126   : > { %v1420_v39 = vpop.f32.mrf.mxu0  ;;  %v2897_v14 = vpop.f32.mrf.mxu1 }
 0x127   : > { %v1427_v22 = vadd.f32 %v1420_v39, %v1280_v11 }
 0x128   : > { %v2885_v28 = vpop.f32.mrf.mxu0  ;;  %v1545_v44 = vpop.f32.mrf.mxu1 }
 0x129   : > { %v1549_v34 = vadd.f32 %v1542_v36, %v1427_v22 }
 0x12a   : > { %v1423_v5 = vpop.f32.mrf.mxu0  ;;  %v2898_v7 = vpop.f32.mrf.mxu1 }
 0x12b   : > { %v1428_v31 = vadd.f32 %v1423_v5, %v1281_v26 }
 0x12c   : > { %v2886_v6 = vpop.f32.mrf.mxu0 }
 0x12d   : > { %v1550_v45 = vadd.f32 %v1545_v44, %v1428_v31 }
 0x134   : > { %v1788_v50 = vpop.f32.mrf.mxu1 }
 0x136   : > { %v1665_v24 = vpop.f32.mrf.mxu0  ;;  %v2921_v27 = vpop.f32.mrf.mxu1 }
 0x137   : > { %v1672_v33 = vadd.f32 %v1665_v24, %v1549_v34 }
 0x138   : > { %v2909_v20 = vpop.f32.mrf.mxu0  ;;  %v1791_v15 = vpop.f32.mrf.mxu1 }
 0x139   : > { %v1795_v47 = vadd.f32 %v1788_v50, %v1672_v33 }
 0x13a   : > { %v1668_v37 = vpop.f32.mrf.mxu0  ;;  %v2922_v41 = vpop.f32.mrf.mxu1 }
 0x13b   : > { %v1673_v1 = vadd.f32 %v1668_v37, %v1550_v45 }
 0x13c   : > { %v2910_v53 = vpop.f32.mrf.mxu0 }
 0x13d   : > { %v1796_v51 = vadd.f32 %v1791_v15, %v1673_v1 }
 0x144   : > { %v2057_v18 = vpop.f32.mrf.mxu1 }
 0x146   : > { %v1935_v19 = vpop.f32.mrf.mxu0  ;;  %v2945_v59 = vpop.f32.mrf.mxu1 }
 0x147   : > { %v1942_v48 = vadd.f32 %v1935_v19, %v1795_v47  ;;  %v2361_v19 = vld [vmem:[%s180_s29 + $0x4] sm:$0x1] }
 0x148   : > { %v2933_v30 = vpop.f32.mrf.mxu0  ;;  %v2060_v32 = vpop.f32.mrf.mxu1 }
 0x149   : > { %v2064_v46 = vadd.f32 %v2057_v18, %v1942_v48 }
 0x14a   : > { %v1938_v40 = vpop.f32.mrf.mxu0  ;;  %v2946_v43 = vpop.f32.mrf.mxu1 }
 0x14b   : > { %v1943_v35 = vadd.f32 %v1938_v40, %v1796_v51 }
 0x14c   : > { %v2934_v23 = vpop.f32.mrf.mxu0 }
 0x14d   : > { %v2065_v55 = vadd.f32 %v2060_v32, %v1943_v35 }
 0x154   : > { %v2303_v49 = vpop.f32.mrf.mxu1 }
 0x156   : > { %v2180_v52 = vpop.f32.mrf.mxu0  ;;  %v2969_v8 = vpop.f32.mrf.mxu1 }
 0x157   : > { %v2187_v25 = vadd.f32 %v2180_v52, %v2064_v46 }
 0x158   : > { %v2957_v38 = vpop.f32.mrf.mxu0  ;;  %v2306_v54 = vpop.f32.mrf.mxu1 }
 0x159   : > { %v2310_v17 = vadd.f32 %v2303_v49, %v2187_v25 }
 0x15a   : > { %v2183_v29 = vpop.f32.mrf.mxu0  ;;  %v2970_v9 = vpop.f32.mrf.mxu1 }
 0x15b   : > { %v2188_v2 = vadd.f32 %v2183_v29, %v2065_v55  ;;  %v2323_v16 = vmul.f32 %v2310_v17, %v2310_v17 }
 0x15c   : > { %v2958_v57 = vpop.f32.mrf.mxu0 }
 0x15d   : > { %v2311_v42 = vadd.f32 %v2306_v54, %v2188_v2 }
 0x15f   : > { %v2313_v58 = vsel %vm2312_vm2, %v2311_v42, 0.0  ;;  %v2324_v62 = vmul.f32 %v2311_v42, %v2311_v42 }
 0x160   : > { %v2314_v63 = vadd.f32 %v2313_v58, %v2310_v17 }
 0x161   : > { %v2325_v21 = vsel %vm2312_vm2, %v2324_v62, 0.0 }
 0x162   : > { %v2315_v56 = vrot.slane %v2314_v63, 4  ;;  %v2326_v4 = vadd.f32 %v2325_v21, %v2323_v16 }
 0x164   : > { %v2316_v0 = vadd.f32 %v2315_v56, %v2314_v63  ;;  %v2327_v60 = vrot.slane %v2326_v4, 4 }
 0x166   : > { %v2317_v3 = vrot.slane %v2316_v0, 2  ;;  %v2328_v12 = vadd.f32 %v2327_v60, %v2326_v4 }
 0x168   : > { %v2318_v13 = vadd.f32 %v2317_v3, %v2316_v0  ;;  %v2329_v36 = vrot.slane %v2328_v12, 2 }
 0x16a   : > { %v2319_v39 = vrot.slane %v2318_v13, 1  ;;  %v2330_v14 = vadd.f32 %v2329_v36, %v2328_v12 }
 0x16c   : > { %v2320_v28 = vadd.f32 %v2319_v39, %v2318_v13  ;;  %v2331_v44 = vrot.slane %v2330_v14, 1 }
 0x16e   : > { %v2322_v5 = vmul.f32 0.11111111, %v2320_v28  ;;  %v2332_v7 = vadd.f32 %v2331_v44, %v2330_v14 }
 0x170   : > { %v2333_v6 = vmul.f32 0.11111111, %v2332_v7  ;;  %v2334_v50 = vmul.f32 %v2322_v5, %v2322_v5 }
 0x172   : > { %v2335_v24 = vsub.f32 %v2333_v6, %v2334_v50 }
 0x174   : > { %v2336_v27 = vadd.f32 1e-05, %v2335_v24 }
 0x176   : > { %3063 = vrsqrt.f32 %v2336_v27 }
 0x183   : > { %v3064_v20 = vpop.eup %3063 }
 0x184   : > { %v2338_v15 = vmul.f32 %v3064_v20, %v2310_v17  ;;  %v2339_v37 = vmul.f32 %v3064_v20, %v2311_v42  ;;  %v2340_v41 = vmul.f32 %v3064_v20, %v2322_v5 }
 0x186   : > { %v2341_v53 = vsub.f32 %v2338_v15, %v2340_v41  ;;  %v2342_v10 = vsub.f32 %v2339_v37, %v2340_v41 }
 0x188   : > { %vm2343_vm4 = vcmp.ge.f32.partialorder %v2341_v53, 0.0  ;;  %vm2344_vm5 = vcmp.ge.f32.partialorder %v2342_v10, 0.0  ;;  %v2345_v61 = vmul.f32 0.2, %v2341_v53  ;;  %v2346_v11 = vmul.f32 0.2, %v2342_v10 }
 0x18a   : > { %v2347_v18 = vsel %vm2343_vm4, %v2341_v53, %v2345_v61  ;;  %v2348_v22 = vsel %vm2344_vm5, %v2342_v10, %v2346_v11 }
 0x18b   : > { %v2697_v59 = vpack.c.bf16 %v2347_v18, %v2347_v18  ;;  %v2698_v26 = vpack.c.bf16 %v2348_v22, %v2348_v22 }
 0x18d   : > { %2357 = vst [vmem:[%s180_s29] sm:$0xf] %v2697_v59  ;;  %v2362_v30 = vsel %vm2360_vm6, %v2698_v26, %v2361_v19 }
 0x18e   : > { %2363 = vst [vmem:[%s180_s29 + $0x4] sm:$0x1] %v2362_v30 }
 0x18f PF: > { %s12_s11 = sadd.s32 1, %s3087_s11   ;;  %s3791_s9 = smov %s3083_s10 }
 0x190   : > { %p9_p5 = scmp.ge.s32.totalorder %s12_s11, 4   ;;  %s3792_s10 = smov %s3794_s12 }
 0x192   :  { %11 = sbr.rel (!%p9_p5) target bundleno = 2 (0x2), region = 76 }

// kernel: _lambda_.9
= control target key start
LH: loop header
LB: loop body
LE: loop exit
PB: predicated region body
PF: predicated region fallthrough
CT: control target
= control target key end

     0   :  { %s3565_s12 = smov 0   ;;  %s3567_s13 = smov 0   ;;  %s4316_s0 = inlined_call_operand.vmem [shape: bf16[2,5,5,128], index: 0, kind: input, shape index: {}]   ;;  %s4317_s1 = inlined_call_operand.vmem [shape: bf16[16,128,8], index: 1, kind: input, shape index: {}]   ;;  %s4318_s2 = inlined_call_operand.vmem [shape: f32[1,8], index: 2, kind: input, shape index: {}]   ;;  %s4319_s3 = inlined_call_operand.vmem [shape: f32[2,4,8], index: 3, kind: output, shape index: {}]  }
   0x1   :  { %s3569_s14 = smov 0  }
   0x2 LB: > { %s25_s15 = sadd.s32 1, %s3536_s13  ;;  %p2510_p0 = scmp.ge.s32.totalorder %s3540_s14, 1  ;;  %s3540_s14 = sphi %s3569_s14, %s13_s14   ;;  %s3536_s13 = sphi %s3567_s13, %s4323_s13   ;;  %s3532_s12 = sphi %s3565_s12, %s4322_s12  }
   0x3   : > { %p27_p1 = scmp.ge.s32.totalorder %s25_s15, 2  ;;  %p168_p2 = scmp.lt.s32.totalorder %s3540_s14, 3 }
   0x5   : > { %s4325_s15 = smov (%p27_p1, %s25_s15), 0  ;;  %p169_p3 = pnand %p2510_p0, %p168_p2 }
   0x6   : > { %p201_p4 = scmp.lt.s32.totalorder (!%p169_p3), %s3532_s12, 1 }
   0x7   : > { %172 = sbr.rel (%p169_p3) target bundleno = 469 (0x1d5), region = 32 }
   0xc   : > { %v3386_v0 = vld [vmem:[%s4317_s1 + $0x78] sm:$0xff]   ;;  %v3542_v1 = vmov 0.0   ;;  %v3388_v3 = vld [vmem:[%s4317_s1 + $0x70] sm:$0xff]   ;;  %vm3543_vm0 = vmmov 0   ;;  %v3390_v5 = vld [vmem:[%s4317_s1 + $0x68] sm:$0xff]   ;;  %s4327_s12 = smov (!%p201_p4, %s3532_s12), 1  ;;  %v247_v9 = vlaneseq }
   0xd   : > { %3038 = vmatprep.subr.bf16.mxu0 %v3542_v1  ;;  %3058 = vmatprep.subr.bf16.mxu1 %v3542_v1  ;;  %v3387_v2 = vld [vmem:[%s4317_s1 + $0x38] sm:$0xff]   ;;  %v3389_v4 = vld [vmem:[%s4317_s1 + $0x30] sm:$0xff]   ;;  %v3391_v6 = vld [vmem:[%s4317_s1 + $0x28] sm:$0xff]   ;;  %s3358_s5 = smul.u32 20, %s4327_s12  ;;  %vm288_vm1 = vsmask.f32 256 }
   0xe   : > { %3039 = vmatpush3.bf16.msra.mxu0 %v3386_v0  ;;  %3054 = vmatprep.mubr.msk.bf16.mxu0 %vm3543_vm0, %v3542_v1  ;;  %v3392_v7 = vld [vmem:[%s4317_s1 + $0x60] sm:$0xff]   ;;  %v3394_v10 = vld [vmem:[%s4317_s1 + $0x58] sm:$0xff]   ;;  %v3396_v12 = vld [vmem:[%s4317_s1 + $0x50] sm:$0xff]   ;;  %v248_v13 = vshrl.u32 %v247_v9, 7  ;;  %vm289_vm2 = vsmask.f32 1284 }
   0xf   : > { %3059 = vmatpush3.bf16.msra.mxu1 %v3387_v2  ;;  %3040 = vmatprep.subr.bf16.mxu0 %v3542_v1  ;;  %v3393_v8 = vld [vmem:[%s4317_s1 + $0x20] sm:$0xff]   ;;  %v3395_v11 = vld [vmem:[%s4317_s1 + $0x18] sm:$0xff]   ;;  %s3640_s18 = scalar_lea.vmem %s4316_s0, %s3358_s5  ;;  %v3397_v14 = vld [vmem:[%s4317_s1 + $0x10] sm:$0xff]   ;;  %v3544_v15 = vmov 1966171168   ;;  %s2512_s30 = sshll.u32 %s4327_s12, 2 }
  0x10   : > { %3060 = vmatprep.subr.bf16.mxu1 %v3542_v1  ;;  %3074 = vmatprep.mubr.msk.bf16.mxu1 %vm3543_vm0, %v3542_v1  ;;  %v245_v16 = vunpack.c.l.s4 %v3544_v15  ;;  %vm290_vm3 = vmor %vm288_vm1, %vm289_vm2  ;;  %vm291_vm4 = vsmask.f32 2312  ;;  %vm293_vm5 = vsmask.f32 3340  ;;  %vm295_vm6 = vsmask.f32 4368  ;;  %s219_s8 = scalar_lea.vmem %s4319_s3, %s2512_s30 }
  0x11   : > { %v221_v17 = vld [vmem:[%s3640_s18] sm:$0x7]  ;;  %v3648_v18 = vld [vmem:[%s3640_s18 + $0x4] sm:$0x7]  ;;  %vm292_vm7 = vmor %vm290_vm3, %vm291_vm4  ;;  %vm297_vm9 = vsmask.f32 5396 }
  0x12   : > { %3041 = vmatpush3.bf16.msra.mxu0 %v3388_v3  ;;  %v246_v19 = vunpack.c.0.s8 %v245_v16  ;;  %vm294_vm8 = vmor %vm292_vm7, %vm293_vm5  ;;  %v442_v20 = vcombine.low %v221_v17, %v3648_v18  ;;  %v3398_v21 = vld [vmem:[%s4317_s1 + $0x48] sm:$0xff]   ;;  %vm299_vm12 = vsmask.f32 6424  ;;  %v3400_v24 = vld [vmem:[%s4317_s1 + $0x40] sm:$0xff]   ;;  %vm301_vm13 = vsmask.f32 7452 }
  0x13   : > { %3061 = vmatpush3.bf16.msra.mxu1 %v3389_v4  ;;  %3042 = vmatprep.subr.bf16.mxu0 %v3542_v1  ;;  %vm296_vm10 = vmor %vm294_vm8, %vm295_vm6  ;;  %v3399_v22 = vld [vmem:[%s4317_s1 + $0x8] sm:$0xff]   ;;  %v3401_v32 = vld [vmem:[%s4317_s1] sm:$0xff]  }
  0x14   : > { %3062 = vmatprep.subr.bf16.mxu1 %v3542_v1  ;;  %v3658_v23 = vsub.s32 %v246_v19, %v248_v13  ;;  %vm298_vm11 = vmor %vm296_vm10, %vm297_vm9  ;;  %v3404_v41 = vld [vmem:[%s4317_s1 + $0xf8] sm:$0xff]   ;;  %v3406_v46 = vld [vmem:[%s4317_s1 + $0xf0] sm:$0xff]  }
  0x15   : > { %vm300_vm14 = vmor %vm298_vm11, %vm299_vm12  ;;  %v3403_v47 = vld [vmem:[%s4317_s1 + $0xb8] sm:$0xff]   ;;  %v3408_v49 = vld [vmem:[%s4317_s1 + $0xe8] sm:$0xff]  }
  0x16   : > { %3043 = vmatpush3.bf16.msra.mxu0 %v3390_v5  ;;  %v250_v25 = vrot.slane %v221_v17, %v3658_v23  ;;  %v272_v26 = vrot.slane %v3648_v18, %v3658_v23  ;;  %v449_v27 = vrot.slane %v442_v20, %v3658_v23  ;;  %vm3683_vm15 = vmor %vm300_vm14, %vm301_vm13  ;;  %v3405_v50 = vld [vmem:[%s4317_s1 + $0xb0] sm:$0xff]   ;;  %v3410_v52 = vld [vmem:[%s4317_s1 + $0xe0] sm:$0xff]  }
  0x17   : > { %3063 = vmatpush3.bf16.msra.mxu1 %v3391_v6  ;;  %3044 = vmatprep.subr.bf16.mxu0 %v3542_v1  ;;  %v3407_v54 = vld [vmem:[%s4317_s1 + $0xa8] sm:$0xff]   ;;  %v3412_v55 = vld [vmem:[%s4317_s1 + $0xd8] sm:$0xff]   ;;  %v3409_v60 = vld [vmem:[%s4317_s1 + $0xa0] sm:$0xff]  }
  0x18   : > { %3064 = vmatprep.subr.bf16.mxu1 %v3542_v1  ;;  %v251_v28 = vcombine.high %v250_v25, %v250_v25  ;;  %v258_v29 = vrot.slane %v250_v25, %v3658_v23  ;;  %v273_v30 = vcombine.high %v272_v26, %v272_v26  ;;  %v280_v31 = vrot.slane %v272_v26, %v3658_v23  ;;  %v3414_v61 = vld [vmem:[%s4317_s1 + $0xd0] sm:$0xff]   ;;  %v3411_v0 = vld [vmem:[%s4317_s1 + $0x98] sm:$0xff]   ;;  %v3416_v3 = vld [vmem:[%s4317_s1 + $0xc8] sm:$0xff]  }
  0x19   : > { %v456_v40 = vrot.slane %v449_v27, %v3658_v23  ;;  %v3413_v4 = vld [vmem:[%s4317_s1 + $0x90] sm:$0xff]   ;;  %v3418_v6 = vld [vmem:[%s4317_s1 + $0xc0] sm:$0xff]   ;;  %v3776_v9 = vld [vmem:[%s3640_s18 + $0x8] sm:$0x7] }
  0x1a   : > { %3045 = vmatpush3.bf16.msra.mxu0 %v3392_v7  ;;  %v3677_v33 = vrot.slane %v251_v28, %v3658_v23  ;;  %v3680_v34 = vrot.slane %v273_v30, %v3658_v23  ;;  %v304_v35 = vshrl.u32 %v258_v29, 16  ;;  %v313_v36 = vshrl.u32 %v280_v31, 16  ;;  %v3417_v13 = vld [vmem:[%s4317_s1 + $0x80] sm:$0xff]   ;;  %v3422_v16 = vld [vmem:[%s4317_s1 + $0x170] sm:$0xff]   ;;  %v3419_v17 = vld [vmem:[%s4317_s1 + $0x138] sm:$0xff]  }
  0x1b   : > { %3065 = vmatpush3.bf16.msra.mxu1 %v3393_v8  ;;  %3046 = vmatprep.subr.bf16.mxu0 %v3542_v1  ;;  %v668_v51 = vcombine.high %v258_v29, %v258_v29  ;;  %v669_v53 = vcombine.high %v280_v31, %v280_v31  ;;  %v3415_v8 = vld [vmem:[%s4317_s1 + $0x88] sm:$0xff]   ;;  %v3426_v25 = vld [vmem:[%s4317_s1 + $0x160] sm:$0xff]   ;;  %v3428_v29 = vld [vmem:[%s4317_s1 + $0x158] sm:$0xff]  }
  0x1c   : > { %3066 = vmatprep.subr.bf16.mxu1 %v3542_v1  ;;  %v309_v38 = vshll.u32 %v3677_v33, 16  ;;  %v318_v39 = vshll.u32 %v3680_v34, 16  ;;  %v670_v56 = vshrl.u32 %v3677_v33, 16  ;;  %v678_v58 = vshrl.u32 %v3680_v34, 16  ;;  %v3424_v20 = vld [vmem:[%s4317_s1 + $0x168] sm:$0xff]   ;;  %v3425_v30 = vld [vmem:[%s4317_s1 + $0x120] sm:$0xff]  }
  0x1d   : > { %v675_v57 = vshll.u32 %v668_v51, 16  ;;  %v683_v59 = vshll.u32 %v669_v53, 16  ;;  %v563_v7 = vcombine.low %v3677_v33, %v3680_v34  ;;  %v3423_v26 = vld [vmem:[%s4317_s1 + $0x128] sm:$0xff]   ;;  %v3427_v33 = vld [vmem:[%s4317_s1 + $0x118] sm:$0xff]   ;;  %v3443_v51 = vld [vmem:[%s4317_s1 + $0x1e0] sm:$0xff]  }
  0x1e   : > { %3047 = vmatpush3.bf16.msra.mxu0 %v3394_v10  ;;  %v311_v42 = vsel %vm3683_vm15, %v304_v35, %v309_v38  ;;  %v3698_v43 = vsel %vm3683_vm15, %v313_v36, %v318_v39  ;;  %v3432_v36 = vld [vmem:[%s4317_s1 + $0x148] sm:$0xff]   ;;  %v3429_v38 = vld [vmem:[%s4317_s1 + $0x110] sm:$0xff]  }
  0x1f   : > { %3067 = vmatpush3.bf16.msra.mxu1 %v3395_v11  ;;  %3048 = vmatprep.subr.bf16.mxu0 %v3542_v1  ;;  %v338_v44 = vcombine.low %v311_v42, %v3698_v43  ;;  %v677_v62 = vsel %vm3683_vm15, %v670_v56, %v675_v57  ;;  %v3748_v63 = vsel %vm3683_vm15, %v678_v58, %v683_v59  ;;  %v3431_v42 = vld [vmem:[%s4317_s1 + $0x108] sm:$0xff]   ;;  %v3442_v57 = vld [vmem:[%s4317_s1 + $0x1a0] sm:$0xff]   ;;  %v3447_v58 = vld [vmem:[%s4317_s1 + $0x1d0] sm:$0xff]  }
  0x20   : > { %3068 = vmatprep.subr.bf16.mxu1 %v3542_v1  ;;  %v703_v2 = vcombine.low %v677_v62, %v3748_v63  ;;  %v570_v11 = vrot.slane %v563_v7, %v3658_v23  ;;  %v3440_v53 = vld [vmem:[%s4317_s1 + $0x1a8] sm:$0xff]   ;;  %v3512_v37 = vld [vmem:[%s4317_s1 + $0x390] sm:$0xff]  }
  0x21   : > { %v345_v45 = vrot.slane %v338_v44, %v3658_v23  ;;  %v3449_v62 = vld [vmem:[%s4317_s1 + $0x1c8] sm:$0xff]  }
  0x22   : > { %3049 = vmatpush3.bf16.msra.mxu0 %v3396_v12  ;;  %v710_v5 = vrot.slane %v703_v2, %v3658_v23  ;;  %v3420_v12 = vld [vmem:[%s4317_s1 + $0x178] sm:$0xff]   ;;  %v577_v15 = vrot.slane %v570_v11, %v3658_v23  ;;  %v3455_v11 = vld [vmem:[%s4317_s1 + $0x270] sm:$0xff]  }
  0x23   : > { %3069 = vmatpush3.bf16.msra.mxu1 %v3397_v14  ;;  %3050 = vmatprep.subr.bf16.mxu0 %v3542_v1  ;;  %v352_v48 = vrot.slane %v345_v45, %v3658_v23  ;;  %v937_v14 = vrot.slane %v3776_v9, %v3658_v23  ;;  %v3437_v45 = vld [vmem:[%s4317_s1 + $0x1f8] sm:$0xff]  }
  0x24   : > { %3070 = vmatprep.subr.bf16.mxu1 %v3542_v1  ;;  %v717_v10 = vrot.slane %v710_v5, %v3658_v23  ;;  %v3450_v5 = vld [vmem:[%s4317_s1 + $0x180] sm:$0xff]  }
  0x25   : > { %v938_v19 = vcombine.high %v937_v14, %v937_v14 }
  0x26   : > { %3051 = vmatpush3.bf16.msra.mxu0 %v3398_v21  ;;  %v3421_v21 = vld [vmem:[%s4317_s1 + $0x130] sm:$0xff]  }
  0x27   : > { %3071 = vmatpush3.bf16.msra.mxu1 %v3399_v22  ;;  %3052 = vmatprep.subr.bf16.mxu0 %v3542_v1  ;;  %v3812_v22 = vrot.slane %v937_v14, %v3658_v23  ;;  %v3457_v14 = vld [vmem:[%s4317_s1 + $0x268] sm:$0xff]  }
  0x28   : > { %3072 = vmatprep.subr.bf16.mxu1 %v3542_v1 }
  0x29   : > { %v954_v27 = vshrl.u32 %v3812_v22, 16 }
  0x2a   : > { %3053 = vmatpush3.bf16.msra.mxu0 %v3400_v24  ;;  %v3815_v24 = vrot.slane %v938_v19, %v3658_v23 }
  0x2b   : > { %3073 = vmatpush3.bf16.msra.mxu1 %v3401_v32  ;;  %3078 = vmatprep.subr.bf16.mxu0 %v3542_v1  ;;  %v3430_v32 = vld [vmem:[%s4317_s1 + $0x150] sm:$0xff]  }
  0x2c   : > { %3098 = vmatprep.subr.bf16.mxu1 %v3542_v1  ;;  %v959_v28 = vshll.u32 %v3815_v24, 16 }
  0x2d   : > { %3055 = vmatmul.mubr.bf16.vlgmr.msra.gmra.mxu0 %v352_v48  ;;  %v3436_v48 = vld [vmem:[%s4317_s1 + $0x1b8] sm:$0xff]  }
  0x2e   : > { %3075 = vmatmul.mubr.bf16.vlgmr.msra.gmra.mxu1 %v456_v40  ;;  %3079 = vmatpush3.bf16.msra.mxu0 %v3403_v47  ;;  %v3837_v31 = vsel %vm3683_vm15, %v954_v27, %v959_v28  ;;  %v3434_v40 = vld [vmem:[%s4317_s1 + $0x140] sm:$0xff]   ;;  %v3439_v47 = vld [vmem:[%s4317_s1 + $0x1f0] sm:$0xff]  }
  0x2f   : > { %3099 = vmatpush3.bf16.msra.mxu1 %v3404_v41  ;;  %3114 = vmatprep.mubr.msk.bf16.mxu1 %vm3543_vm0, %v3542_v1  ;;  %v979_v35 = vcombine.low %v3698_v43, %v3837_v31  ;;  %v826_v41 = vcombine.low %v3648_v18, %v3776_v9  ;;  %v3433_v18 = vld [vmem:[%s4317_s1 + $0x100] sm:$0xff]   ;;  %v3463_v28 = vld [vmem:[%s4317_s1 + $0x250] sm:$0xff]  }
  0x30   : > { %3100 = vmatprep.subr.bf16.mxu1 %v3542_v1  ;;  %3080 = vmatprep.subr.bf16.mxu0 %v3542_v1  ;;  %v3458_v27 = vld [vmem:[%s4317_s1 + $0x220] sm:$0xff]  }
  0x31   : > { %3094 = vmatprep.mubr.msk.bf16.mxu0 %vm3543_vm0, %v3542_v1  ;;  %v986_v39 = vrot.slane %v979_v35, %v3658_v23  ;;  %v833_v44 = vrot.slane %v826_v41, %v3658_v23  ;;  %v3462_v35 = vld [vmem:[%s4317_s1 + $0x210] sm:$0xff]  }
  0x32   : > { %3081 = vmatpush3.bf16.msra.mxu0 %v3405_v50  ;;  %v3438_v50 = vld [vmem:[%s4317_s1 + $0x1b0] sm:$0xff]  }
  0x33   : > { %3101 = vmatpush3.bf16.msra.mxu1 %v3406_v46  ;;  %3082 = vmatprep.subr.bf16.mxu0 %v3542_v1  ;;  %v993_v43 = vrot.slane %v986_v39, %v3658_v23  ;;  %v840_v46 = vrot.slane %v833_v44, %v3658_v23  ;;  %v3464_v39 = vld [vmem:[%s4317_s1 + $0x208] sm:$0xff]   ;;  %v3472_v44 = vld [vmem:[%s4317_s1 + $0x2f0] sm:$0xff]  }
  0x34   : > { %3102 = vmatprep.subr.bf16.mxu1 %v3542_v1 }
  0x36   : > { %3083 = vmatpush3.bf16.msra.mxu0 %v3407_v54  ;;  %v1207_v54 = vshrl.u32 %v3815_v24, 16 }
  0x37   : > { %3103 = vmatpush3.bf16.msra.mxu1 %v3408_v49  ;;  %3084 = vmatprep.subr.bf16.mxu0 %v3542_v1  ;;  %v3441_v49 = vld [vmem:[%s4317_s1 + $0x1e8] sm:$0xff]  }
  0x38   : > { %3104 = vmatprep.subr.bf16.mxu1 %v3542_v1 }
  0x3a   : > { %3085 = vmatpush3.bf16.msra.mxu0 %v3409_v60  ;;  %v3444_v60 = vld [vmem:[%s4317_s1 + $0x198] sm:$0xff]  }
  0x3b   : > { %3105 = vmatpush3.bf16.msra.mxu1 %v3410_v52  ;;  %3086 = vmatprep.subr.bf16.mxu0 %v3542_v1  ;;  %v1206_v52 = vcombine.high %v3812_v22, %v3812_v22  ;;  %v3461_v22 = vld [vmem:[%s4317_s1 + $0x258] sm:$0xff]  }
  0x3c   : > { %3106 = vmatprep.subr.bf16.mxu1 %v3542_v1 }
  0x3d   : > { %v1212_v56 = vshll.u32 %v1206_v52, 16 }
  0x3e   : > { %3087 = vmatpush3.bf16.msra.mxu0 %v3411_v0  ;;  %v3446_v0 = vld [vmem:[%s4317_s1 + $0x190] sm:$0xff]  }
  0x3f   : > { %3107 = vmatpush3.bf16.msra.mxu1 %v3412_v55  ;;  %3088 = vmatprep.subr.bf16.mxu0 %v3542_v1  ;;  %v3445_v55 = vld [vmem:[%s4317_s1 + $0x1d8] sm:$0xff]   ;;  %v3923_v59 = vsel %vm3683_vm15, %v1207_v54, %v1212_v56  ;;  %v3480_v54 = vld [vmem:[%s4317_s1 + $0x2d0] sm:$0xff]  }
  0x40   : > { %3108 = vmatprep.subr.bf16.mxu1 %v3542_v1  ;;  %v3477_v56 = vld [vmem:[%s4317_s1 + $0x298] sm:$0xff]  }
  0x42   : > { %3089 = vmatpush3.bf16.msra.mxu0 %v3413_v4  ;;  %v3448_v4 = vld [vmem:[%s4317_s1 + $0x188] sm:$0xff]  }
  0x43   : > { %3109 = vmatpush3.bf16.msra.mxu1 %v3414_v61  ;;  %3090 = vmatprep.subr.bf16.mxu0 %v3542_v1  ;;  %v1232_v61 = vcombine.low %v3748_v63, %v3923_v59  ;;  %v3451_v63 = vld [vmem:[%s4317_s1 + $0x1c0] sm:$0xff]  }
  0x44   : > { %3110 = vmatprep.subr.bf16.mxu1 %v3542_v1 }
  0x45   : > { %v1239_v2 = vrot.slane %v1232_v61, %v3658_v23 }
  0x46   : > { %3091 = vmatpush3.bf16.msra.mxu0 %v3415_v8  ;;  %v3961_v8 = vld [vmem:[%s3640_s18 + $0xc] sm:$0x7] }
  0x47   : > { %3111 = vmatpush3.bf16.msra.mxu1 %v3416_v3  ;;  %3092 = vmatprep.subr.bf16.mxu0 %v3542_v1  ;;  %v1101_v3 = vcombine.low %v3680_v34, %v3815_v24  ;;  %v3453_v34 = vld [vmem:[%s4317_s1 + $0x278] sm:$0xff]  }
  0x48   : > { %3112 = vmatprep.subr.bf16.mxu1 %v3542_v1 }
  0x49   : > { %v1108_v7 = vrot.slane %v1101_v3, %v3658_v23  ;;  %v3486_v3 = vld [vmem:[%s4317_s1 + $0x378] sm:$0xff]  }
  0x4a   : > { %3093 = vmatpush3.bf16.msra.mxu0 %v3417_v13  ;;  %v3452_v13 = vld [vmem:[%s4317_s1 + $0x238] sm:$0xff]  }
  0x4b   : > { %3113 = vmatpush3.bf16.msra.mxu1 %v3418_v6  ;;  %3118 = vmatprep.subr.bf16.mxu0 %v3542_v1  ;;  %v1246_v6 = vrot.slane %v1239_v2, %v3658_v23 }
  0x4c   : > { %3138 = vmatprep.subr.bf16.mxu1 %v3542_v1 }
  0x4d   : > { %3095 = vmatmul.mubr.bf16.vlgmr.msra.gmra.mxu0 %v577_v15 }
  0x4e   : > { %3115 = vmatmul.mubr.bf16.vlgmr.msra.gmra.mxu1 %v717_v10  ;;  %3119 = vmatpush3.bf16.msra.mxu0 %v3419_v17  ;;  %v1115_v10 = vrot.slane %v1108_v7, %v3658_v23  ;;  %v3459_v17 = vld [vmem:[%s4317_s1 + $0x260] sm:$0xff]  }
  0x4f   : > { %3139 = vmatpush3.bf16.msra.mxu1 %v3420_v12  ;;  %3154 = vmatprep.mubr.msk.bf16.mxu1 %vm3543_vm0, %v3542_v1  ;;  %v1466_v12 = vrot.slane %v3961_v8, %v3658_v23 }
  0x50   : > { %3140 = vmatprep.subr.bf16.mxu1 %v3542_v1  ;;  %3120 = vmatprep.subr.bf16.mxu0 %v3542_v1 }
  0x51   : > { %3134 = vmatprep.mubr.msk.bf16.mxu0 %vm3543_vm0, %v3542_v1  ;;  %v1467_v15 = vcombine.high %v1466_v12, %v1466_v12  ;;  %v3991_v19 = vrot.slane %v1466_v12, %v3658_v23  ;;  %v3487_v12 = vld [vmem:[%s4317_s1 + $0x330] sm:$0xff]  }
  0x52   : > { %3121 = vmatpush3.bf16.msra.mxu0 %v3421_v21  ;;  %v3456_v21 = vld [vmem:[%s4317_s1 + $0x228] sm:$0xff]  }
  0x53   : > { %3141 = vmatpush3.bf16.msra.mxu1 %v3422_v16  ;;  %3122 = vmatprep.subr.bf16.mxu0 %v3542_v1  ;;  %v3454_v16 = vld [vmem:[%s4317_s1 + $0x230] sm:$0xff]  }
  0x54   : > { %3142 = vmatprep.subr.bf16.mxu1 %v3542_v1 }
  0x56   : > { %3123 = vmatpush3.bf16.msra.mxu0 %v3423_v26 }
  0x57   : > { %3143 = vmatpush3.bf16.msra.mxu1 %v3424_v20  ;;  %3124 = vmatprep.subr.bf16.mxu0 %v3542_v1  ;;  %v3994_v20 = vrot.slane %v1467_v15, %v3658_v23 }
  0x58   : > { %3144 = vmatprep.subr.bf16.mxu1 %v3542_v1 }
  0x59   : > { %v1488_v26 = vshll.u32 %v3994_v20, 16 }
  0x5a   : > { %3125 = vmatpush3.bf16.msra.mxu0 %v3425_v30  ;;  %v3460_v30 = vld [vmem:[%s4317_s1 + $0x218] sm:$0xff]  }
  0x5b   : > { %3145 = vmatpush3.bf16.msra.mxu1 %v3426_v25  ;;  %3126 = vmatprep.subr.bf16.mxu0 %v3542_v1  ;;  %v1483_v25 = vshrl.u32 %v3991_v19, 16 }
  0x5c   : > { %3146 = vmatprep.subr.bf16.mxu1 %v3542_v1 }
  0x5e   : > { %3127 = vmatpush3.bf16.msra.mxu0 %v3427_v33  ;;  %v3465_v33 = vld [vmem:[%s4317_s1 + $0x248] sm:$0xff]  }
  0x5f   : > { %3147 = vmatpush3.bf16.msra.mxu1 %v3428_v29  ;;  %3128 = vmatprep.subr.bf16.mxu0 %v3542_v1  ;;  %v4016_v29 = vsel %vm3683_vm15, %v1483_v25, %v1488_v26  ;;  %v3496_v25 = vld [vmem:[%s4317_s1 + $0x350] sm:$0xff]  }
  0x60   : > { %3148 = vmatprep.subr.bf16.mxu1 %v3542_v1 }
  0x62   : > { %3129 = vmatpush3.bf16.msra.mxu0 %v3429_v38  ;;  %v1355_v38 = vcombine.low %v3776_v9, %v3961_v8  ;;  %v3466_v9 = vld [vmem:[%s4317_s1 + $0x200] sm:$0xff]  }
  0x63   : > { %3149 = vmatpush3.bf16.msra.mxu1 %v3430_v32  ;;  %3130 = vmatprep.subr.bf16.mxu0 %v3542_v1  ;;  %v1508_v32 = vcombine.low %v3837_v31, %v4016_v29  ;;  %v3467_v31 = vld [vmem:[%s4317_s1 + $0x240] sm:$0xff]  }
  0x64   : > { %3150 = vmatprep.subr.bf16.mxu1 %v3542_v1  ;;  %v1362_v41 = vrot.slane %v1355_v38, %v3658_v23 }
  0x66   : > { %3131 = vmatpush3.bf16.msra.mxu0 %v3431_v42  ;;  %v3470_v42 = vld [vmem:[%s4317_s1 + $0x2f8] sm:$0xff]  }
  0x67   : > { %3151 = vmatpush3.bf16.msra.mxu1 %v3432_v36  ;;  %3132 = vmatprep.subr.bf16.mxu0 %v3542_v1  ;;  %v1515_v36 = vrot.slane %v1508_v32, %v3658_v23  ;;  %v3495_v32 = vld [vmem:[%s4317_s1 + $0x310] sm:$0xff]  }
  0x68   : > { %3152 = vmatprep.subr.bf16.mxu1 %v3542_v1 }
  0x6a   : > { %3133 = vmatpush3.bf16.msra.mxu0 %v3433_v18  ;;  %v3474_v18 = vld [vmem:[%s4317_s1 + $0x2e8] sm:$0xff]  }
  0x6b   : > { %3153 = vmatpush3.bf16.msra.mxu1 %v3434_v40  ;;  %3158 = vmatprep.subr.bf16.mxu0 %v3542_v1  ;;  %v1522_v40 = vrot.slane %v1515_v36, %v3658_v23  ;;  %v3497_v36 = vld [vmem:[%s4317_s1 + $0x308] sm:$0xff]  }
  0x6c   : > { %3178 = vmatprep.subr.bf16.mxu1 %v3542_v1 }
  0x6d   : > { %3135 = vmatmul.mubr.bf16.vlgmr.msra.gmra.mxu0 %v840_v46  ;;  %v3471_v46 = vld [vmem:[%s4317_s1 + $0x2b0] sm:$0xff]  }
  0x6e   : > { %3155 = vmatmul.mubr.bf16.vlgmr.msra.gmra.mxu1 %v993_v43  ;;  %3159 = vmatpush3.bf16.msra.mxu0 %v3436_v48  ;;  %v1369_v43 = vrot.slane %v1362_v41, %v3658_v23  ;;  %v1735_v48 = vcombine.high %v3991_v19, %v3991_v19 }
  0x6f   : > { %3179 = vmatpush3.bf16.msra.mxu1 %v3437_v45  ;;  %3194 = vmatprep.mubr.msk.bf16.mxu1 %vm3543_vm0, %v3542_v1  ;;  %v3469_v45 = vld [vmem:[%s4317_s1 + $0x2b8] sm:$0xff]  }
  0x70   : > { %3180 = vmatprep.subr.bf16.mxu1 %v3542_v1  ;;  %3160 = vmatprep.subr.bf16.mxu0 %v3542_v1  ;;  %v1741_v52 = vshll.u32 %v1735_v48, 16 }
  0x71   : > { %3174 = vmatprep.mubr.msk.bf16.mxu0 %vm3543_vm0, %v3542_v1 }
  0x72   : > { %3161 = vmatpush3.bf16.msra.mxu0 %v3438_v50  ;;  %v3478_v50 = vld [vmem:[%s4317_s1 + $0x2d8] sm:$0xff]  }
  0x73   : > { %3181 = vmatpush3.bf16.msra.mxu1 %v3439_v47  ;;  %3162 = vmatprep.subr.bf16.mxu0 %v3542_v1  ;;  %v3476_v47 = vld [vmem:[%s4317_s1 + $0x2e0] sm:$0xff]  }
  0x74   : > { %3182 = vmatprep.subr.bf16.mxu1 %v3542_v1 }
  0x76   : > { %3163 = vmatpush3.bf16.msra.mxu0 %v3440_v53  ;;  %v3475_v53 = vld [vmem:[%s4317_s1 + $0x2a0] sm:$0xff]  }
  0x77   : > { %3183 = vmatpush3.bf16.msra.mxu1 %v3441_v49  ;;  %3164 = vmatprep.subr.bf16.mxu0 %v3542_v1  ;;  %v3473_v49 = vld [vmem:[%s4317_s1 + $0x2a8] sm:$0xff]  }
  0x78   : > { %3184 = vmatprep.subr.bf16.mxu1 %v3542_v1 }
  0x7a   : > { %3165 = vmatpush3.bf16.msra.mxu0 %v3442_v57 }
  0x7b   : > { %3185 = vmatpush3.bf16.msra.mxu1 %v3443_v51  ;;  %3166 = vmatprep.subr.bf16.mxu0 %v3542_v1  ;;  %v1736_v51 = vshrl.u32 %v3994_v20, 16 }
  0x7c   : > { %3186 = vmatprep.subr.bf16.mxu1 %v3542_v1 }
  0x7e   : > { %3167 = vmatpush3.bf16.msra.mxu0 %v3444_v60  ;;  %v3479_v60 = vld [vmem:[%s4317_s1 + $0x290] sm:$0xff]  }
  0x7f   : > { %3187 = vmatpush3.bf16.msra.mxu1 %v3445_v55  ;;  %3168 = vmatprep.subr.bf16.mxu0 %v3542_v1  ;;  %v4099_v55 = vsel %vm3683_vm15, %v1736_v51, %v1741_v52  ;;  %v3509_v51 = vld [vmem:[%s4317_s1 + $0x3e0] sm:$0xff]  }
  0x80   : > { %3188 = vmatprep.subr.bf16.mxu1 %v3542_v1  ;;  %v1761_v57 = vcombine.low %v3923_v59, %v4099_v55  ;;  %v3484_v59 = vld [vmem:[%s4317_s1 + $0x2c0] sm:$0xff]  }
  0x82   : > { %3169 = vmatpush3.bf16.msra.mxu0 %v3446_v0  ;;  %v1768_v61 = vrot.slane %v1761_v57, %v3658_v23  ;;  %v3481_v0 = vld [vmem:[%s4317_s1 + $0x288] sm:$0xff]  }
  0x83   : > { %3189 = vmatpush3.bf16.msra.mxu1 %v3447_v58  ;;  %3170 = vmatprep.subr.bf16.mxu0 %v3542_v1  ;;  %v3482_v58 = vld [vmem:[%s4317_s1 + $0x2c8] sm:$0xff]  }
  0x84   : > { %3190 = vmatprep.subr.bf16.mxu1 %v3542_v1  ;;  %v1775_v2 = vrot.slane %v1768_v61, %v3658_v23  ;;  %v3513_v61 = vld [vmem:[%s4317_s1 + $0x3d0] sm:$0xff]  }
  0x86   : > { %3171 = vmatpush3.bf16.msra.mxu0 %v3448_v4  ;;  %v225_v4 = vld [vmem:[%s3640_s18 + $0x10] sm:$0x7] }
  0x87   : > { %3191 = vmatpush3.bf16.msra.mxu1 %v3449_v62  ;;  %3172 = vmatprep.subr.bf16.mxu0 %v3542_v1  ;;  %v1630_v62 = vcombine.low %v3815_v24, %v3994_v20  ;;  %v3483_v24 = vld [vmem:[%s4317_s1 + $0x280] sm:$0xff]   ;;  %v1995_v7 = vrot.slane %v225_v4, %v3658_v23 }
  0x88   : > { %3192 = vmatprep.subr.bf16.mxu1 %v3542_v1 }
  0x8a   : > { %3173 = vmatpush3.bf16.msra.mxu0 %v3450_v5 }
  0x8b   : > { %3193 = vmatpush3.bf16.msra.mxu1 %v3451_v63  ;;  %3198 = vmatprep.subr.bf16.mxu0 %v3542_v1  ;;  %v1637_v63 = vrot.slane %v1630_v62, %v3658_v23  ;;  %v3510_v62 = vld [vmem:[%s4317_s1 + $0x398] sm:$0xff]  }
  0x8c   : > { %3218 = vmatprep.subr.bf16.mxu1 %v3542_v1 }
  0x8d   : > { %3175 = vmatmul.mubr.bf16.vlgmr.msra.gmra.mxu0 %v1115_v10  ;;  %v1644_v5 = vrot.slane %v1637_v63, %v3658_v23  ;;  %v3490_v10 = vld [vmem:[%s4317_s1 + $0x368] sm:$0xff]  }
  0x8e   : > { %3195 = vmatmul.mubr.bf16.vlgmr.msra.gmra.mxu1 %v1246_v6  ;;  %3199 = vmatpush3.bf16.msra.mxu0 %v3452_v13  ;;  %v3488_v6 = vld [vmem:[%s4317_s1 + $0x370] sm:$0xff]   ;;  %v3492_v13 = vld [vmem:[%s4317_s1 + $0x360] sm:$0xff]  }
  0x8f   : > { %3219 = vmatpush3.bf16.msra.mxu1 %v3453_v34  ;;  %3234 = vmatprep.mubr.msk.bf16.mxu1 %vm3543_vm0, %v3542_v1  ;;  %v3485_v34 = vld [vmem:[%s4317_s1 + $0x338] sm:$0xff]  }
  0x90   : > { %3220 = vmatprep.subr.bf16.mxu1 %v3542_v1  ;;  %3200 = vmatprep.subr.bf16.mxu0 %v3542_v1 }
  0x91   : > { %3214 = vmatprep.mubr.msk.bf16.mxu0 %vm3543_vm0, %v3542_v1 }
  0x92   : > { %3201 = vmatpush3.bf16.msra.mxu0 %v3454_v16  ;;  %v3489_v16 = vld [vmem:[%s4317_s1 + $0x328] sm:$0xff]  }
  0x93   : > { %3221 = vmatpush3.bf16.msra.mxu1 %v3455_v11  ;;  %3202 = vmatprep.subr.bf16.mxu0 %v3542_v1  ;;  %v1996_v11 = vcombine.high %v1995_v7, %v1995_v7 }
  0x94   : > { %3222 = vmatprep.subr.bf16.mxu1 %v3542_v1 }
  0x95   : > { %v4167_v15 = vrot.slane %v1996_v11, %v3658_v23 }
  0x96   : > { %3203 = vmatpush3.bf16.msra.mxu0 %v3456_v21 }
  0x97   : > { %3223 = vmatpush3.bf16.msra.mxu1 %v3457_v14  ;;  %3204 = vmatprep.subr.bf16.mxu0 %v3542_v1  ;;  %v4164_v14 = vrot.slane %v1995_v7, %v3658_v23  ;;  %v2017_v21 = vshll.u32 %v4167_v15, 16  ;;  %v2265_v57 = vshrl.u32 %v4167_v15, 16 }
  0x98   : > { %3224 = vmatprep.subr.bf16.mxu1 %v3542_v1 }
  0x99   : > { %v2012_v19 = vshrl.u32 %v4164_v14, 16  ;;  %v2264_v52 = vcombine.high %v4164_v14, %v4164_v14 }
  0x9a   : > { %3205 = vmatpush3.bf16.msra.mxu0 %v3458_v27  ;;  %v3493_v27 = vld [vmem:[%s4317_s1 + $0x318] sm:$0xff]  }
  0x9b   : > { %3225 = vmatpush3.bf16.msra.mxu1 %v3459_v17  ;;  %3206 = vmatprep.subr.bf16.mxu0 %v3542_v1  ;;  %v3494_v17 = vld [vmem:[%s4317_s1 + $0x358] sm:$0xff]   ;;  %v2019_v26 = vsel %vm3683_vm15, %v2012_v19, %v2017_v21 }
  0x9c   : > { %3226 = vmatprep.subr.bf16.mxu1 %v3542_v1 }
  0x9e   : > { %3207 = vmatpush3.bf16.msra.mxu0 %v3460_v30  ;;  %v3498_v30 = vld [vmem:[%s4317_s1 + $0x348] sm:$0xff]  }
  0x9f   : > { %3227 = vmatpush3.bf16.msra.mxu1 %v3461_v22  ;;  %3208 = vmatprep.subr.bf16.mxu0 %v3542_v1  ;;  %v3491_v22 = vld [vmem:[%s4317_s1 + $0x320] sm:$0xff]  }
  0xa0   : > { %3228 = vmatprep.subr.bf16.mxu1 %v3542_v1 }
  0xa2   : > { %3209 = vmatpush3.bf16.msra.mxu0 %v3462_v35  ;;  %v1884_v35 = vcombine.low %v3961_v8, %v225_v4  ;;  %v3499_v8 = vld [vmem:[%s4317_s1 + $0x300] sm:$0xff]  }
  0xa3   : > { %3229 = vmatpush3.bf16.msra.mxu1 %v3463_v28  ;;  %3210 = vmatprep.subr.bf16.mxu0 %v3542_v1  ;;  %v2037_v28 = vcombine.low %v4016_v29, %v2019_v26  ;;  %v3500_v29 = vld [vmem:[%s4317_s1 + $0x340] sm:$0xff]  }
  0xa4   : > { %3230 = vmatprep.subr.bf16.mxu1 %v3542_v1  ;;  %v1891_v38 = vrot.slane %v1884_v35, %v3658_v23 }
  0xa6   : > { %3211 = vmatpush3.bf16.msra.mxu0 %v3464_v39  ;;  %v3503_v39 = vld [vmem:[%s4317_s1 + $0x3f8] sm:$0xff]   ;;  %v1898_v41 = vrot.slane %v1891_v38, %v3658_v23 }
  0xa7   : > { %3231 = vmatpush3.bf16.msra.mxu1 %v3465_v33  ;;  %3212 = vmatprep.subr.bf16.mxu0 %v3542_v1  ;;  %v2044_v33 = vrot.slane %v2037_v28, %v3658_v23 }
  0xa8   : > { %3232 = vmatprep.subr.bf16.mxu1 %v3542_v1 }
  0xaa   : > { %3213 = vmatpush3.bf16.msra.mxu0 %v3466_v9  ;;  %v3502_v9 = vld [vmem:[%s4317_s1 + $0x3b8] sm:$0xff]  }
  0xab   : > { %3233 = vmatpush3.bf16.msra.mxu1 %v3467_v31  ;;  %3238 = vmatprep.subr.bf16.mxu0 %v3542_v1  ;;  %v2051_v31 = vrot.slane %v2044_v33, %v3658_v23 }
  0xac   : > { %3258 = vmatprep.subr.bf16.mxu1 %v3542_v1 }
  0xad   : > { %3215 = vmatmul.mubr.bf16.vlgmr.msra.gmra.mxu0 %v1369_v43 }
  0xae   : > { %3235 = vmatmul.mubr.bf16.vlgmr.msra.gmra.mxu1 %v1522_v40  ;;  %3239 = vmatpush3.bf16.msra.mxu0 %v3469_v45 }
  0xaf   : > { %3259 = vmatpush3.bf16.msra.mxu1 %v3470_v42  ;;  %3274 = vmatprep.mubr.msk.bf16.mxu1 %vm3543_vm0, %v3542_v1  ;;  %v3505_v42 = vld [vmem:[%s4317_s1 + $0x3f0] sm:$0xff]  }
  0xb0   : > { %3260 = vmatprep.subr.bf16.mxu1 %v3542_v1  ;;  %3240 = vmatprep.subr.bf16.mxu0 %v3542_v1 }
  0xb1   : > { %3254 = vmatprep.mubr.msk.bf16.mxu0 %vm3543_vm0, %v3542_v1 }
  0xb2   : > { %3241 = vmatpush3.bf16.msra.mxu0 %v3471_v46 }
  0xb3   : > { %3261 = vmatpush3.bf16.msra.mxu1 %v3472_v44  ;;  %3242 = vmatprep.subr.bf16.mxu0 %v3542_v1 }
  0xb4   : > { %3262 = vmatprep.subr.bf16.mxu1 %v3542_v1 }
  0xb6   : > { %3243 = vmatpush3.bf16.msra.mxu0 %v3473_v49 }
  0xb7   : > { %3263 = vmatpush3.bf16.msra.mxu1 %v3474_v18  ;;  %3244 = vmatprep.subr.bf16.mxu0 %v3542_v1  ;;  %v3507_v18 = vld [vmem:[%s4317_s1 + $0x3e8] sm:$0xff]  }
  0xb8   : > { %3264 = vmatprep.subr.bf16.mxu1 %v3542_v1 }
  0xba   : > { %3245 = vmatpush3.bf16.msra.mxu0 %v3475_v53  ;;  %v3506_v53 = vld [vmem:[%s4317_s1 + $0x3a8] sm:$0xff]  }
  0xbb   : > { %3265 = vmatpush3.bf16.msra.mxu1 %v3476_v47  ;;  %3246 = vmatprep.subr.bf16.mxu0 %v3542_v1  ;;  %v3504_v47 = vld [vmem:[%s4317_s1 + $0x3b0] sm:$0xff]  }
  0xbc   : > { %3266 = vmatprep.subr.bf16.mxu1 %v3542_v1 }
  0xbe   : > { %3247 = vmatpush3.bf16.msra.mxu0 %v3477_v56  ;;  %v3511_v56 = vld [vmem:[%s4317_s1 + $0x3d8] sm:$0xff]  }
  0xbf   : > { %3267 = vmatpush3.bf16.msra.mxu1 %v3478_v50  ;;  %3248 = vmatprep.subr.bf16.mxu0 %v3542_v1 }
  0xc0   : > { %3268 = vmatprep.subr.bf16.mxu1 %v3542_v1 }
  0xc2   : > { %3249 = vmatpush3.bf16.msra.mxu0 %v3479_v60  ;;  %v3508_v60 = vld [vmem:[%s4317_s1 + $0x3a0] sm:$0xff]  }
  0xc3   : > { %3269 = vmatpush3.bf16.msra.mxu1 %v3480_v54  ;;  %3250 = vmatprep.subr.bf16.mxu0 %v3542_v1 }
  0xc4   : > { %3270 = vmatprep.subr.bf16.mxu1 %v3542_v1 }
  0xc6   : > { %3251 = vmatpush3.bf16.msra.mxu0 %v3481_v0 }
  0xc7   : > { %3271 = vmatpush3.bf16.msra.mxu1 %v3482_v58  ;;  %3252 = vmatprep.subr.bf16.mxu0 %v3542_v1  ;;  %v2270_v58 = vshll.u32 %v2264_v52, 16 }
  0xc8   : > { %3272 = vmatprep.subr.bf16.mxu1 %v3542_v1 }
  0xca   : > { %3253 = vmatpush3.bf16.msra.mxu0 %v3483_v24  ;;  %v3514_v24 = vld [vmem:[%s4317_s1 + $0x388] sm:$0xff]  }
  0xcb   : > { %3273 = vmatpush3.bf16.msra.mxu1 %v3484_v59  ;;  %3278 = vmatprep.subr.bf16.mxu0 %v3542_v1  ;;  %v2272_v59 = vsel %vm3683_vm15, %v2265_v57, %v2270_v58 }
  0xcc   : > { %3298 = vmatprep.subr.bf16.mxu1 %v3542_v1  ;;  %v2290_v0 = vcombine.low %v4099_v55, %v2272_v59  ;;  %v3517_v55 = vld [vmem:[%s4317_s1 + $0x3c0] sm:$0xff]  }
  0xcd   : > { %3255 = vmatmul.mubr.bf16.vlgmr.msra.gmra.mxu0 %v1644_v5 }
  0xce   : > { %3275 = vmatmul.mubr.bf16.vlgmr.msra.gmra.mxu1 %v1775_v2  ;;  %3279 = vmatpush3.bf16.msra.mxu0 %v3485_v34  ;;  %v3515_v2 = vld [vmem:[%s4317_s1 + $0x3c8] sm:$0xff]   ;;  %v2297_v63 = vrot.slane %v2290_v0, %v3658_v23 }
  0xcf   : > { %3299 = vmatpush3.bf16.msra.mxu1 %v3486_v3  ;;  %3314 = vmatprep.mubr.msk.bf16.mxu1 %vm3543_vm0, %v3542_v1  ;;  %v2159_v3 = vcombine.low %v3994_v20, %v4167_v15 }
  0xd0   : > { %3300 = vmatprep.subr.bf16.mxu1 %v3542_v1  ;;  %3280 = vmatprep.subr.bf16.mxu0 %v3542_v1  ;;  %v2304_v4 = vrot.slane %v2297_v63, %v3658_v23 }
  0xd1   : > { %3294 = vmatprep.mubr.msk.bf16.mxu0 %vm3543_vm0, %v3542_v1  ;;  %v2166_v5 = vrot.slane %v2159_v3, %v3658_v23 }
  0xd2   : > { %3281 = vmatpush3.bf16.msra.mxu0 %v3487_v12 }
  0xd3   : > { %3301 = vmatpush3.bf16.msra.mxu1 %v3488_v6  ;;  %3282 = vmatprep.subr.bf16.mxu0 %v3542_v1  ;;  %v3516_v6 = vld [vmem:[%s4317_s1 + $0x380] sm:$0xff]   ;;  %v2173_v7 = vrot.slane %v2166_v5, %v3658_v23 }
  0xd4   : > { %3302 = vmatprep.subr.bf16.mxu1 %v3542_v1 }
  0xd6   : > { %3283 = vmatpush3.bf16.msra.mxu0 %v3489_v16 }
  0xd7   : > { %3303 = vmatpush3.bf16.msra.mxu1 %v3490_v10  ;;  %3284 = vmatprep.subr.bf16.mxu0 %v3542_v1 }
  0xd8   : > { %3304 = vmatprep.subr.bf16.mxu1 %v3542_v1 }
  0xda   : > { %3285 = vmatpush3.bf16.msra.mxu0 %v3491_v22 }
  0xdb   : > { %3305 = vmatpush3.bf16.msra.mxu1 %v3492_v13  ;;  %3286 = vmatprep.subr.bf16.mxu0 %v3542_v1 }
  0xdc   : > { %3306 = vmatprep.subr.bf16.mxu1 %v3542_v1 }
  0xde   : > { %3287 = vmatpush3.bf16.msra.mxu0 %v3493_v27 }
  0xdf   : > { %3307 = vmatpush3.bf16.msra.mxu1 %v3494_v17  ;;  %3288 = vmatprep.subr.bf16.mxu0 %v3542_v1 }
  0xe0   : > { %3308 = vmatprep.subr.bf16.mxu1 %v3542_v1 }
  0xe2   : > { %3289 = vmatpush3.bf16.msra.mxu0 %v3495_v32 }
  0xe3   : > { %3309 = vmatpush3.bf16.msra.mxu1 %v3496_v25  ;;  %3290 = vmatprep.subr.bf16.mxu0 %v3542_v1 }
  0xe4   : > { %3310 = vmatprep.subr.bf16.mxu1 %v3542_v1 }
  0xe6   : > { %3291 = vmatpush3.bf16.msra.mxu0 %v3497_v36 }
  0xe7   : > { %3311 = vmatpush3.bf16.msra.mxu1 %v3498_v30  ;;  %3292 = vmatprep.subr.bf16.mxu0 %v3542_v1 }
  0xe8   : > { %3312 = vmatprep.subr.bf16.mxu1 %v3542_v1 }
  0xea   : > { %3293 = vmatpush3.bf16.msra.mxu0 %v3499_v8 }
  0xeb   : > { %3313 = vmatpush3.bf16.msra.mxu1 %v3500_v29  ;;  %3318 = vmatprep.subr.bf16.mxu0 %v3542_v1 }
  0xec   : > { %3338 = vmatprep.subr.bf16.mxu1 %v3542_v1 }
  0xed   : > { %v436_v45 = vpop.f32.mrf.mxu0  ;;  %3295 = vmatmul.mubr.bf16.vlgmr.msra.gmra.mxu0 %v1898_v41 }
  0xee   : > { %v540_v40 = vpop.f32.mrf.mxu1  ;;  %3315 = vmatmul.mubr.bf16.vlgmr.msra.gmra.mxu1 %v2051_v31  ;;  %3319 = vmatpush3.bf16.msra.mxu0 %v3502_v9 }
  0xef   : > { %3339 = vmatpush3.bf16.msra.mxu1 %v3503_v39  ;;  %3354 = vmatprep.mubr.msk.bf16.mxu1 %vm3543_vm0, %v3542_v1  ;;  %v541_v46 = vadd.f32 %v540_v40, %v436_v45  ;;  %v3056_v49 = vpop.f32.mrf.mxu0 }
  0xf0   : > { %v3076_v43 = vpop.f32.mrf.mxu1  ;;  %3340 = vmatprep.subr.bf16.mxu1 %v3542_v1  ;;  %3320 = vmatprep.subr.bf16.mxu0 %v3542_v1 }
  0xf1   : > { %3334 = vmatprep.mubr.msk.bf16.mxu0 %vm3543_vm0, %v3542_v1  ;;  %v439_v50 = vpop.f32.mrf.mxu0  ;;  %vm2403_vm0 = vcmask 60416  }
  0xf2   : > { %v543_v44 = vpop.f32.mrf.mxu1  ;;  %3321 = vmatpush3.bf16.msra.mxu0 %v3504_v47 }
  0xf3   : > { %3341 = vmatpush3.bf16.msra.mxu1 %v3505_v42  ;;  %v3057_v54 = vpop.f32.mrf.mxu0  ;;  %3322 = vmatprep.subr.bf16.mxu0 %v3542_v1 }
  0xf4   : > { %v3077_v48 = vpop.f32.mrf.mxu1  ;;  %3342 = vmatprep.subr.bf16.mxu1 %v3542_v1 }
  0xf6   : > { %3323 = vmatpush3.bf16.msra.mxu0 %v3506_v53 }
  0xf7   : > { %3343 = vmatpush3.bf16.msra.mxu1 %v3507_v18  ;;  %3324 = vmatprep.subr.bf16.mxu0 %v3542_v1 }
  0xf8   : > { %3344 = vmatprep.subr.bf16.mxu1 %v3542_v1 }
  0xfa   : > { %3325 = vmatpush3.bf16.msra.mxu0 %v3508_v60 }
  0xfb   : > { %3345 = vmatpush3.bf16.msra.mxu1 %v3509_v51  ;;  %3326 = vmatprep.subr.bf16.mxu0 %v3542_v1 }
  0xfc   : > { %3346 = vmatprep.subr.bf16.mxu1 %v3542_v1 }
  0xfe   : > { %3327 = vmatpush3.bf16.msra.mxu0 %v3510_v62 }
  0xff   : > { %3347 = vmatpush3.bf16.msra.mxu1 %v3511_v56  ;;  %3328 = vmatprep.subr.bf16.mxu0 %v3542_v1 }
 0x100   : > { %3348 = vmatprep.subr.bf16.mxu1 %v3542_v1 }
 0x102   : > { %3329 = vmatpush3.bf16.msra.mxu0 %v3512_v37 }
 0x103   : > { %3349 = vmatpush3.bf16.msra.mxu1 %v3513_v61  ;;  %3330 = vmatprep.subr.bf16.mxu0 %v3542_v1 }
 0x104   : > { %3350 = vmatprep.subr.bf16.mxu1 %v3542_v1 }
 0x106   : > { %3331 = vmatpush3.bf16.msra.mxu0 %v3514_v24 }
 0x107   : > { %3351 = vmatpush3.bf16.msra.mxu1 %v3515_v2  ;;  %3332 = vmatprep.subr.bf16.mxu0 %v3542_v1 }
 0x108   : > { %3352 = vmatprep.subr.bf16.mxu1 %v3542_v1 }
 0x10a   : > { %3333 = vmatpush3.bf16.msra.mxu0 %v3516_v6 }
 0x10b   : > { %3353 = vmatpush3.bf16.msra.mxu1 %v3517_v55 }
 0x10d   : > { %v661_v11 = vpop.f32.mrf.mxu0  ;;  %3335 = vmatmul.mubr.bf16.vlgmr.msra.gmra.mxu0 %v2173_v7 }
 0x10e   : > { %v801_v20 = vpop.f32.mrf.mxu1  ;;  %3355 = vmatmul.mubr.bf16.vlgmr.msra.gmra.mxu1 %v2304_v4  ;;  %v667_v12 = vadd.f32 %v661_v11, %v541_v46 }
 0x10f   : > { %v3096_v14 = vpop.f32.mrf.mxu0 }
 0x110   : > { %v3116_v34 = vpop.f32.mrf.mxu1  ;;  %v807_v15 = vadd.f32 %v801_v20, %v667_v12 }
 0x111   : > { %v664_v16 = vpop.f32.mrf.mxu0 }
 0x112   : > { %v804_v10 = vpop.f32.mrf.mxu1 }
 0x113   : > { %v3097_v17 = vpop.f32.mrf.mxu0  ;;  %v2891_v10 = vld [vmem:[%s4318_s2] ss:$0 sm:$0xff] }
 0x114   : > { %v3117_v13 = vpop.f32.mrf.mxu1 }
 0x12d   : > { %v924_v25 = vpop.f32.mrf.mxu0 }
 0x12e   : > { %v1077_v19 = vpop.f32.mrf.mxu1  ;;  %v930_v1 = vadd.f32 %v924_v25, %v807_v15 }
 0x12f   : > { %v3136_v27 = vpop.f32.mrf.mxu0 }
 0x130   : > { %v3156_v21 = vpop.f32.mrf.mxu1  ;;  %v1083_v28 = vadd.f32 %v1077_v19, %v930_v1 }
 0x131   : > { %v927_v23 = vpop.f32.mrf.mxu0 }
 0x132   : > { %v1080_v22 = vpop.f32.mrf.mxu1 }
 0x133   : > { %v3137_v30 = vpop.f32.mrf.mxu0 }
 0x134   : > { %v3157_v26 = vpop.f32.mrf.mxu1 }
 0x14d   : > { %v1199_v35 = vpop.f32.mrf.mxu0 }
 0x14e   : > { %v1330_v32 = vpop.f32.mrf.mxu1  ;;  %v1205_v36 = vadd.f32 %v1199_v35, %v1083_v28 }
 0x14f   : > { %v3176_v38 = vpop.f32.mrf.mxu0 }
 0x150   : > { %v3196_v33 = vpop.f32.mrf.mxu1  ;;  %v1336_v39 = vadd.f32 %v1330_v32, %v1205_v36 }
 0x151   : > { %v1202_v8 = vpop.f32.mrf.mxu0 }
 0x152   : > { %v1333_v29 = vpop.f32.mrf.mxu1 }
 0x153   : > { %v3177_v40 = vpop.f32.mrf.mxu0 }
 0x154   : > { %v3197_v31 = vpop.f32.mrf.mxu1 }
 0x16d   : > { %v1453_v43 = vpop.f32.mrf.mxu0 }
 0x16e   : > { %v1606_v41 = vpop.f32.mrf.mxu1  ;;  %v1459_v44 = vadd.f32 %v1453_v43, %v1336_v39 }
 0x16f   : > { %v3216_v18 = vpop.f32.mrf.mxu0 }
 0x170   : > { %v3236_v42 = vpop.f32.mrf.mxu1  ;;  %v1612_v46 = vadd.f32 %v1606_v41, %v1459_v44 }
 0x171   : > { %v1456_v47 = vpop.f32.mrf.mxu0 }
 0x172   : > { %v1609_v9 = vpop.f32.mrf.mxu1 }
 0x173   : > { %v3217_v48 = vpop.f32.mrf.mxu0 }
 0x174   : > { %v3237_v45 = vpop.f32.mrf.mxu1 }
 0x18d   : > { %v1728_v52 = vpop.f32.mrf.mxu0 }
 0x18e   : > { %v1859_v49 = vpop.f32.mrf.mxu1  ;;  %v1734_v63 = vadd.f32 %v1728_v52, %v1612_v46 }
 0x18f   : > { %v3256_v54 = vpop.f32.mrf.mxu0 }
 0x190   : > { %v3276_v50 = vpop.f32.mrf.mxu1  ;;  %v1865_v55 = vadd.f32 %v1859_v49, %v1734_v63 }
 0x191   : > { %v1731_v56 = vpop.f32.mrf.mxu0 }
 0x192   : > { %v1862_v51 = vpop.f32.mrf.mxu1 }
 0x193   : > { %v3257_v57 = vpop.f32.mrf.mxu0 }
 0x194   : > { %v3277_v53 = vpop.f32.mrf.mxu1 }
 0x1ad   : > { %v1982_v59 = vpop.f32.mrf.mxu0 }
 0x1ae   : > { %v2135_v58 = vpop.f32.mrf.mxu1  ;;  %v1988_v3 = vadd.f32 %v1982_v59, %v1865_v55 }
 0x1af   : > { %v3296_v0 = vpop.f32.mrf.mxu0 }
 0x1b0   : > { %v3316_v60 = vpop.f32.mrf.mxu1  ;;  %v2141_v5 = vadd.f32 %v2135_v58, %v1988_v3 }
 0x1b1   : > { %v1985_v2 = vpop.f32.mrf.mxu0 }
 0x1b2   : > { %v2138_v61 = vpop.f32.mrf.mxu1 }
 0x1b3   : > { %v3297_v37 = vpop.f32.mrf.mxu0 }
 0x1b4   : > { %v3317_v62 = vpop.f32.mrf.mxu1 }
 0x1cd   : > { %v2257_v20 = vpop.f32.mrf.mxu0 }
 0x1ce   : > { %v2388_v24 = vpop.f32.mrf.mxu1  ;;  %v2263_v7 = vadd.f32 %v2257_v20, %v2141_v5 }
 0x1cf   : > { %v3336_v11 = vpop.f32.mrf.mxu0 }
 0x1d0   : > { %v3356_v4 = vpop.f32.mrf.mxu1  ;;  %v2394_v12 = vadd.f32 %v2388_v24, %v2263_v7 }
 0x1d1   : > { %v2260_v13 = vpop.f32.mrf.mxu0 }
 0x1d2   : > { %v2391_v6 = vpop.f32.mrf.mxu1  ;;  %v2402_v14 = vadd.f32 %v2891_v10, %v2394_v12 }
 0x1d3   : > { %v3337_v15 = vpop.f32.mrf.mxu0 }
 0x1d4   : > { %v3357_v34 = vpop.f32.mrf.mxu1  ;;  %2404 = vst.msk [vmem:[%s219_s8] sm:$0xf] %vm2403_vm0, %v2402_v14 }
 0x1d5 PF: > { %s13_s14 = sadd.s32 1, %s3540_s14   ;;  %s4322_s12 = smov %s3536_s13 }
 0x1d6   : > { %p10_p5 = scmp.ge.s32.totalorder %s13_s14, 4   ;;  %s4323_s13 = smov %s4325_s15 }
 0x1d8   :  { %12 = sbr.rel (!%p10_p5) target bundleno = 2 (0x2), region = 83 }

</bundles_post_ra>
